<compile_context>
chip_gen: v7x
topology: tpu7x:2x2x1
jax: 0.10.0
libtpu: 0.0.40
codegen_flags: <defaults>
</compile_context>

<pallas_src>
import functools

import numpy as np
import jax
import jax.numpy as jnp
from jax.experimental import pallas as pl
from jax.experimental.pallas import tpu as pltpu


# Set to jnp.bfloat16 on v6e/v7x for ~2x MXU throughput (accumulation stays f32).
MATMUL_INPUT_DTYPE = jnp.float32


# ----------------------------------------------------------------------------
# sincos positional embeddings (identical math to the PyTorch module, in numpy)
# ----------------------------------------------------------------------------
def get_1d_sincos_pos_embed_from_grid(embed_dim, pos):
    assert embed_dim % 2 == 0
    omega = np.arange(embed_dim // 2, dtype=np.float32)
    omega /= embed_dim / 2.0
    omega = 1.0 / 10000 ** omega
    pos = pos.reshape(-1)
    out = np.einsum('m,d->md', pos, omega)
    emb_sin = np.sin(out)
    emb_cos = np.cos(out)
    return np.concatenate([emb_sin, emb_cos], axis=1)


def get_2d_sincos_pos_embed_from_grid(embed_dim, grid):
    assert embed_dim % 2 == 0
    emb_h = get_1d_sincos_pos_embed_from_grid(embed_dim // 2, grid[0])
    emb_w = get_1d_sincos_pos_embed_from_grid(embed_dim // 2, grid[1])
    return np.concatenate([emb_h, emb_w], axis=1)


def get_2d_sincos_pos_embed(embed_dim, grid_size_h, grid_size_w, cls_token=False):
    grid_h = np.arange(grid_size_h, dtype=np.float32)
    grid_w = np.arange(grid_size_w, dtype=np.float32)
    grid = np.meshgrid(grid_w, grid_h)
    grid = np.stack(grid, axis=0)
    grid = grid.reshape([2, 1, grid_size_h, grid_size_w])
    pos_embed = get_2d_sincos_pos_embed_from_grid(embed_dim, grid)
    if cls_token:
        pos_embed = np.concatenate([np.zeros([1, embed_dim]), pos_embed], axis=0)
    return pos_embed


# ----------------------------------------------------------------------------
# small helpers
# ----------------------------------------------------------------------------
def _pick_tile(dim, target, align):
    """Largest tile t <= target with t % align == 0 and dim % t == 0, else full dim.

    Keeps the (8, 128) last-two-dims constraint satisfied: the returned tile is
    either a multiple of `align` that divides `dim`, or the full dimension.
    """
    if dim <= target:
        return dim
    t = (target // align) * align
    while t >= align:
        if dim % t == 0:
            return t
        t -= align
    return dim


def _apply_ln(x, g, b, eps):
    mu = jnp.mean(x, axis=-1, keepdims=True)
    var = jnp.mean(jnp.square(x - mu), axis=-1, keepdims=True)
    return (x - mu) * jax.lax.rsqrt(var + eps) * g + b


def _gelu(y):
    # TODO(synk): torch nn.GELU defaults to the exact erf GELU; the tanh
    # approximation is used here for a robust Mosaic elementwise lowering.
    return jax.nn.gelu(y, approximate=True)


# ----------------------------------------------------------------------------
# Fused tiled linear: y = [residual +] act( LN(x) @ w + b )
# ----------------------------------------------------------------------------
def _fused_linear_kernel(*refs, activation, has_ln, has_res, eps, k_steps):
    it = iter(refs)
    x_ref = next(it)
    w_ref = next(it)
    b_ref = next(it)
    g_ref = next(it) if has_ln else None
    bt_ref = next(it) if has_ln else None
    r_ref = next(it) if has_res else None
    o_ref = next(it)
    acc_ref = next(it)

    k = pl.program_id(2)

    @pl.when(k == 0)
    def _():
        acc_ref[...] = jnp.zeros_like(acc_ref)

    x = x_ref[...]
    if has_ln:
        x = _apply_ln(x, g_ref[...], bt_ref[...], eps)
    acc_ref[...] += jnp.dot(x.astype(MATMUL_INPUT_DTYPE),
                            w_ref[...].astype(MATMUL_INPUT_DTYPE),
                            preferred_element_type=jnp.float32)

    @pl.when(k == k_steps - 1)
    def _():
        y = acc_ref[...] + b_ref[...]
        if activation == 'gelu':
            y = _gelu(y)
        if has_res:
            y = y + r_ref[...]
        o_ref[...] = y.astype(o_ref.dtype)


def fused_linear(x, w, b, *, activation=None, residual=None, ln=None, eps=1e-5,
                 tm=256, tn=256, tk=512):
    """x:(M,K), w:(K,N), b:(N,)  ->  (M,N).  Optional fused LN(x), GELU, residual."""
    M, K = x.shape
    N = w.shape[1]
    has_ln = ln is not None
    has_res = residual is not None

    tm_e = _pick_tile(M, tm, 8)
    tn_e = _pick_tile(N, tn, 128)
    tk_e = K if has_ln else _pick_tile(K, tk, 128)   # LN needs the full feature row
    k_steps = K // tk_e
    grid = (M // tm_e, N // tn_e, k_steps)

    in_specs = [
        pl.BlockSpec((tm_e, tk_e), lambda m, n, k: (m, k)),
        pl.BlockSpec((tk_e, tn_e), lambda m, n, k: (k, n)),
        pl.BlockSpec((1, tn_e), lambda m, n, k: (0, n)),
    ]
    args = [x, w, b.reshape(1, N)]
    if has_ln:
        g, beta = ln
        in_specs += [pl.BlockSpec((1, K), lambda m, n, k: (0, 0)),
                     pl.BlockSpec((1, K), lambda m, n, k: (0, 0))]
        args += [g.reshape(1, K), beta.reshape(1, K)]
    if has_res:
        in_specs.append(pl.BlockSpec((tm_e, tn_e), lambda m, n, k: (m, n)))
        args.append(residual)

    kernel = functools.partial(_fused_linear_kernel, activation=activation,
                               has_ln=has_ln, has_res=has_res, eps=eps,
                               k_steps=k_steps)
    flops = 2 * M * N * K
    transc = M * N if activation == 'gelu' else 0
    bytes_accessed = 4 * (M * K + K * N + M * N + (M * N if has_res else 0))

    return pl.pallas_call(
        kernel,
        out_shape=jax.ShapeDtypeStruct((M, N), jnp.float32),
        grid=grid,
        in_specs=in_specs,
        out_specs=pl.BlockSpec((tm_e, tn_e), lambda m, n, k: (m, n)),
        scratch_shapes=[pltpu.VMEM((tm_e, tn_e), jnp.float32)],
        compiler_params=pltpu.CompilerParams(
            dimension_semantics=("parallel", "parallel", "arbitrary")),
        cost_estimate=pl.CostEstimate(flops=flops, transcendentals=transc,
                                      bytes_accessed=bytes_accessed),
    )(*args)


# ----------------------------------------------------------------------------
# Stacked linear: out[s] = LN(x) @ w_stack[s] + b_stack[s]   (QKV / KV packing)
# ----------------------------------------------------------------------------
def _stacked_linear_kernel(*refs, has_ln, eps):
    if has_ln:
        x_ref, g_ref, bt_ref, w_ref, b_ref, o_ref = refs
    else:
        x_ref, w_ref, b_ref, o_ref = refs
    x = x_ref[...]
    if has_ln:
        x = _apply_ln(x, g_ref[...], bt_ref[...], eps)
    y = jnp.dot(x.astype(MATMUL_INPUT_DTYPE),
                w_ref[0].astype(MATMUL_INPUT_DTYPE),
                preferred_element_type=jnp.float32) + b_ref[0]
    o_ref[0] = y.astype(o_ref.dtype)


def stacked_linear(x, w_stack, b_stack, *, ln=None, eps=1e-5, tm=256, tn=256):
    """x:(M,K), w_stack:(S,K,N), b_stack:(S,1,N)  ->  (S,M,N).  Optional fused LN."""
    M, K = x.shape
    S, _, N = w_stack.shape
    has_ln = ln is not None
    tm_e = _pick_tile(M, tm, 8)
    tn_e = _pick_tile(N, tn, 128)
    grid = (M // tm_e, S, N // tn_e)

    in_specs = [pl.BlockSpec((tm_e, K), lambda m, s, n: (m, 0))]
    args = [x]
    if has_ln:
        g, beta = ln
        in_specs += [pl.BlockSpec((1, K), lambda m, s, n: (0, 0)),
                     pl.BlockSpec((1, K), lambda m, s, n: (0, 0))]
        args += [g.reshape(1, K), beta.reshape(1, K)]
    in_specs += [pl.BlockSpec((1, K, tn_e), lambda m, s, n: (s, 0, n)),
                 pl.BlockSpec((1, 1, tn_e), lambda m, s, n: (s, 0, n))]
    args += [w_stack, b_stack]

    kernel = functools.partial(_stacked_linear_kernel, has_ln=has_ln, eps=eps)
    flops = 2 * S * M * N * K
    bytes_accessed = 4 * (M * K + S * K * N + S * M * N)

    return pl.pallas_call(
        kernel,
        out_shape=jax.ShapeDtypeStruct((S, M, N), jnp.float32),
        grid=grid,
        in_specs=in_specs,
        out_specs=pl.BlockSpec((1, tm_e, tn_e), lambda m, s, n: (s, m, n)),
        compiler_params=pltpu.CompilerParams(
            dimension_semantics=("parallel", "parallel", "parallel")),
        cost_estimate=pl.CostEstimate(flops=flops, transcendentals=0,
                                      bytes_accessed=bytes_accessed),
    )(*args)


# ----------------------------------------------------------------------------
# Batched per-variable patch embedding (+ fused var-embedding add)
# ----------------------------------------------------------------------------
def _patch_embed_kernel(p_ref, w_ref, b_ref, ve_ref, o_ref, *, num_vars):
    for v in range(num_vars):
        y = jnp.dot(p_ref[:, v, :].astype(MATMUL_INPUT_DTYPE),
                    w_ref[v].astype(MATMUL_INPUT_DTYPE),
                    preferred_element_type=jnp.float32)
        o_ref[:, v, :] = y + b_ref[v] + ve_ref[v]


def patch_embed_pallas(patches, w, b, ve, *, tm=256):
    """patches:(M,V,pp), w:(V,pp,D), b/ve:(V,1,D)  ->  (M,V,D) with var-embed added."""
    M, V, PP = patches.shape
    D = w.shape[-1]
    tm_e = _pick_tile(M, tm, 8)
    grid = (M // tm_e,)
    kernel = functools.partial(_patch_embed_kernel, num_vars=V)
    return pl.pallas_call(
        kernel,
        out_shape=jax.ShapeDtypeStruct((M, V, D), jnp.float32),
        grid=grid,
        in_specs=[pl.BlockSpec((tm_e, V, PP), lambda m: (m, 0, 0)),
                  pl.BlockSpec((V, PP, D), lambda m: (0, 0, 0)),
                  pl.BlockSpec((V, 1, D), lambda m: (0, 0, 0)),
                  pl.BlockSpec((V, 1, D), lambda m: (0, 0, 0))],
        out_specs=pl.BlockSpec((tm_e, V, D), lambda m: (m, 0, 0)),
        compiler_params=pltpu.CompilerParams(dimension_semantics=("parallel",)),
        cost_estimate=pl.CostEstimate(flops=2 * M * V * PP * D, transcendentals=0,
                                      bytes_accessed=4 * (M * V * PP + V * PP * D + M * V * D)),
    )(patches, w, b, ve)


# ----------------------------------------------------------------------------
# Flash-style multi-head self-attention (reads the stacked (3,B,L,D) QKV buffer)
# ----------------------------------------------------------------------------
def _flash_mha_kernel(q_ref, k_ref, v_ref, o_ref, m_ref, l_ref, acc_ref,
                      *, num_heads, head_dim, scale, kv_steps):
    ki = pl.program_id(2)

    @pl.when(ki == 0)
    def _():
        m_ref[...] = jnp.full_like(m_ref, -1e30)
        l_ref[...] = jnp.zeros_like(l_ref)
        acc_ref[...] = jnp.zeros_like(acc_ref)

    q = q_ref[0, 0]          # (tq, D)
    k = k_ref[0, 0]          # (tk, D)
    v = v_ref[0, 0]          # (tk, D)

    for h in range(num_heads):
        lo = h * head_dim
        qh = q[:, lo:lo + head_dim]
        kh = k[:, lo:lo + head_dim]
        vh = v[:, lo:lo + head_dim]
        s = jax.lax.dot_general(qh, kh, (((1,), (1,)), ((), ())),
                                preferred_element_type=jnp.float32) * scale
        m_prev = m_ref[h]
        m_new = jnp.maximum(m_prev, jnp.max(s, axis=-1, keepdims=True))
        alpha = jnp.exp(m_prev - m_new)
        p = jnp.exp(s - m_new)
        l_ref[h] = alpha * l_ref[h] + jnp.sum(p, axis=-1, keepdims=True)
        acc_ref[h] = alpha * acc_ref[h] + jnp.dot(p, vh,
                                                  preferred_element_type=jnp.float32)
        m_ref[h] = m_new

    @pl.when(ki == kv_steps - 1)
    def _():
        for h in range(num_heads):
            lo = h * head_dim
            inv = pl.reciprocal(l_ref[h], approx=True)
            o_ref[0, :, lo:lo + head_dim] = (acc_ref[h] * inv).astype(o_ref.dtype)


def self_attention_pallas(qkv, num_heads, *, tq=128, tk=128):
    """qkv: (3, B, L, D) stacked projections -> (B, L, D) lane-dense attention output."""
    _, B, L, D = qkv.shape
    hd = D // num_heads
    tq_e = _pick_tile(L, tq, 8)
    tk_e = _pick_tile(L, tk, 8)
    kv_steps = L // tk_e
    grid = (B, L // tq_e, kv_steps)
    scale = 1.0 / float(np.sqrt(hd))
    kernel = functools.partial(_flash_mha_kernel, num_heads=num_heads,
                               head_dim=hd, scale=scale, kv_steps=kv_steps)
    return pl.pallas_call(
        kernel,
        out_shape=jax.ShapeDtypeStruct((B, L, D), jnp.float32),
        grid=grid,
        in_specs=[pl.BlockSpec((1, 1, tq_e, D), lambda b, qi, ki: (0, b, qi, 0)),
                  pl.BlockSpec((1, 1, tk_e, D), lambda b, qi, ki: (1, b, ki, 0)),
                  pl.BlockSpec((1, 1, tk_e, D), lambda b, qi, ki: (2, b, ki, 0))],
        out_specs=pl.BlockSpec((1, tq_e, D), lambda b, qi, ki: (b, qi, 0)),
        scratch_shapes=[pltpu.VMEM((num_heads, tq_e, 1), jnp.float32),
                        pltpu.VMEM((num_heads, tq_e, 1), jnp.float32),
                        pltpu.VMEM((num_heads, tq_e, hd), jnp.float32)],
        compiler_params=pltpu.CompilerParams(
            dimension_semantics=("parallel", "parallel", "arbitrary")),
    )(qkv, qkv, qkv)


# ----------------------------------------------------------------------------
# Variable-aggregation cross-attention (shared single query, V keys per group)
# ----------------------------------------------------------------------------
def _var_agg_kernel(q_ref, k_ref, v_ref, o_ref, *, num_heads, head_dim, scale):
    q = q_ref[...]           # (1, D)
    k = k_ref[0]             # (tg, V, D)
    v = v_ref[0]             # (tg, V, D)
    for h in range(num_heads):
        lo = h * head_dim
        qh = q[:, lo:lo + head_dim]                  # (1, hd)
        kh = k[:, :, lo:lo + head_dim]               # (tg, V, hd)
        vh = v[:, :, lo:lo + head_dim]               # (tg, V, hd)
        s = jnp.sum(kh * qh[:, None, :], axis=-1) * scale      # (tg, V)
        s = s - jnp.max(s, axis=-1, keepdims=True)
        e = jnp.exp(s)
        p = e * pl.reciprocal(jnp.sum(e, axis=-1, keepdims=True), approx=True)
        o_ref[:, lo:lo + head_dim] = jnp.sum(p[:, :, None] * vh, axis=1)


def var_agg_attention_pallas(q_vec, kv, num_heads, *, tg=256):
    """q_vec:(1,D) shared query, kv:(2,G,V,D) stacked keys/values -> (G,D)."""
    _, G, V, D = kv.shape
    hd = D // num_heads
    tg_e = _pick_tile(G, tg, 8)
    grid = (G // tg_e,)
    scale = 1.0 / float(np.sqrt(hd))
    kernel = functools.partial(_var_agg_kernel, num_heads=num_heads,
                               head_dim=hd, scale=scale)
    return pl.pallas_call(
        kernel,
        out_shape=jax.ShapeDtypeStruct((G, D), jnp.float32),
        grid=grid,
        in_specs=[pl.BlockSpec((1, D), lambda g: (0, 0)),
                  pl.BlockSpec((1, tg_e, V, D), lambda g: (0, g, 0, 0)),
                  pl.BlockSpec((1, tg_e, V, D), lambda g: (1, g, 0, 0))],
        out_specs=pl.BlockSpec((tg_e, D), lambda g: (g, 0)),
        compiler_params=pltpu.CompilerParams(dimension_semantics=("parallel",)),
    )(q_vec, kv, kv)


# ----------------------------------------------------------------------------
# Model building blocks
# ----------------------------------------------------------------------------
def block_forward(xf, bp, num_heads, B, L):
    """timm-style Block on flat (M, D) tokens: x + Attn(LN(x)); x + MLP(LN(x))."""
    M, D = xf.shape
    # LN1 + QKV fused into one stacked-matmul kernel -> (3, M, D)
    qkv = stacked_linear(xf, bp['qkv_w'], bp['qkv_b'], ln=(bp['ln1_g'], bp['ln1_b']))
    attn = self_attention_pallas(qkv.reshape(3, B, L, D), num_heads)       # (B, L, D)
    # out-projection with the residual add fused in
    xf = fused_linear(attn.reshape(M, D), bp['proj_w'], bp['proj_b'], residual=xf)
    # LN2 + fc1 + GELU fused; fc2 with residual fused
    h = fused_linear(xf, bp['fc1_w'], bp['fc1_b'], activation='gelu',
                     ln=(bp['ln2_g'], bp['ln2_b']))
    xf = fused_linear(h, bp['fc2_w'], bp['fc2_b'], residual=xf)
    return xf


def vit_forward(params, x, lead_times, cfg):
    """Full ViT.forward.  x: (B, in_channels, H, W) -> (B, H, W, out_channels)."""
    B, V, H, W = x.shape
    p = cfg['patch_size']
    D = cfg['embed_dim']
    nh = cfg['num_heads']
    out_c = cfg['out_channels']
    hh, ww = H // p, W // p
    L = hh * ww
    M = B * L

    # ---- per-variable patch embedding (Conv2d(1,D,k=p,s=p) == patch matmul), batched
    patches = x.reshape(B, V, hh, p, ww, p).transpose(0, 2, 4, 1, 3, 5)
    patches = patches.reshape(M, V, p * p)
    xa = patch_embed_pallas(patches, params['token_embed_w'],
                            params['token_embed_b'], params['var_embed'])   # (M, V, D)

    # ---- aggregate variables: cross-attention with the learned var_query
    q_vec = fused_linear(params['var_query'].reshape(1, D),
                         params['agg']['wq'], params['agg']['bq'])          # (1, D)
    kv = stacked_linear(xa.reshape(M * V, D),
                        params['agg']['kv_w'], params['agg']['kv_b'])       # (2, M*V, D)
    agg = var_agg_attention_pallas(q_vec, kv.reshape(2, M, V, D), nh)       # (M, D)

    # ---- out-projection with (pos_embed + lead-time embedding) fused as residual
    lt = fused_linear(lead_times[:, 0:1], params['lt_w'], params['lt_b'])   # (B, D)
    resid = (params['pos_embed'] + lt[:, None, :]).reshape(M, D)
    xf = fused_linear(agg, params['agg']['wo'], params['agg']['bo'], residual=resid)

    # ---- transformer blocks (dropout / drop_path are identity: rates are 0)
    for bp in params['blocks']:
        xf = block_forward(xf, bp, nh, B, L)

    # ---- decoder head; the final LayerNorm is fused into the first head linear
    heads = params['head']
    w0, b0 = heads[0]
    act0 = 'gelu' if len(heads) > 1 else None
    h = fused_linear(xf, w0, b0, activation=act0,
                     ln=(params['norm_g'], params['norm_b']))
    for (w, b) in heads[1:-1]:
        h = fused_linear(h, w, b, activation='gelu')
    if len(heads) > 1:
        w, b = heads[-1]
        h = fused_linear(h, w, b)

    # ---- unpatchify: (M, p*p*c) -> (B, H, W, c)  (== unpatchify + permute(0,2,3,1))
    y = h.reshape(B, hh, ww, p, p, out_c)
    y = y.transpose(0, 1, 3, 2, 4, 5).reshape(B, hh * p, ww * p, out_c)
    return y


# ----------------------------------------------------------------------------
# Deterministic synthetic parameter init (mirrors the shapes in ViT.__init__)
# ----------------------------------------------------------------------------
def init_params(key, *, in_channels, out_channels, embed_dim, img_size, patch_size,
                depth, decoder_depth, num_heads, mlp_ratio):
    V, D, p = in_channels, embed_dim, patch_size
    hh, ww = img_size[0] // p, img_size[1] // p
    hidden = int(D * mlp_ratio)
    keys = iter(jax.random.split(key, 1024))

    def nrm(shape, std=0.02):      # trunc_normal_(std=0.02) approximated by normal
        return jax.random.normal(next(keys), shape, jnp.float32) * std

    zeros = lambda s: jnp.zeros(s, jnp.float32)
    ones = lambda s: jnp.ones(s, jnp.float32)

    params = {
        'token_embed_w': nrm((V, p * p, D)),
        'token_embed_b': zeros((V, 1, D)),
        'var_embed': jnp.asarray(
            get_1d_sincos_pos_embed_from_grid(D, np.arange(V)),
            jnp.float32).reshape(V, 1, D),
        'pos_embed': jnp.asarray(
            get_2d_sincos_pos_embed(D, hh, ww), jnp.float32)[None],          # (1, L, D)
        'var_query': zeros((1, 1, D)),         # nn.Parameter(zeros), never re-init
        'agg': dict(wq=nrm((D, D)), bq=zeros((D,)),
                    kv_w=nrm((2, D, D)), kv_b=zeros((2, 1, D)),
                    wo=nrm((D, D)), bo=zeros((D,))),
        'lt_w': nrm((1, D)), 'lt_b': zeros((D,)),
        'norm_g': ones((D,)), 'norm_b': zeros((D,)),
    }
    blocks = []
    for _ in range(depth):
        blocks.append(dict(
            ln1_g=ones((D,)), ln1_b=zeros((D,)),
            qkv_w=nrm((3, D, D)), qkv_b=zeros((3, 1, D)),
            proj_w=nrm((D, D)), proj_b=zeros((D,)),
            ln2_g=ones((D,)), ln2_b=zeros((D,)),
            fc1_w=nrm((D, hidden)), fc1_b=zeros((hidden,)),
            fc2_w=nrm((hidden, D)), fc2_b=zeros((D,)),
        ))
    params['blocks'] = blocks
    head = [(nrm((D, D)), zeros((D,))) for _ in range(decoder_depth)]
    head.append((nrm((D, out_channels * p * p)), zeros((out_channels * p * p,))))
    params['head'] = head
    return params


# ----------------------------------------------------------------------------
if __name__ == "__main__":
    B = 2
    in_channels = 4
    out_channels = 3
    h_channels = 32           # embed_dim
    img_size = [16, 16]
    patch_size = 8
    depth = 2
    decoder_depth = 2
    num_heads = 4
    mlp_ratio = 4.0

    key = jax.random.PRNGKey(0)
    kx, kp = jax.random.split(key)
    x = jax.random.normal(kx, (B, in_channels, img_size[0], img_size[1]), jnp.float32)
    lead_times = jnp.ones((B, 1), jnp.float32)    # forward() default: ones

    params = init_params(
        kp, in_channels=in_channels, out_channels=out_channels, embed_dim=h_channels,
        img_size=img_size, patch_size=patch_size, depth=depth,
        decoder_depth=decoder_depth, num_heads=num_heads, mlp_ratio=mlp_ratio)

    cfg = dict(patch_size=patch_size, embed_dim=h_channels,
               num_heads=num_heads, out_channels=out_channels)

    fwd = jax.jit(functools.partial(vit_forward, cfg=cfg))
    out = fwd(params, x, lead_times)
    out = jax.block_until_ready(out)

    assert out.shape == (B, img_size[0], img_size[1], out_channels), out.shape
    assert out.dtype == jnp.float32
    assert bool(jnp.all(jnp.isfinite(out)))
    print("KERNEL_OK")
</pallas_src>

<mosaic_0001>
module attributes {stable_mosaic.version = 11 : i64} {
  func.func @_stacked_linear_kernel(%arg0: i32, %arg1: i32, %arg2: i32, %arg3: memref<32x32xf32, #tpu.memory_space<vmem>>, %arg4: memref<1x32x32xf32, #tpu.memory_space<vmem>>, %arg5: memref<1x1x32xf32, #tpu.memory_space<vmem>>, %arg6: memref<1x32x32xf32, #tpu.memory_space<vmem>>) attributes {dimension_semantics = [#tpu.dimension_semantics<parallel>, #tpu.dimension_semantics<parallel>, #tpu.dimension_semantics<parallel>], iteration_bounds = array<i64: 1, 2, 1>, scalar_prefetch = 0 : i64, scratch_operands = 0 : i64, tpu.core_type = #tpu.core_type<tc>, window_params = [{transform_indices = @transform_0, window_bounds = array<i64: 32, 32>}, {transform_indices = @transform_1, window_bounds = array<i64: 1, 32, 32>}, {transform_indices = @transform_2, window_bounds = array<i64: 1, 1, 32>}, {transform_indices = @transform_3, window_bounds = array<i64: 1, 32, 32>}]} {
    %c0 = arith.constant 0 : index
    %c0_0 = arith.constant 0 : index
    %0 = vector.load %arg3[%c0, %c0_0] : memref<32x32xf32, #tpu.memory_space<vmem>>, vector<32x32xf32>
    %c0_1 = arith.constant 0 : index
    %c0_2 = arith.constant 0 : index
    %c0_3 = arith.constant 0 : index
    %1 = vector.load %arg4[%c0_1, %c0_2, %c0_3] : memref<1x32x32xf32, #tpu.memory_space<vmem>>, vector<1x32x32xf32>
    %2 = vector.shape_cast %1 : vector<1x32x32xf32> to vector<32x32xf32>
    %cst = arith.constant dense<0.000000e+00> : vector<32x32xf32>
    %3 = tpu.matmul %0, %2, %cst {dimension_numbers = #tpu.dot_dimension_numbers<[1], [0], [0], [1], [0, 0, 1, 1], [], []>} : vector<32x32xf32>, vector<32x32xf32>, vector<32x32xf32> -> vector<32x32xf32>
    %c0_4 = arith.constant 0 : index
    %c0_5 = arith.constant 0 : index
    %c0_6 = arith.constant 0 : index
    %4 = vector.load %arg5[%c0_4, %c0_5, %c0_6] : memref<1x1x32xf32, #tpu.memory_space<vmem>>, vector<1x1x32xf32>
    %5 = vector.shape_cast %4 : vector<1x1x32xf32> to vector<1x32xf32>
    %6 = vector.broadcast %5 : vector<1x32xf32> to vector<32x32xf32>
    %7 = arith.addf %3, %6 : vector<32x32xf32>
    %c0_7 = arith.constant 0 : index
    %c0_8 = arith.constant 0 : index
    %c0_9 = arith.constant 0 : index
    %8 = vector.load %arg6[%c0_7, %c0_8, %c0_9] : memref<1x32x32xf32, #tpu.memory_space<vmem>>, vector<1x32x32xf32>
    %9 = vector.shape_cast %8 : vector<1x32x32xf32> to vector<32x32xf32>
    %10 = vector.shape_cast %7 : vector<32x32xf32> to vector<1x32x32xf32>
    tpu.vector_store %arg6[%c0_7, %c0_8, %c0_9], %10 {strides = array<i32>} : memref<1x32x32xf32, #tpu.memory_space<vmem>>, vector<1x32x32xf32>,
    return
  }
  func.func @transform_0(%arg0: i32, %arg1: i32, %arg2: i32) -> (i32, i32) {
    %c0_i32 = arith.constant 0 : i32
    %c0_i32_0 = arith.constant 0 : i32
    return %arg0, %c0_i32 : i32, i32
  }
  func.func @transform_1(%arg0: i32, %arg1: i32, %arg2: i32) -> (i32, i32, i32) {
    %c0_i32 = arith.constant 0 : i32
    %c0_i32_0 = arith.constant 0 : i32
    return %arg1, %c0_i32, %arg2 : i32, i32, i32
  }
  func.func @transform_2(%arg0: i32, %arg1: i32, %arg2: i32) -> (i32, i32, i32) {
    %c0_i32 = arith.constant 0 : i32
    %c0_i32_0 = arith.constant 0 : i32
    return %arg1, %c0_i32, %arg2 : i32, i32, i32
  }
  func.func @transform_3(%arg0: i32, %arg1: i32, %arg2: i32) -> (i32, i32, i32) {
    %c0_i32 = arith.constant 0 : i32
    return %arg1, %arg0, %arg2 : i32, i32, i32
  }
}

module attributes {stable_mosaic.version = 11 : i64} {
  func.func @_patch_embed_kernel(%arg0: i32, %arg1: memref<8x4x64xf32, #tpu.memory_space<vmem>>, %arg2: memref<4x64x32xf32, #tpu.memory_space<vmem>>, %arg3: memref<4x1x32xf32, #tpu.memory_space<vmem>>, %arg4: memref<4x1x32xf32, #tpu.memory_space<vmem>>, %arg5: memref<8x4x32xf32, #tpu.memory_space<vmem>>) attributes {dimension_semantics = [#tpu.dimension_semantics<parallel>], iteration_bounds = array<i64: 1>, scalar_prefetch = 0 : i64, scratch_operands = 0 : i64, tpu.core_type = #tpu.core_type<tc>, window_params = [{transform_indices = @transform_0, window_bounds = array<i64: 8, 4, 64>}, {pipeline_mode = #tpu.pipeline_mode<synchronous>, transform_indices = @transform_1, window_bounds = array<i64: 4, 64, 32>}, {pipeline_mode = #tpu.pipeline_mode<synchronous>, transform_indices = @transform_2, window_bounds = array<i64: 4, 1, 32>}, {pipeline_mode = #tpu.pipeline_mode<synchronous>, transform_indices = @transform_3, window_bounds = array<i64: 4, 1, 32>}, {transform_indices = @transform_4, window_bounds = array<i64: 8, 4, 32>}]} {
    %c0 = arith.constant 0 : index
    %c0_0 = arith.constant 0 : index
    %c0_1 = arith.constant 0 : index
    %0 = vector.load %arg1[%c0, %c0_0, %c0_1] : memref<8x4x64xf32, #tpu.memory_space<vmem>>, vector<8x1x64xf32>
    %1 = vector.shape_cast %0 : vector<8x1x64xf32> to vector<8x64xf32>
    %c0_2 = arith.constant 0 : index
    %c0_3 = arith.constant 0 : index
    %c0_4 = arith.constant 0 : index
    %2 = vector.load %arg2[%c0_2, %c0_3, %c0_4] : memref<4x64x32xf32, #tpu.memory_space<vmem>>, vector<1x64x32xf32>
    %3 = vector.shape_cast %2 : vector<1x64x32xf32> to vector<64x32xf32>
    %cst = arith.constant dense<0.000000e+00> : vector<8x32xf32>
    %4 = tpu.matmul %1, %3, %cst {dimension_numbers = #tpu.dot_dimension_numbers<[1], [0], [0], [1], [0, 0, 1, 1], [], []>} : vector<8x64xf32>, vector<64x32xf32>, vector<8x32xf32> -> vector<8x32xf32>
    %c0_5 = arith.constant 0 : index
    %c0_6 = arith.constant 0 : index
    %c0_7 = arith.constant 0 : index
    %5 = vector.load %arg3[%c0_5, %c0_6, %c0_7] : memref<4x1x32xf32, #tpu.memory_space<vmem>>, vector<1x1x32xf32>
    %6 = vector.shape_cast %5 : vector<1x1x32xf32> to vector<1x32xf32>
    %7 = vector.broadcast %6 : vector<1x32xf32> to vector<8x32xf32>
    %8 = arith.addf %4, %7 : vector<8x32xf32>
    %c0_8 = arith.constant 0 : index
    %c0_9 = arith.constant 0 : index
    %c0_10 = arith.constant 0 : index
    %9 = vector.load %arg4[%c0_8, %c0_9, %c0_10] : memref<4x1x32xf32, #tpu.memory_space<vmem>>, vector<1x1x32xf32>
    %10 = vector.shape_cast %9 : vector<1x1x32xf32> to vector<1x32xf32>
    %11 = vector.broadcast %10 : vector<1x32xf32> to vector<8x32xf32>
    %12 = arith.addf %8, %11 : vector<8x32xf32>
    %c0_11 = arith.constant 0 : index
    %c0_12 = arith.constant 0 : index
    %c0_13 = arith.constant 0 : index
    %13 = vector.load %arg5[%c0_11, %c0_12, %c0_13] : memref<8x4x32xf32, #tpu.memory_space<vmem>>, vector<8x1x32xf32>
    %14 = vector.shape_cast %13 : vector<8x1x32xf32> to vector<8x32xf32>
    %15 = vector.shape_cast %12 : vector<8x32xf32> to vector<8x1x32xf32>
    tpu.vector_store %arg5[%c0_11, %c0_12, %c0_13], %15 {strides = array<i32>} : memref<8x4x32xf32, #tpu.memory_space<vmem>>, vector<8x1x32xf32>,
    %c0_14 = arith.constant 0 : index
    %c1 = arith.constant 1 : index
    %c0_15 = arith.constant 0 : index
    %16 = vector.load %arg1[%c0_14, %c1, %c0_15] : memref<8x4x64xf32, #tpu.memory_space<vmem>>, vector<8x1x64xf32>
    %17 = vector.shape_cast %16 : vector<8x1x64xf32> to vector<8x64xf32>
    %c1_16 = arith.constant 1 : index
    %c0_17 = arith.constant 0 : index
    %c0_18 = arith.constant 0 : index
    %18 = vector.load %arg2[%c1_16, %c0_17, %c0_18] : memref<4x64x32xf32, #tpu.memory_space<vmem>>, vector<1x64x32xf32>
    %19 = vector.shape_cast %18 : vector<1x64x32xf32> to vector<64x32xf32>
    %cst_19 = arith.constant dense<0.000000e+00> : vector<8x32xf32>
    %20 = tpu.matmul %17, %19, %cst_19 {dimension_numbers = #tpu.dot_dimension_numbers<[1], [0], [0], [1], [0, 0, 1, 1], [], []>} : vector<8x64xf32>, vector<64x32xf32>, vector<8x32xf32> -> vector<8x32xf32>
    %c1_20 = arith.constant 1 : index
    %c0_21 = arith.constant 0 : index
    %c0_22 = arith.constant 0 : index
    %21 = vector.load %arg3[%c1_20, %c0_21, %c0_22] : memref<4x1x32xf32, #tpu.memory_space<vmem>>, vector<1x1x32xf32>
    %22 = vector.shape_cast %21 : vector<1x1x32xf32> to vector<1x32xf32>
    %23 = vector.broadcast %22 : vector<1x32xf32> to vector<8x32xf32>
    %24 = arith.addf %20, %23 : vector<8x32xf32>
    %c1_23 = arith.constant 1 : index
    %c0_24 = arith.constant 0 : index
    %c0_25 = arith.constant 0 : index
    %25 = vector.load %arg4[%c1_23, %c0_24, %c0_25] : memref<4x1x32xf32, #tpu.memory_space<vmem>>, vector<1x1x32xf32>
    %26 = vector.shape_cast %25 : vector<1x1x32xf32> to vector<1x32xf32>
    %27 = vector.broadcast %26 : vector<1x32xf32> to vector<8x32xf32>
    %28 = arith.addf %24, %27 : vector<8x32xf32>
    %c0_26 = arith.constant 0 : index
    %c1_27 = arith.constant 1 : index
    %c0_28 = arith.constant 0 : index
    %29 = vector.load %arg5[%c0_26, %c1_27, %c0_28] : memref<8x4x32xf32, #tpu.memory_space<vmem>>, vector<8x1x32xf32>
    %30 = vector.shape_cast %29 : vector<8x1x32xf32> to vector<8x32xf32>
    %31 = vector.shape_cast %28 : vector<8x32xf32> to vector<8x1x32xf32>
    tpu.vector_store %arg5[%c0_26, %c1_27, %c0_28], %31 {strides = array<i32>} : memref<8x4x32xf32, #tpu.memory_space<vmem>>, vector<8x1x32xf32>,
    %c0_29 = arith.constant 0 : index
    %c2 = arith.constant 2 : index
    %c0_30 = arith.constant 0 : index
    %32 = vector.load %arg1[%c0_29, %c2, %c0_30] : memref<8x4x64xf32, #tpu.memory_space<vmem>>, vector<8x1x64xf32>
    %33 = vector.shape_cast %32 : vector<8x1x64xf32> to vector<8x64xf32>
    %c2_31 = arith.constant 2 : index
    %c0_32 = arith.constant 0 : index
    %c0_33 = arith.constant 0 : index
    %34 = vector.load %arg2[%c2_31, %c0_32, %c0_33] : memref<4x64x32xf32, #tpu.memory_space<vmem>>, vector<1x64x32xf32>
    %35 = vector.shape_cast %34 : vector<1x64x32xf32> to vector<64x32xf32>
    %cst_34 = arith.constant dense<0.000000e+00> : vector<8x32xf32>
    %36 = tpu.matmul %33, %35, %cst_34 {dimension_numbers = #tpu.dot_dimension_numbers<[1], [0], [0], [1], [0, 0, 1, 1], [], []>} : vector<8x64xf32>, vector<64x32xf32>, vector<8x32xf32> -> vector<8x32xf32>
    %c2_35 = arith.constant 2 : index
    %c0_36 = arith.constant 0 : index
    %c0_37 = arith.constant 0 : index
    %37 = vector.load %arg3[%c2_35, %c0_36, %c0_37] : memref<4x1x32xf32, #tpu.memory_space<vmem>>, vector<1x1x32xf32>
    %38 = vector.shape_cast %37 : vector<1x1x32xf32> to vector<1x32xf32>
    %39 = vector.broadcast %38 : vector<1x32xf32> to vector<8x32xf32>
    %40 = arith.addf %36, %39 : vector<8x32xf32>
    %c2_38 = arith.constant 2 : index
    %c0_39 = arith.constant 0 : index
    %c0_40 = arith.constant 0 : index
    %41 = vector.load %arg4[%c2_38, %c0_39, %c0_40] : memref<4x1x32xf32, #tpu.memory_space<vmem>>, vector<1x1x32xf32>
    %42 = vector.shape_cast %41 : vector<1x1x32xf32> to vector<1x32xf32>
    %43 = vector.broadcast %42 : vector<1x32xf32> to vector<8x32xf32>
    %44 = arith.addf %40, %43 : vector<8x32xf32>
    %c0_41 = arith.constant 0 : index
    %c2_42 = arith.constant 2 : index
    %c0_43 = arith.constant 0 : index
    %45 = vector.load %arg5[%c0_41, %c2_42, %c0_43] : memref<8x4x32xf32, #tpu.memory_space<vmem>>, vector<8x1x32xf32>
    %46 = vector.shape_cast %45 : vector<8x1x32xf32> to vector<8x32xf32>
    %47 = vector.shape_cast %44 : vector<8x32xf32> to vector<8x1x32xf32>
    tpu.vector_store %arg5[%c0_41, %c2_42, %c0_43], %47 {strides = array<i32>} : memref<8x4x32xf32, #tpu.memory_space<vmem>>, vector<8x1x32xf32>,
    %c0_44 = arith.constant 0 : index
    %c3 = arith.constant 3 : index
    %c0_45 = arith.constant 0 : index
    %48 = vector.load %arg1[%c0_44, %c3, %c0_45] : memref<8x4x64xf32, #tpu.memory_space<vmem>>, vector<8x1x64xf32>
    %49 = vector.shape_cast %48 : vector<8x1x64xf32> to vector<8x64xf32>
    %c3_46 = arith.constant 3 : index
    %c0_47 = arith.constant 0 : index
    %c0_48 = arith.constant 0 : index
    %50 = vector.load %arg2[%c3_46, %c0_47, %c0_48] : memref<4x64x32xf32, #tpu.memory_space<vmem>>, vector<1x64x32xf32>
    %51 = vector.shape_cast %50 : vector<1x64x32xf32> to vector<64x32xf32>
    %cst_49 = arith.constant dense<0.000000e+00> : vector<8x32xf32>
    %52 = tpu.matmul %49, %51, %cst_49 {dimension_numbers = #tpu.dot_dimension_numbers<[1], [0], [0], [1], [0, 0, 1, 1], [], []>} : vector<8x64xf32>, vector<64x32xf32>, vector<8x32xf32> -> vector<8x32xf32>
    %c3_50 = arith.constant 3 : index
    %c0_51 = arith.constant 0 : index
    %c0_52 = arith.constant 0 : index
    %53 = vector.load %arg3[%c3_50, %c0_51, %c0_52] : memref<4x1x32xf32, #tpu.memory_space<vmem>>, vector<1x1x32xf32>
    %54 = vector.shape_cast %53 : vector<1x1x32xf32> to vector<1x32xf32>
    %55 = vector.broadcast %54 : vector<1x32xf32> to vector<8x32xf32>
    %56 = arith.addf %52, %55 : vector<8x32xf32>
    %c3_53 = arith.constant 3 : index
    %c0_54 = arith.constant 0 : index
    %c0_55 = arith.constant 0 : index
    %57 = vector.load %arg4[%c3_53, %c0_54, %c0_55] : memref<4x1x32xf32, #tpu.memory_space<vmem>>, vector<1x1x32xf32>
    %58 = vector.shape_cast %57 : vector<1x1x32xf32> to vector<1x32xf32>
    %59 = vector.broadcast %58 : vector<1x32xf32> to vector<8x32xf32>
    %60 = arith.addf %56, %59 : vector<8x32xf32>
    %c0_56 = arith.constant 0 : index
    %c3_57 = arith.constant 3 : index
    %c0_58 = arith.constant 0 : index
    %61 = vector.load %arg5[%c0_56, %c3_57, %c0_58] : memref<8x4x32xf32, #tpu.memory_space<vmem>>, vector<8x1x32xf32>
    %62 = vector.shape_cast %61 : vector<8x1x32xf32> to vector<8x32xf32>
    %63 = vector.shape_cast %60 : vector<8x32xf32> to vector<8x1x32xf32>
    tpu.vector_store %arg5[%c0_56, %c3_57, %c0_58], %63 {strides = array<i32>} : memref<8x4x32xf32, #tpu.memory_space<vmem>>, vector<8x1x32xf32>,
    return
  }
  func.func @transform_0(%arg0: i32) -> (i32, i32, i32) {
    %c0_i32 = arith.constant 0 : i32
    %c0_i32_0 = arith.constant 0 : i32
    %c0_i32_1 = arith.constant 0 : i32
    return %arg0, %c0_i32, %c0_i32_0 : i32, i32, i32
  }
  func.func @transform_1(%arg0: i32) -> (i32, i32, i32) {
    %c0_i32 = arith.constant 0 : i32
    %c0_i32_0 = arith.constant 0 : i32
    %c0_i32_1 = arith.constant 0 : i32
    %c0_i32_2 = arith.constant 0 : i32
    return %c0_i32, %c0_i32_0, %c0_i32_1 : i32, i32, i32
  }
  func.func @transform_2(%arg0: i32) -> (i32, i32, i32) {
    %c0_i32 = arith.constant 0 : i32
    %c0_i32_0 = arith.constant 0 : i32
    %c0_i32_1 = arith.constant 0 : i32
    %c0_i32_2 = arith.constant 0 : i32
    return %c0_i32, %c0_i32_0, %c0_i32_1 : i32, i32, i32
  }
  func.func @transform_3(%arg0: i32) -> (i32, i32, i32) {
    %c0_i32 = arith.constant 0 : i32
    %c0_i32_0 = arith.constant 0 : i32
    %c0_i32_1 = arith.constant 0 : i32
    %c0_i32_2 = arith.constant 0 : i32
    return %c0_i32, %c0_i32_0, %c0_i32_1 : i32, i32, i32
  }
  func.func @transform_4(%arg0: i32) -> (i32, i32, i32) {
    %c0_i32 = arith.constant 0 : i32
    %c0_i32_0 = arith.constant 0 : i32
    %c0_i32_1 = arith.constant 0 : i32
    return %arg0, %c0_i32, %c0_i32_0 : i32, i32, i32
  }
}

module attributes {stable_mosaic.version = 11 : i64} {
  func.func @_fused_linear_kernel(%arg0: i32, %arg1: i32, %arg2: i32, %arg3: memref<1x32xf32, #tpu.memory_space<vmem>>, %arg4: memref<32x32xf32, #tpu.memory_space<vmem>>, %arg5: memref<1x32xf32, #tpu.memory_space<vmem>>, %arg6: memref<1x32xf32, #tpu.memory_space<vmem>>, %arg7: memref<1x32xf32, #tpu.memory_space<vmem>>) attributes {dimension_semantics = [#tpu.dimension_semantics<parallel>, #tpu.dimension_semantics<parallel>, #tpu.dimension_semantics<arbitrary>], iteration_bounds = array<i64: 1, 1, 1>, scalar_prefetch = 0 : i64, scratch_operands = 1 : i64, tpu.core_type = #tpu.core_type<tc>, window_params = [{transform_indices = @transform_0, window_bounds = array<i64: 1, 32>}, {transform_indices = @transform_1, window_bounds = array<i64: 32, 32>}, {transform_indices = @transform_2, window_bounds = array<i64: 1, 32>}, {transform_indices = @transform_3, window_bounds = array<i64: 1, 32>}]} {
    %c0_i32 = arith.constant 0 : i32
    %0 = arith.cmpi eq, %arg2, %c0_i32 : i32
    %1 = arith.extui %0 : i1 to i32
    %c0_i32_0 = arith.constant 0 : i32
    %2 = arith.cmpi ne, %1, %c0_i32_0 : i32
    scf.if %2 {
      %cst_10 = arith.constant 0.000000e+00 : f32
      %12 = vector.broadcast %cst_10 : f32 to vector<1x32xf32>
      %c0_11 = arith.constant 0 : index
      %c0_12 = arith.constant 0 : index
      %13 = vector.load %arg7[%c0_11, %c0_12] : memref<1x32xf32, #tpu.memory_space<vmem>>, vector<1x32xf32>
      tpu.vector_store %arg7[%c0_11, %c0_12], %12 {strides = array<i32>} : memref<1x32xf32, #tpu.memory_space<vmem>>, vector<1x32xf32>,
    } else {
    }
    %c0 = arith.constant 0 : index
    %c0_1 = arith.constant 0 : index
    %3 = vector.load %arg3[%c0, %c0_1] : memref<1x32xf32, #tpu.memory_space<vmem>>, vector<1x32xf32>
    %c0_2 = arith.constant 0 : index
    %c0_3 = arith.constant 0 : index
    %4 = vector.load %arg7[%c0_2, %c0_3] : memref<1x32xf32, #tpu.memory_space<vmem>>, vector<1x32xf32>
    %c0_4 = arith.constant 0 : index
    %c0_5 = arith.constant 0 : index
    %5 = vector.load %arg4[%c0_4, %c0_5] : memref<32x32xf32, #tpu.memory_space<vmem>>, vector<32x32xf32>
    %cst = arith.constant dense<0.000000e+00> : vector<1x32xf32>
    %6 = tpu.matmul %3, %5, %cst {dimension_numbers = #tpu.dot_dimension_numbers<[1], [0], [0], [1], [0, 0, 1, 1], [], []>} : vector<1x32xf32>, vector<32x32xf32>, vector<1x32xf32> -> vector<1x32xf32>
    %7 = arith.addf %4, %6 : vector<1x32xf32>
    %c0_6 = arith.constant 0 : index
    %c0_7 = arith.constant 0 : index
    %8 = vector.load %arg7[%c0_6, %c0_7] : memref<1x32xf32, #tpu.memory_space<vmem>>, vector<1x32xf32>
    tpu.vector_store %arg7[%c0_6, %c0_7], %7 {strides = array<i32>} : memref<1x32xf32, #tpu.memory_space<vmem>>, vector<1x32xf32>,
    %c0_i32_8 = arith.constant 0 : i32
    %9 = arith.cmpi eq, %arg2, %c0_i32_8 : i32
    %10 = arith.extui %9 : i1 to i32
    %c0_i32_9 = arith.constant 0 : i32
    %11 = arith.cmpi ne, %10, %c0_i32_9 : i32
    scf.if %11 {
      %c0_10 = arith.constant 0 : index
      %c0_11 = arith.constant 0 : index
      %12 = vector.load %arg7[%c0_10, %c0_11] : memref<1x32xf32, #tpu.memory_space<vmem>>, vector<1x32xf32>
      %c0_12 = arith.constant 0 : index
      %c0_13 = arith.constant 0 : index
      %13 = vector.load %arg5[%c0_12, %c0_13] : memref<1x32xf32, #tpu.memory_space<vmem>>, vector<1x32xf32>
      %14 = arith.addf %12, %13 : vector<1x32xf32>
      %c0_14 = arith.constant 0 : index
      %c0_15 = arith.constant 0 : index
      %15 = vector.load %arg6[%c0_14, %c0_15] : memref<1x32xf32, #tpu.memory_space<vmem>>, vector<1x32xf32>
      tpu.vector_store %arg6[%c0_14, %c0_15], %14 {strides = array<i32>} : memref<1x32xf32, #tpu.memory_space<vmem>>, vector<1x32xf32>,
    } else {
    }
    return
  }
  func.func @transform_0(%arg0: i32, %arg1: i32, %arg2: i32) -> (i32, i32) {
    %c0_i32 = arith.constant 0 : i32
    return %arg0, %arg2 : i32, i32
  }
  func.func @transform_1(%arg0: i32, %arg1: i32, %arg2: i32) -> (i32, i32) {
    %c0_i32 = arith.constant 0 : i32
    return %arg2, %arg1 : i32, i32
  }
  func.func @transform_2(%arg0: i32, %arg1: i32, %arg2: i32) -> (i32, i32) {
    %c0_i32 = arith.constant 0 : i32
    %c0_i32_0 = arith.constant 0 : i32
    return %c0_i32, %arg1 : i32, i32
  }
  func.func @transform_3(%arg0: i32, %arg1: i32, %arg2: i32) -> (i32, i32) {
    %c0_i32 = arith.constant 0 : i32
    return %arg0, %arg1 : i32, i32
  }
}

module attributes {stable_mosaic.version = 11 : i64} {
  func.func @_var_agg_kernel(%arg0: i32, %arg1: memref<1x32xf32, #tpu.memory_space<vmem>>, %arg2: memref<1x8x4x32xf32, #tpu.memory_space<vmem>>, %arg3: memref<1x8x4x32xf32, #tpu.memory_space<vmem>>, %arg4: memref<8x32xf32, #tpu.memory_space<vmem>>) attributes {dimension_semantics = [#tpu.dimension_semantics<parallel>], iteration_bounds = array<i64: 1>, scalar_prefetch = 0 : i64, scratch_operands = 0 : i64, tpu.core_type = #tpu.core_type<tc>, window_params = [{pipeline_mode = #tpu.pipeline_mode<synchronous>, transform_indices = @transform_0, window_bounds = array<i64: 1, 32>}, {transform_indices = @transform_1, window_bounds = array<i64: 1, 8, 4, 32>}, {transform_indices = @transform_2, window_bounds = array<i64: 1, 8, 4, 32>}, {transform_indices = @transform_3, window_bounds = array<i64: 8, 32>}]} {
    %c0 = arith.constant 0 : index
    %c0_0 = arith.constant 0 : index
    %0 = vector.load %arg1[%c0, %c0_0] : memref<1x32xf32, #tpu.memory_space<vmem>>, vector<1x32xf32>
    %c0_1 = arith.constant 0 : index
    %c0_2 = arith.constant 0 : index
    %c0_3 = arith.constant 0 : index
    %c0_4 = arith.constant 0 : index
    %1 = vector.load %arg2[%c0_1, %c0_2, %c0_3, %c0_4] : memref<1x8x4x32xf32, #tpu.memory_space<vmem>>, vector<1x8x4x32xf32>
    %2 = vector.shape_cast %1 : vector<1x8x4x32xf32> to vector<8x4x32xf32>
    %c0_5 = arith.constant 0 : index
    %c0_6 = arith.constant 0 : index
    %c0_7 = arith.constant 0 : index
    %c0_8 = arith.constant 0 : index
    %3 = vector.load %arg3[%c0_5, %c0_6, %c0_7, %c0_8] : memref<1x8x4x32xf32, #tpu.memory_space<vmem>>, vector<1x8x4x32xf32>
    %4 = vector.shape_cast %3 : vector<1x8x4x32xf32> to vector<8x4x32xf32>
    %5 = vector.extract_strided_slice %0 {offsets = [0, 0], sizes = [1, 8], strides = [1, 1]} : vector<1x32xf32> to vector<1x8xf32>
    %6 = vector.extract_strided_slice %2 {offsets = [0, 0, 0], sizes = [8, 4, 8], strides = [1, 1, 1]} : vector<8x4x32xf32> to vector<8x4x8xf32>
    %7 = vector.extract_strided_slice %4 {offsets = [0, 0, 0], sizes = [8, 4, 8], strides = [1, 1, 1]} : vector<8x4x32xf32> to vector<8x4x8xf32>
    %8 = vector.shape_cast %5 : vector<1x8xf32> to vector<1x1x8xf32>
    %9 = vector.broadcast %8 : vector<1x1x8xf32> to vector<8x4x8xf32>
    %10 = arith.mulf %6, %9 : vector<8x4x8xf32>
    %cst = arith.constant dense<0.000000e+00> : vector<8x4xf32>
    %11 = vector.multi_reduction <add>, %10, %cst [2] : vector<8x4x8xf32> to vector<8x4xf32>
    %cst_9 = arith.constant 0.353553385 : f32
    %12 = vector.broadcast %cst_9 : f32 to vector<8x4xf32>
    %13 = arith.mulf %11, %12 : vector<8x4xf32>
    %cst_10 = arith.constant dense<0xFF800000> : vector<8xf32>
    %14 = vector.multi_reduction <maximumf>, %13, %cst_10 [1] : vector<8x4xf32> to vector<8xf32>
    %15 = vector.shape_cast %14 : vector<8xf32> to vector<8x1xf32>
    %16 = vector.broadcast %15 : vector<8x1xf32> to vector<8x4xf32>
    %17 = arith.subf %13, %16 : vector<8x4xf32>
    %18 = math.exp %17 : vector<8x4xf32>
    %cst_11 = arith.constant dense<0.000000e+00> : vector<8xf32>
    %19 = vector.multi_reduction <add>, %18, %cst_11 [1] : vector<8x4xf32> to vector<8xf32>
    %20 = vector.shape_cast %19 : vector<8xf32> to vector<8x1xf32>
    %21 = tpu.reciprocal %20 {approx = true} : vector<8x1xf32> -> vector<8x1xf32>
    %22 = vector.broadcast %21 : vector<8x1xf32> to vector<8x4xf32>
    %23 = arith.mulf %18, %22 : vector<8x4xf32>
    %24 = vector.shape_cast %23 : vector<8x4xf32> to vector<8x4x1xf32>
    %25 = vector.broadcast %24 : vector<8x4x1xf32> to vector<8x4x8xf32>
    %26 = arith.mulf %25, %7 : vector<8x4x8xf32>
    %cst_12 = arith.constant dense<0.000000e+00> : vector<8x8xf32>
    %27 = vector.multi_reduction <add>, %26, %cst_12 [1] : vector<8x4x8xf32> to vector<8x8xf32>
    %c0_13 = arith.constant 0 : index
    %c0_14 = arith.constant 0 : index
    %28 = vector.load %arg4[%c0_13, %c0_14] : memref<8x32xf32, #tpu.memory_space<vmem>>, vector<8x8xf32>
    tpu.vector_store %arg4[%c0_13, %c0_14], %27 {strides = array<i32>} : memref<8x32xf32, #tpu.memory_space<vmem>>, vector<8x8xf32>,
    %29 = vector.extract_strided_slice %0 {offsets = [0, 8], sizes = [1, 8], strides = [1, 1]} : vector<1x32xf32> to vector<1x8xf32>
    %30 = vector.extract_strided_slice %2 {offsets = [0, 0, 8], sizes = [8, 4, 8], strides = [1, 1, 1]} : vector<8x4x32xf32> to vector<8x4x8xf32>
    %31 = vector.extract_strided_slice %4 {offsets = [0, 0, 8], sizes = [8, 4, 8], strides = [1, 1, 1]} : vector<8x4x32xf32> to vector<8x4x8xf32>
    %32 = vector.shape_cast %29 : vector<1x8xf32> to vector<1x1x8xf32>
    %33 = vector.broadcast %32 : vector<1x1x8xf32> to vector<8x4x8xf32>
    %34 = arith.mulf %30, %33 : vector<8x4x8xf32>
    %cst_15 = arith.constant dense<0.000000e+00> : vector<8x4xf32>
    %35 = vector.multi_reduction <add>, %34, %cst_15 [2] : vector<8x4x8xf32> to vector<8x4xf32>
    %cst_16 = arith.constant 0.353553385 : f32
    %36 = vector.broadcast %cst_16 : f32 to vector<8x4xf32>
    %37 = arith.mulf %35, %36 : vector<8x4xf32>
    %cst_17 = arith.constant dense<0xFF800000> : vector<8xf32>
    %38 = vector.multi_reduction <maximumf>, %37, %cst_17 [1] : vector<8x4xf32> to vector<8xf32>
    %39 = vector.shape_cast %38 : vector<8xf32> to vector<8x1xf32>
    %40 = vector.broadcast %39 : vector<8x1xf32> to vector<8x4xf32>
    %41 = arith.subf %37, %40 : vector<8x4xf32>
    %42 = math.exp %41 : vector<8x4xf32>
    %cst_18 = arith.constant dense<0.000000e+00> : vector<8xf32>
    %43 = vector.multi_reduction <add>, %42, %cst_18 [1] : vector<8x4xf32> to vector<8xf32>
    %44 = vector.shape_cast %43 : vector<8xf32> to vector<8x1xf32>
    %45 = tpu.reciprocal %44 {approx = true} : vector<8x1xf32> -> vector<8x1xf32>
    %46 = vector.broadcast %45 : vector<8x1xf32> to vector<8x4xf32>
    %47 = arith.mulf %42, %46 : vector<8x4xf32>
    %48 = vector.shape_cast %47 : vector<8x4xf32> to vector<8x4x1xf32>
    %49 = vector.broadcast %48 : vector<8x4x1xf32> to vector<8x4x8xf32>
    %50 = arith.mulf %49, %31 : vector<8x4x8xf32>
    %cst_19 = arith.constant dense<0.000000e+00> : vector<8x8xf32>
    %51 = vector.multi_reduction <add>, %50, %cst_19 [1] : vector<8x4x8xf32> to vector<8x8xf32>
    %c0_20 = arith.constant 0 : index
    %c8 = arith.constant 8 : index
    %52 = vector.load %arg4[%c0_20, %c8] : memref<8x32xf32, #tpu.memory_space<vmem>>, vector<8x8xf32>
    tpu.vector_store %arg4[%c0_20, %c8], %51 {strides = array<i32>} : memref<8x32xf32, #tpu.memory_space<vmem>>, vector<8x8xf32>,
    %53 = vector.extract_strided_slice %0 {offsets = [0, 16], sizes = [1, 8], strides = [1, 1]} : vector<1x32xf32> to vector<1x8xf32>
    %54 = vector.extract_strided_slice %2 {offsets = [0, 0, 16], sizes = [8, 4, 8], strides = [1, 1, 1]} : vector<8x4x32xf32> to vector<8x4x8xf32>
    %55 = vector.extract_strided_slice %4 {offsets = [0, 0, 16], sizes = [8, 4, 8], strides = [1, 1, 1]} : vector<8x4x32xf32> to vector<8x4x8xf32>
    %56 = vector.shape_cast %53 : vector<1x8xf32> to vector<1x1x8xf32>
    %57 = vector.broadcast %56 : vector<1x1x8xf32> to vector<8x4x8xf32>
    %58 = arith.mulf %54, %57 : vector<8x4x8xf32>
    %cst_21 = arith.constant dense<0.000000e+00> : vector<8x4xf32>
    %59 = vector.multi_reduction <add>, %58, %cst_21 [2] : vector<8x4x8xf32> to vector<8x4xf32>
    %cst_22 = arith.constant 0.353553385 : f32
    %60 = vector.broadcast %cst_22 : f32 to vector<8x4xf32>
    %61 = arith.mulf %59, %60 : vector<8x4xf32>
    %cst_23 = arith.constant dense<0xFF800000> : vector<8xf32>
    %62 = vector.multi_reduction <maximumf>, %61, %cst_23 [1] : vector<8x4xf32> to vector<8xf32>
    %63 = vector.shape_cast %62 : vector<8xf32> to vector<8x1xf32>
    %64 = vector.broadcast %63 : vector<8x1xf32> to vector<8x4xf32>
    %65 = arith.subf %61, %64 : vector<8x4xf32>
    %66 = math.exp %65 : vector<8x4xf32>
    %cst_24 = arith.constant dense<0.000000e+00> : vector<8xf32>
    %67 = vector.multi_reduction <add>, %66, %cst_24 [1] : vector<8x4xf32> to vector<8xf32>
    %68 = vector.shape_cast %67 : vector<8xf32> to vector<8x1xf32>
    %69 = tpu.reciprocal %68 {approx = true} : vector<8x1xf32> -> vector<8x1xf32>
    %70 = vector.broadcast %69 : vector<8x1xf32> to vector<8x4xf32>
    %71 = arith.mulf %66, %70 : vector<8x4xf32>
    %72 = vector.shape_cast %71 : vector<8x4xf32> to vector<8x4x1xf32>
    %73 = vector.broadcast %72 : vector<8x4x1xf32> to vector<8x4x8xf32>
    %74 = arith.mulf %73, %55 : vector<8x4x8xf32>
    %cst_25 = arith.constant dense<0.000000e+00> : vector<8x8xf32>
    %75 = vector.multi_reduction <add>, %74, %cst_25 [1] : vector<8x4x8xf32> to vector<8x8xf32>
    %c0_26 = arith.constant 0 : index
    %c16 = arith.constant 16 : index
    %76 = vector.load %arg4[%c0_26, %c16] : memref<8x32xf32, #tpu.memory_space<vmem>>, vector<8x8xf32>
    tpu.vector_store %arg4[%c0_26, %c16], %75 {strides = array<i32>} : memref<8x32xf32, #tpu.memory_space<vmem>>, vector<8x8xf32>,
    %77 = vector.extract_strided_slice %0 {offsets = [0, 24], sizes = [1, 8], strides = [1, 1]} : vector<1x32xf32> to vector<1x8xf32>
    %78 = vector.extract_strided_slice %2 {offsets = [0, 0, 24], sizes = [8, 4, 8], strides = [1, 1, 1]} : vector<8x4x32xf32> to vector<8x4x8xf32>
    %79 = vector.extract_strided_slice %4 {offsets = [0, 0, 24], sizes = [8, 4, 8], strides = [1, 1, 1]} : vector<8x4x32xf32> to vector<8x4x8xf32>
    %80 = vector.shape_cast %77 : vector<1x8xf32> to vector<1x1x8xf32>
    %81 = vector.broadcast %80 : vector<1x1x8xf32> to vector<8x4x8xf32>
    %82 = arith.mulf %78, %81 : vector<8x4x8xf32>
    %cst_27 = arith.constant dense<0.000000e+00> : vector<8x4xf32>
    %83 = vector.multi_reduction <add>, %82, %cst_27 [2] : vector<8x4x8xf32> to vector<8x4xf32>
    %cst_28 = arith.constant 0.353553385 : f32
    %84 = vector.broadcast %cst_28 : f32 to vector<8x4xf32>
    %85 = arith.mulf %83, %84 : vector<8x4xf32>
    %cst_29 = arith.constant dense<0xFF800000> : vector<8xf32>
    %86 = vector.multi_reduction <maximumf>, %85, %cst_29 [1] : vector<8x4xf32> to vector<8xf32>
    %87 = vector.shape_cast %86 : vector<8xf32> to vector<8x1xf32>
    %88 = vector.broadcast %87 : vector<8x1xf32> to vector<8x4xf32>
    %89 = arith.subf %85, %88 : vector<8x4xf32>
    %90 = math.exp %89 : vector<8x4xf32>
    %cst_30 = arith.constant dense<0.000000e+00> : vector<8xf32>
    %91 = vector.multi_reduction <add>, %90, %cst_30 [1] : vector<8x4xf32> to vector<8xf32>
    %92 = vector.shape_cast %91 : vector<8xf32> to vector<8x1xf32>
    %93 = tpu.reciprocal %92 {approx = true} : vector<8x1xf32> -> vector<8x1xf32>
    %94 = vector.broadcast %93 : vector<8x1xf32> to vector<8x4xf32>
    %95 = arith.mulf %90, %94 : vector<8x4xf32>
    %96 = vector.shape_cast %95 : vector<8x4xf32> to vector<8x4x1xf32>
    %97 = vector.broadcast %96 : vector<8x4x1xf32> to vector<8x4x8xf32>
    %98 = arith.mulf %97, %79 : vector<8x4x8xf32>
    %cst_31 = arith.constant dense<0.000000e+00> : vector<8x8xf32>
    %99 = vector.multi_reduction <add>, %98, %cst_31 [1] : vector<8x4x8xf32> to vector<8x8xf32>
    %c0_32 = arith.constant 0 : index
    %c24 = arith.constant 24 : index
    %100 = vector.load %arg4[%c0_32, %c24] : memref<8x32xf32, #tpu.memory_space<vmem>>, vector<8x8xf32>
    tpu.vector_store %arg4[%c0_32, %c24], %99 {strides = array<i32>} : memref<8x32xf32, #tpu.memory_space<vmem>>, vector<8x8xf32>,
    return
  }
  func.func @transform_0(%arg0: i32) -> (i32, i32) {
    %c0_i32 = arith.constant 0 : i32
    %c0_i32_0 = arith.constant 0 : i32
    %c0_i32_1 = arith.constant 0 : i32
    return %c0_i32, %c0_i32_0 : i32, i32
  }
  func.func @transform_1(%arg0: i32) -> (i32, i32, i32, i32) {
    %c0_i32 = arith.constant 0 : i32
    %c0_i32_0 = arith.constant 0 : i32
    %c0_i32_1 = arith.constant 0 : i32
    %c0_i32_2 = arith.constant 0 : i32
    return %c0_i32, %arg0, %c0_i32_0, %c0_i32_1 : i32, i32, i32, i32
  }
  func.func @transform_2(%arg0: i32) -> (i32, i32, i32, i32) {
    %c1_i32 = arith.constant 1 : i32
    %c0_i32 = arith.constant 0 : i32
    %c0_i32_0 = arith.constant 0 : i32
    %c0_i32_1 = arith.constant 0 : i32
    return %c1_i32, %arg0, %c0_i32, %c0_i32_0 : i32, i32, i32, i32
  }
  func.func @transform_3(%arg0: i32) -> (i32, i32) {
    %c0_i32 = arith.constant 0 : i32
    %c0_i32_0 = arith.constant 0 : i32
    return %arg0, %c0_i32 : i32, i32
  }
}

module attributes {stable_mosaic.version = 11 : i64} {
  func.func @_fused_linear_kernel(%arg0: i32, %arg1: i32, %arg2: i32, %arg3: memref<2x1xf32, #tpu.memory_space<vmem>>, %arg4: memref<1x32xf32, #tpu.memory_space<vmem>>, %arg5: memref<1x32xf32, #tpu.memory_space<vmem>>, %arg6: memref<2x32xf32, #tpu.memory_space<vmem>>, %arg7: memref<2x32xf32, #tpu.memory_space<vmem>>) attributes {dimension_semantics = [#tpu.dimension_semantics<parallel>, #tpu.dimension_semantics<parallel>, #tpu.dimension_semantics<arbitrary>], iteration_bounds = array<i64: 1, 1, 1>, scalar_prefetch = 0 : i64, scratch_operands = 1 : i64, tpu.core_type = #tpu.core_type<tc>, window_params = [{transform_indices = @transform_0, window_bounds = array<i64: 2, 1>}, {transform_indices = @transform_1, window_bounds = array<i64: 1, 32>}, {transform_indices = @transform_2, window_bounds = array<i64: 1, 32>}, {transform_indices = @transform_3, window_bounds = array<i64: 2, 32>}]} {
    %c0_i32 = arith.constant 0 : i32
    %0 = arith.cmpi eq, %arg2, %c0_i32 : i32
    %1 = arith.extui %0 : i1 to i32
    %c0_i32_0 = arith.constant 0 : i32
    %2 = arith.cmpi ne, %1, %c0_i32_0 : i32
    scf.if %2 {
      %cst_10 = arith.constant 0.000000e+00 : f32
      %12 = vector.broadcast %cst_10 : f32 to vector<2x32xf32>
      %c0_11 = arith.constant 0 : index
      %c0_12 = arith.constant 0 : index
      %13 = vector.load %arg7[%c0_11, %c0_12] : memref<2x32xf32, #tpu.memory_space<vmem>>, vector<2x32xf32>
      tpu.vector_store %arg7[%c0_11, %c0_12], %12 {strides = array<i32>} : memref<2x32xf32, #tpu.memory_space<vmem>>, vector<2x32xf32>,
    } else {
    }
    %c0 = arith.constant 0 : index
    %c0_1 = arith.constant 0 : index
    %3 = vector.load %arg3[%c0, %c0_1] : memref<2x1xf32, #tpu.memory_space<vmem>>, vector<2x1xf32>
    %c0_2 = arith.constant 0 : index
    %c0_3 = arith.constant 0 : index
    %4 = vector.load %arg7[%c0_2, %c0_3] : memref<2x32xf32, #tpu.memory_space<vmem>>, vector<2x32xf32>
    %c0_4 = arith.constant 0 : index
    %c0_5 = arith.constant 0 : index
    %5 = vector.load %arg4[%c0_4, %c0_5] : memref<1x32xf32, #tpu.memory_space<vmem>>, vector<1x32xf32>
    %cst = arith.constant dense<0.000000e+00> : vector<2x32xf32>
    %6 = tpu.matmul %3, %5, %cst {dimension_numbers = #tpu.dot_dimension_numbers<[1], [0], [0], [1], [0, 0, 1, 1], [], []>} : vector<2x1xf32>, vector<1x32xf32>, vector<2x32xf32> -> vector<2x32xf32>
    %7 = arith.addf %4, %6 : vector<2x32xf32>
    %c0_6 = arith.constant 0 : index
    %c0_7 = arith.constant 0 : index
    %8 = vector.load %arg7[%c0_6, %c0_7] : memref<2x32xf32, #tpu.memory_space<vmem>>, vector<2x32xf32>
    tpu.vector_store %arg7[%c0_6, %c0_7], %7 {strides = array<i32>} : memref<2x32xf32, #tpu.memory_space<vmem>>, vector<2x32xf32>,
    %c0_i32_8 = arith.constant 0 : i32
    %9 = arith.cmpi eq, %arg2, %c0_i32_8 : i32
    %10 = arith.extui %9 : i1 to i32
    %c0_i32_9 = arith.constant 0 : i32
    %11 = arith.cmpi ne, %10, %c0_i32_9 : i32
    scf.if %11 {
      %c0_10 = arith.constant 0 : index
      %c0_11 = arith.constant 0 : index
      %12 = vector.load %arg7[%c0_10, %c0_11] : memref<2x32xf32, #tpu.memory_space<vmem>>, vector<2x32xf32>
      %c0_12 = arith.constant 0 : index
      %c0_13 = arith.constant 0 : index
      %13 = vector.load %arg5[%c0_12, %c0_13] : memref<1x32xf32, #tpu.memory_space<vmem>>, vector<1x32xf32>
      %14 = vector.broadcast %13 : vector<1x32xf32> to vector<2x32xf32>
      %15 = arith.addf %12, %14 : vector<2x32xf32>
      %c0_14 = arith.constant 0 : index
      %c0_15 = arith.constant 0 : index
      %16 = vector.load %arg6[%c0_14, %c0_15] : memref<2x32xf32, #tpu.memory_space<vmem>>, vector<2x32xf32>
      tpu.vector_store %arg6[%c0_14, %c0_15], %15 {strides = array<i32>} : memref<2x32xf32, #tpu.memory_space<vmem>>, vector<2x32xf32>,
    } else {
    }
    return
  }
  func.func @transform_0(%arg0: i32, %arg1: i32, %arg2: i32) -> (i32, i32) {
    %c0_i32 = arith.constant 0 : i32
    return %arg0, %arg2 : i32, i32
  }
  func.func @transform_1(%arg0: i32, %arg1: i32, %arg2: i32) -> (i32, i32) {
    %c0_i32 = arith.constant 0 : i32
    return %arg2, %arg1 : i32, i32
  }
  func.func @transform_2(%arg0: i32, %arg1: i32, %arg2: i32) -> (i32, i32) {
    %c0_i32 = arith.constant 0 : i32
    %c0_i32_0 = arith.constant 0 : i32
    return %c0_i32, %arg1 : i32, i32
  }
  func.func @transform_3(%arg0: i32, %arg1: i32, %arg2: i32) -> (i32, i32) {
    %c0_i32 = arith.constant 0 : i32
    return %arg0, %arg1 : i32, i32
  }
}

module attributes {stable_mosaic.version = 11 : i64} {
  func.func @_fused_linear_kernel(%arg0: i32, %arg1: i32, %arg2: i32, %arg3: memref<8x32xf32, #tpu.memory_space<vmem>>, %arg4: memref<32x32xf32, #tpu.memory_space<vmem>>, %arg5: memref<1x32xf32, #tpu.memory_space<vmem>>, %arg6: memref<8x32xf32, #tpu.memory_space<vmem>>, %arg7: memref<8x32xf32, #tpu.memory_space<vmem>>, %arg8: memref<8x32xf32, #tpu.memory_space<vmem>>) attributes {dimension_semantics = [#tpu.dimension_semantics<parallel>, #tpu.dimension_semantics<parallel>, #tpu.dimension_semantics<arbitrary>], iteration_bounds = array<i64: 1, 1, 1>, scalar_prefetch = 0 : i64, scratch_operands = 1 : i64, tpu.core_type = #tpu.core_type<tc>, window_params = [{transform_indices = @transform_0, window_bounds = array<i64: 8, 32>}, {transform_indices = @transform_1, window_bounds = array<i64: 32, 32>}, {transform_indices = @transform_2, window_bounds = array<i64: 1, 32>}, {transform_indices = @transform_3, window_bounds = array<i64: 8, 32>}, {transform_indices = @transform_4, window_bounds = array<i64: 8, 32>}]} {
    %c0_i32 = arith.constant 0 : i32
    %0 = arith.cmpi eq, %arg2, %c0_i32 : i32
    %1 = arith.extui %0 : i1 to i32
    %c0_i32_0 = arith.constant 0 : i32
    %2 = arith.cmpi ne, %1, %c0_i32_0 : i32
    scf.if %2 {
      %cst_10 = arith.constant 0.000000e+00 : f32
      %12 = vector.broadcast %cst_10 : f32 to vector<8x32xf32>
      %c0_11 = arith.constant 0 : index
      %c0_12 = arith.constant 0 : index
      %13 = vector.load %arg8[%c0_11, %c0_12] : memref<8x32xf32, #tpu.memory_space<vmem>>, vector<8x32xf32>
      tpu.vector_store %arg8[%c0_11, %c0_12], %12 {strides = array<i32>} : memref<8x32xf32, #tpu.memory_space<vmem>>, vector<8x32xf32>,
    } else {
    }
    %c0 = arith.constant 0 : index
    %c0_1 = arith.constant 0 : index
    %3 = vector.load %arg3[%c0, %c0_1] : memref<8x32xf32, #tpu.memory_space<vmem>>, vector<8x32xf32>
    %c0_2 = arith.constant 0 : index
    %c0_3 = arith.constant 0 : index
    %4 = vector.load %arg8[%c0_2, %c0_3] : memref<8x32xf32, #tpu.memory_space<vmem>>, vector<8x32xf32>
    %c0_4 = arith.constant 0 : index
    %c0_5 = arith.constant 0 : index
    %5 = vector.load %arg4[%c0_4, %c0_5] : memref<32x32xf32, #tpu.memory_space<vmem>>, vector<32x32xf32>
    %cst = arith.constant dense<0.000000e+00> : vector<8x32xf32>
    %6 = tpu.matmul %3, %5, %cst {dimension_numbers = #tpu.dot_dimension_numbers<[1], [0], [0], [1], [0, 0, 1, 1], [], []>} : vector<8x32xf32>, vector<32x32xf32>, vector<8x32xf32> -> vector<8x32xf32>
    %7 = arith.addf %4, %6 : vector<8x32xf32>
    %c0_6 = arith.constant 0 : index
    %c0_7 = arith.constant 0 : index
    %8 = vector.load %arg8[%c0_6, %c0_7] : memref<8x32xf32, #tpu.memory_space<vmem>>, vector<8x32xf32>
    tpu.vector_store %arg8[%c0_6, %c0_7], %7 {strides = array<i32>} : memref<8x32xf32, #tpu.memory_space<vmem>>, vector<8x32xf32>,
    %c0_i32_8 = arith.constant 0 : i32
    %9 = arith.cmpi eq, %arg2, %c0_i32_8 : i32
    %10 = arith.extui %9 : i1 to i32
    %c0_i32_9 = arith.constant 0 : i32
    %11 = arith.cmpi ne, %10, %c0_i32_9 : i32
    scf.if %11 {
      %c0_10 = arith.constant 0 : index
      %c0_11 = arith.constant 0 : index
      %12 = vector.load %arg8[%c0_10, %c0_11] : memref<8x32xf32, #tpu.memory_space<vmem>>, vector<8x32xf32>
      %c0_12 = arith.constant 0 : index
      %c0_13 = arith.constant 0 : index
      %13 = vector.load %arg5[%c0_12, %c0_13] : memref<1x32xf32, #tpu.memory_space<vmem>>, vector<1x32xf32>
      %14 = vector.broadcast %13 : vector<1x32xf32> to vector<8x32xf32>
      %15 = arith.addf %12, %14 : vector<8x32xf32>
      %c0_14 = arith.constant 0 : index
      %c0_15 = arith.constant 0 : index
      %16 = vector.load %arg6[%c0_14, %c0_15] : memref<8x32xf32, #tpu.memory_space<vmem>>, vector<8x32xf32>
      %17 = arith.addf %15, %16 : vector<8x32xf32>
      %c0_16 = arith.constant 0 : index
      %c0_17 = arith.constant 0 : index
      %18 = vector.load %arg7[%c0_16, %c0_17] : memref<8x32xf32, #tpu.memory_space<vmem>>, vector<8x32xf32>
      tpu.vector_store %arg7[%c0_16, %c0_17], %17 {strides = array<i32>} : memref<8x32xf32, #tpu.memory_space<vmem>>, vector<8x32xf32>,
    } else {
    }
    return
  }
  func.func @transform_0(%arg0: i32, %arg1: i32, %arg2: i32) -> (i32, i32) {
    %c0_i32 = arith.constant 0 : i32
    return %arg0, %arg2 : i32, i32
  }
  func.func @transform_1(%arg0: i32, %arg1: i32, %arg2: i32) -> (i32, i32) {
    %c0_i32 = arith.constant 0 : i32
    return %arg2, %arg1 : i32, i32
  }
  func.func @transform_2(%arg0: i32, %arg1: i32, %arg2: i32) -> (i32, i32) {
    %c0_i32 = arith.constant 0 : i32
    %c0_i32_0 = arith.constant 0 : i32
    return %c0_i32, %arg1 : i32, i32
  }
  func.func @transform_3(%arg0: i32, %arg1: i32, %arg2: i32) -> (i32, i32) {
    %c0_i32 = arith.constant 0 : i32
    return %arg0, %arg1 : i32, i32
  }
  func.func @transform_4(%arg0: i32, %arg1: i32, %arg2: i32) -> (i32, i32) {
    %c0_i32 = arith.constant 0 : i32
    return %arg0, %arg1 : i32, i32
  }
}

module attributes {stable_mosaic.version = 11 : i64} {
  func.func @_stacked_linear_kernel(%arg0: i32, %arg1: i32, %arg2: i32, %arg3: memref<8x32xf32, #tpu.memory_space<vmem>>, %arg4: memref<1x32xf32, #tpu.memory_space<vmem>>, %arg5: memref<1x32xf32, #tpu.memory_space<vmem>>, %arg6: memref<1x32x32xf32, #tpu.memory_space<vmem>>, %arg7: memref<1x1x32xf32, #tpu.memory_space<vmem>>, %arg8: memref<1x8x32xf32, #tpu.memory_space<vmem>>) attributes {dimension_semantics = [#tpu.dimension_semantics<parallel>, #tpu.dimension_semantics<parallel>, #tpu.dimension_semantics<parallel>], iteration_bounds = array<i64: 1, 3, 1>, scalar_prefetch = 0 : i64, scratch_operands = 0 : i64, tpu.core_type = #tpu.core_type<tc>, window_params = [{transform_indices = @transform_0, window_bounds = array<i64: 8, 32>}, {pipeline_mode = #tpu.pipeline_mode<synchronous>, transform_indices = @transform_1, window_bounds = array<i64: 1, 32>}, {pipeline_mode = #tpu.pipeline_mode<synchronous>, transform_indices = @transform_2, window_bounds = array<i64: 1, 32>}, {transform_indices = @transform_3, window_bounds = array<i64: 1, 32, 32>}, {transform_indices = @transform_4, window_bounds = array<i64: 1, 1, 32>}, {transform_indices = @transform_5, window_bounds = array<i64: 1, 8, 32>}]} {
    %c0 = arith.constant 0 : index
    %c0_0 = arith.constant 0 : index
    %0 = vector.load %arg3[%c0, %c0_0] : memref<8x32xf32, #tpu.memory_space<vmem>>, vector<8x32xf32>
    %c0_1 = arith.constant 0 : index
    %c0_2 = arith.constant 0 : index
    %1 = vector.load %arg4[%c0_1, %c0_2] : memref<1x32xf32, #tpu.memory_space<vmem>>, vector<1x32xf32>
    %c0_3 = arith.constant 0 : index
    %c0_4 = arith.constant 0 : index
    %2 = vector.load %arg5[%c0_3, %c0_4] : memref<1x32xf32, #tpu.memory_space<vmem>>, vector<1x32xf32>
    %cst = arith.constant dense<0.000000e+00> : vector<8xf32>
    %3 = vector.multi_reduction <add>, %0, %cst [1] : vector<8x32xf32> to vector<8xf32>
    %4 = vector.shape_cast %3 : vector<8xf32> to vector<8x1xf32>
    %cst_5 = arith.constant 3.200000e+01 : f32
    %5 = vector.broadcast %cst_5 : f32 to vector<8x1xf32>
    %6 = arith.divf %4, %5 : vector<8x1xf32>
    %7 = vector.broadcast %6 : vector<8x1xf32> to vector<8x32xf32>
    %8 = arith.subf %0, %7 : vector<8x32xf32>
    %9 = arith.mulf %8, %8 : vector<8x32xf32>
    %cst_6 = arith.constant dense<0.000000e+00> : vector<8xf32>
    %10 = vector.multi_reduction <add>, %9, %cst_6 [1] : vector<8x32xf32> to vector<8xf32>
    %11 = vector.shape_cast %10 : vector<8xf32> to vector<8x1xf32>
    %cst_7 = arith.constant 3.200000e+01 : f32
    %12 = vector.broadcast %cst_7 : f32 to vector<8x1xf32>
    %13 = arith.divf %11, %12 : vector<8x1xf32>
    %14 = vector.broadcast %6 : vector<8x1xf32> to vector<8x32xf32>
    %15 = arith.subf %0, %14 : vector<8x32xf32>
    %cst_8 = arith.constant 9.99999974E-6 : f32
    %16 = vector.broadcast %cst_8 : f32 to vector<8x1xf32>
    %17 = arith.addf %13, %16 : vector<8x1xf32>
    %18 = math.rsqrt %17 : vector<8x1xf32>
    %19 = vector.broadcast %18 : vector<8x1xf32> to vector<8x32xf32>
    %20 = arith.mulf %15, %19 : vector<8x32xf32>
    %21 = vector.broadcast %1 : vector<1x32xf32> to vector<8x32xf32>
    %22 = arith.mulf %20, %21 : vector<8x32xf32>
    %23 = vector.broadcast %2 : vector<1x32xf32> to vector<8x32xf32>
    %24 = arith.addf %22, %23 : vector<8x32xf32>
    %c0_9 = arith.constant 0 : index
    %c0_10 = arith.constant 0 : index
    %c0_11 = arith.constant 0 : index
    %25 = vector.load %arg6[%c0_9, %c0_10, %c0_11] : memref<1x32x32xf32, #tpu.memory_space<vmem>>, vector<1x32x32xf32>
    %26 = vector.shape_cast %25 : vector<1x32x32xf32> to vector<32x32xf32>
    %cst_12 = arith.constant dense<0.000000e+00> : vector<8x32xf32>
    %27 = tpu.matmul %24, %26, %cst_12 {dimension_numbers = #tpu.dot_dimension_numbers<[1], [0], [0], [1], [0, 0, 1, 1], [], []>} : vector<8x32xf32>, vector<32x32xf32>, vector<8x32xf32> -> vector<8x32xf32>
    %c0_13 = arith.constant 0 : index
    %c0_14 = arith.constant 0 : index
    %c0_15 = arith.constant 0 : index
    %28 = vector.load %arg7[%c0_13, %c0_14, %c0_15] : memref<1x1x32xf32, #tpu.memory_space<vmem>>, vector<1x1x32xf32>
    %29 = vector.shape_cast %28 : vector<1x1x32xf32> to vector<1x32xf32>
    %30 = vector.broadcast %29 : vector<1x32xf32> to vector<8x32xf32>
    %31 = arith.addf %27, %30 : vector<8x32xf32>
    %c0_16 = arith.constant 0 : index
    %c0_17 = arith.constant 0 : index
    %c0_18 = arith.constant 0 : index
    %32 = vector.load %arg8[%c0_16, %c0_17, %c0_18] : memref<1x8x32xf32, #tpu.memory_space<vmem>>, vector<1x8x32xf32>
    %33 = vector.shape_cast %32 : vector<1x8x32xf32> to vector<8x32xf32>
    %34 = vector.shape_cast %31 : vector<8x32xf32> to vector<1x8x32xf32>
    tpu.vector_store %arg8[%c0_16, %c0_17, %c0_18], %34 {strides = array<i32>} : memref<1x8x32xf32, #tpu.memory_space<vmem>>, vector<1x8x32xf32>,
    return
  }
  func.func @transform_0(%arg0: i32, %arg1: i32, %arg2: i32) -> (i32, i32) {
    %c0_i32 = arith.constant 0 : i32
    %c0_i32_0 = arith.constant 0 : i32
    return %arg0, %c0_i32 : i32, i32
  }
  func.func @transform_1(%arg0: i32, %arg1: i32, %arg2: i32) -> (i32, i32) {
    %c0_i32 = arith.constant 0 : i32
    %c0_i32_0 = arith.constant 0 : i32
    %c0_i32_1 = arith.constant 0 : i32
    return %c0_i32, %c0_i32_0 : i32, i32
  }
  func.func @transform_2(%arg0: i32, %arg1: i32, %arg2: i32) -> (i32, i32) {
    %c0_i32 = arith.constant 0 : i32
    %c0_i32_0 = arith.constant 0 : i32
    %c0_i32_1 = arith.constant 0 : i32
    return %c0_i32, %c0_i32_0 : i32, i32
  }
  func.func @transform_3(%arg0: i32, %arg1: i32, %arg2: i32) -> (i32, i32, i32) {
    %c0_i32 = arith.constant 0 : i32
    %c0_i32_0 = arith.constant 0 : i32
    return %arg1, %c0_i32, %arg2 : i32, i32, i32
  }
  func.func @transform_4(%arg0: i32, %arg1: i32, %arg2: i32) -> (i32, i32, i32) {
    %c0_i32 = arith.constant 0 : i32
    %c0_i32_0 = arith.constant 0 : i32
    return %arg1, %c0_i32, %arg2 : i32, i32, i32
  }
  func.func @transform_5(%arg0: i32, %arg1: i32, %arg2: i32) -> (i32, i32, i32) {
    %c0_i32 = arith.constant 0 : i32
    return %arg1, %arg0, %arg2 : i32, i32, i32
  }
}

module attributes {stable_mosaic.version = 11 : i64} {
  func.func @_fused_linear_kernel(%arg0: i32, %arg1: i32, %arg2: i32, %arg3: memref<8x32xf32, #tpu.memory_space<vmem>>, %arg4: memref<32x128xf32, #tpu.memory_space<vmem>>, %arg5: memref<1x128xf32, #tpu.memory_space<vmem>>, %arg6: memref<1x32xf32, #tpu.memory_space<vmem>>, %arg7: memref<1x32xf32, #tpu.memory_space<vmem>>, %arg8: memref<8x128xf32, #tpu.memory_space<vmem>>, %arg9: memref<8x128xf32, #tpu.memory_space<vmem>>) attributes {dimension_semantics = [#tpu.dimension_semantics<parallel>, #tpu.dimension_semantics<parallel>, #tpu.dimension_semantics<arbitrary>], iteration_bounds = array<i64: 1, 1, 1>, scalar_prefetch = 0 : i64, scratch_operands = 1 : i64, tpu.core_type = #tpu.core_type<tc>, window_params = [{transform_indices = @transform_0, window_bounds = array<i64: 8, 32>}, {transform_indices = @transform_1, window_bounds = array<i64: 32, 128>}, {transform_indices = @transform_2, window_bounds = array<i64: 1, 128>}, {pipeline_mode = #tpu.pipeline_mode<synchronous>, transform_indices = @transform_3, window_bounds = array<i64: 1, 32>}, {pipeline_mode = #tpu.pipeline_mode<synchronous>, transform_indices = @transform_4, window_bounds = array<i64: 1, 32>}, {transform_indices = @transform_5, window_bounds = array<i64: 8, 128>}]} {
    %c0_i32 = arith.constant 0 : i32
    %0 = arith.cmpi eq, %arg2, %c0_i32 : i32
    %1 = arith.extui %0 : i1 to i32
    %c0_i32_0 = arith.constant 0 : i32
    %2 = arith.cmpi ne, %1, %c0_i32_0 : i32
    scf.if %2 {
      %cst_19 = arith.constant 0.000000e+00 : f32
      %36 = vector.broadcast %cst_19 : f32 to vector<8x128xf32>
      %c0_20 = arith.constant 0 : index
      %c0_21 = arith.constant 0 : index
      %37 = vector.load %arg9[%c0_20, %c0_21] : memref<8x128xf32, #tpu.memory_space<vmem>>, vector<8x128xf32>
      tpu.vector_store %arg9[%c0_20, %c0_21], %36 {strides = array<i32>} : memref<8x128xf32, #tpu.memory_space<vmem>>, vector<8x128xf32>,
    } else {
    }
    %c0 = arith.constant 0 : index
    %c0_1 = arith.constant 0 : index
    %3 = vector.load %arg3[%c0, %c0_1] : memref<8x32xf32, #tpu.memory_space<vmem>>, vector<8x32xf32>
    %c0_2 = arith.constant 0 : index
    %c0_3 = arith.constant 0 : index
    %4 = vector.load %arg6[%c0_2, %c0_3] : memref<1x32xf32, #tpu.memory_space<vmem>>, vector<1x32xf32>
    %c0_4 = arith.constant 0 : index
    %c0_5 = arith.constant 0 : index
    %5 = vector.load %arg7[%c0_4, %c0_5] : memref<1x32xf32, #tpu.memory_space<vmem>>, vector<1x32xf32>
    %cst = arith.constant dense<0.000000e+00> : vector<8xf32>
    %6 = vector.multi_reduction <add>, %3, %cst [1] : vector<8x32xf32> to vector<8xf32>
    %7 = vector.shape_cast %6 : vector<8xf32> to vector<8x1xf32>
    %cst_6 = arith.constant 3.200000e+01 : f32
    %8 = vector.broadcast %cst_6 : f32 to vector<8x1xf32>
    %9 = arith.divf %7, %8 : vector<8x1xf32>
    %10 = vector.broadcast %9 : vector<8x1xf32> to vector<8x32xf32>
    %11 = arith.subf %3, %10 : vector<8x32xf32>
    %12 = arith.mulf %11, %11 : vector<8x32xf32>
    %cst_7 = arith.constant dense<0.000000e+00> : vector<8xf32>
    %13 = vector.multi_reduction <add>, %12, %cst_7 [1] : vector<8x32xf32> to vector<8xf32>
    %14 = vector.shape_cast %13 : vector<8xf32> to vector<8x1xf32>
    %cst_8 = arith.constant 3.200000e+01 : f32
    %15 = vector.broadcast %cst_8 : f32 to vector<8x1xf32>
    %16 = arith.divf %14, %15 : vector<8x1xf32>
    %17 = vector.broadcast %9 : vector<8x1xf32> to vector<8x32xf32>
    %18 = arith.subf %3, %17 : vector<8x32xf32>
    %cst_9 = arith.constant 9.99999974E-6 : f32
    %19 = vector.broadcast %cst_9 : f32 to vector<8x1xf32>
    %20 = arith.addf %16, %19 : vector<8x1xf32>
    %21 = math.rsqrt %20 : vector<8x1xf32>
    %22 = vector.broadcast %21 : vector<8x1xf32> to vector<8x32xf32>
    %23 = arith.mulf %18, %22 : vector<8x32xf32>
    %24 = vector.broadcast %4 : vector<1x32xf32> to vector<8x32xf32>
    %25 = arith.mulf %23, %24 : vector<8x32xf32>
    %26 = vector.broadcast %5 : vector<1x32xf32> to vector<8x32xf32>
    %27 = arith.addf %25, %26 : vector<8x32xf32>
    %c0_10 = arith.constant 0 : index
    %c0_11 = arith.constant 0 : index
    %28 = vector.load %arg9[%c0_10, %c0_11] : memref<8x128xf32, #tpu.memory_space<vmem>>, vector<8x128xf32>
    %c0_12 = arith.constant 0 : index
    %c0_13 = arith.constant 0 : index
    %29 = vector.load %arg4[%c0_12, %c0_13] : memref<32x128xf32, #tpu.memory_space<vmem>>, vector<32x128xf32>
    %cst_14 = arith.constant dense<0.000000e+00> : vector<8x128xf32>
    %30 = tpu.matmul %27, %29, %cst_14 {dimension_numbers = #tpu.dot_dimension_numbers<[1], [0], [0], [1], [0, 0, 1, 1], [], []>} : vector<8x32xf32>, vector<32x128xf32>, vector<8x128xf32> -> vector<8x128xf32>
    %31 = arith.addf %28, %30 : vector<8x128xf32>
    %c0_15 = arith.constant 0 : index
    %c0_16 = arith.constant 0 : index
    %32 = vector.load %arg9[%c0_15, %c0_16] : memref<8x128xf32, #tpu.memory_space<vmem>>, vector<8x128xf32>
    tpu.vector_store %arg9[%c0_15, %c0_16], %31 {strides = array<i32>} : memref<8x128xf32, #tpu.memory_space<vmem>>, vector<8x128xf32>,
    %c0_i32_17 = arith.constant 0 : i32
    %33 = arith.cmpi eq, %arg2, %c0_i32_17 : i32
    %34 = arith.extui %33 : i1 to i32
    %c0_i32_18 = arith.constant 0 : i32
    %35 = arith.cmpi ne, %34, %c0_i32_18 : i32
    scf.if %35 {
      %c0_19 = arith.constant 0 : index
      %c0_20 = arith.constant 0 : index
      %36 = vector.load %arg9[%c0_19, %c0_20] : memref<8x128xf32, #tpu.memory_space<vmem>>, vector<8x128xf32>
      %c0_21 = arith.constant 0 : index
      %c0_22 = arith.constant 0 : index
      %37 = vector.load %arg5[%c0_21, %c0_22] : memref<1x128xf32, #tpu.memory_space<vmem>>, vector<1x128xf32>
      %38 = vector.broadcast %37 : vector<1x128xf32> to vector<8x128xf32>
      %39 = arith.addf %36, %38 : vector<8x128xf32>
      %40 = arith.mulf %39, %39 : vector<8x128xf32>
      %41 = arith.mulf %39, %40 : vector<8x128xf32>
      %cst_23 = arith.constant 4.471500e-02 : f32
      %42 = vector.broadcast %cst_23 : f32 to vector<8x128xf32>
      %43 = arith.mulf %42, %41 : vector<8x128xf32>
      %44 = arith.addf %39, %43 : vector<8x128xf32>
      %cst_24 = arith.constant 0.797884583 : f32
      %45 = vector.broadcast %cst_24 : f32 to vector<8x128xf32>
      %46 = arith.mulf %45, %44 : vector<8x128xf32>
      %47 = math.tanh %46 : vector<8x128xf32>
      %cst_25 = arith.constant 1.000000e+00 : f32
      %48 = vector.broadcast %cst_25 : f32 to vector<8x128xf32>
      %49 = arith.addf %48, %47 : vector<8x128xf32>
      %cst_26 = arith.constant 5.000000e-01 : f32
      %50 = vector.broadcast %cst_26 : f32 to vector<8x128xf32>
      %51 = arith.mulf %50, %49 : vector<8x128xf32>
      %52 = arith.mulf %39, %51 : vector<8x128xf32>
      %c0_27 = arith.constant 0 : index
      %c0_28 = arith.constant 0 : index
      %53 = vector.load %arg8[%c0_27, %c0_28] : memref<8x128xf32, #tpu.memory_space<vmem>>, vector<8x128xf32>
      tpu.vector_store %arg8[%c0_27, %c0_28], %52 {strides = array<i32>} : memref<8x128xf32, #tpu.memory_space<vmem>>, vector<8x128xf32>,
    } else {
    }
    return
  }
  func.func @transform_0(%arg0: i32, %arg1: i32, %arg2: i32) -> (i32, i32) {
    %c0_i32 = arith.constant 0 : i32
    return %arg0, %arg2 : i32, i32
  }
  func.func @transform_1(%arg0: i32, %arg1: i32, %arg2: i32) -> (i32, i32) {
    %c0_i32 = arith.constant 0 : i32
    return %arg2, %arg1 : i32, i32
  }
  func.func @transform_2(%arg0: i32, %arg1: i32, %arg2: i32) -> (i32, i32) {
    %c0_i32 = arith.constant 0 : i32
    %c0_i32_0 = arith.constant 0 : i32
    return %c0_i32, %arg1 : i32, i32
  }
  func.func @transform_3(%arg0: i32, %arg1: i32, %arg2: i32) -> (i32, i32) {
    %c0_i32 = arith.constant 0 : i32
    %c0_i32_0 = arith.constant 0 : i32
    %c0_i32_1 = arith.constant 0 : i32
    return %c0_i32, %c0_i32_0 : i32, i32
  }
  func.func @transform_4(%arg0: i32, %arg1: i32, %arg2: i32) -> (i32, i32) {
    %c0_i32 = arith.constant 0 : i32
    %c0_i32_0 = arith.constant 0 : i32
    %c0_i32_1 = arith.constant 0 : i32
    return %c0_i32, %c0_i32_0 : i32, i32
  }
  func.func @transform_5(%arg0: i32, %arg1: i32, %arg2: i32) -> (i32, i32) {
    %c0_i32 = arith.constant 0 : i32
    return %arg0, %arg1 : i32, i32
  }
}

module attributes {stable_mosaic.version = 11 : i64} {
  func.func @_flash_mha_kernel(%arg0: i32, %arg1: i32, %arg2: i32, %arg3: memref<1x1x4x32xf32, #tpu.memory_space<vmem>>, %arg4: memref<1x1x4x32xf32, #tpu.memory_space<vmem>>, %arg5: memref<1x1x4x32xf32, #tpu.memory_space<vmem>>, %arg6: memref<1x4x32xf32, #tpu.memory_space<vmem>>, %arg7: memref<4x4x1xf32, #tpu.memory_space<vmem>>, %arg8: memref<4x4x1xf32, #tpu.memory_space<vmem>>, %arg9: memref<4x4x8xf32, #tpu.memory_space<vmem>>) attributes {dimension_semantics = [#tpu.dimension_semantics<parallel>, #tpu.dimension_semantics<parallel>, #tpu.dimension_semantics<arbitrary>], iteration_bounds = array<i64: 2, 1, 1>, scalar_prefetch = 0 : i64, scratch_operands = 3 : i64, tpu.core_type = #tpu.core_type<tc>, window_params = [{transform_indices = @transform_0, window_bounds = array<i64: 1, 1, 4, 32>}, {transform_indices = @transform_1, window_bounds = array<i64: 1, 1, 4, 32>}, {transform_indices = @transform_2, window_bounds = array<i64: 1, 1, 4, 32>}, {transform_indices = @transform_3, window_bounds = array<i64: 1, 4, 32>}]} {
    %c0_i32 = arith.constant 0 : i32
    %0 = arith.cmpi eq, %arg2, %c0_i32 : i32
    %1 = arith.extui %0 : i1 to i32
    %c0_i32_0 = arith.constant 0 : i32
    %2 = arith.cmpi ne, %1, %c0_i32_0 : i32
    scf.if %2 {
      %cst_102 = arith.constant -1.000000e+30 : f32
      %160 = vector.broadcast %cst_102 : f32 to vector<4x4x1xf32>
      %c0_103 = arith.constant 0 : index
      %c0_104 = arith.constant 0 : index
      %c0_105 = arith.constant 0 : index
      %161 = vector.load %arg7[%c0_103, %c0_104, %c0_105] : memref<4x4x1xf32, #tpu.memory_space<vmem>>, vector<4x4x1xf32>
      tpu.vector_store %arg7[%c0_103, %c0_104, %c0_105], %160 {strides = array<i32>} : memref<4x4x1xf32, #tpu.memory_space<vmem>>, vector<4x4x1xf32>,
      %cst_106 = arith.constant 0.000000e+00 : f32
      %162 = vector.broadcast %cst_106 : f32 to vector<4x4x1xf32>
      %c0_107 = arith.constant 0 : index
      %c0_108 = arith.constant 0 : index
      %c0_109 = arith.constant 0 : index
      %163 = vector.load %arg8[%c0_107, %c0_108, %c0_109] : memref<4x4x1xf32, #tpu.memory_space<vmem>>, vector<4x4x1xf32>
      tpu.vector_store %arg8[%c0_107, %c0_108, %c0_109], %162 {strides = array<i32>} : memref<4x4x1xf32, #tpu.memory_space<vmem>>, vector<4x4x1xf32>,
      %cst_110 = arith.constant 0.000000e+00 : f32
      %164 = vector.broadcast %cst_110 : f32 to vector<4x4x8xf32>
      %c0_111 = arith.constant 0 : index
      %c0_112 = arith.constant 0 : index
      %c0_113 = arith.constant 0 : index
      %165 = vector.load %arg9[%c0_111, %c0_112, %c0_113] : memref<4x4x8xf32, #tpu.memory_space<vmem>>, vector<4x4x8xf32>
      tpu.vector_store %arg9[%c0_111, %c0_112, %c0_113], %164 {strides = array<i32>} : memref<4x4x8xf32, #tpu.memory_space<vmem>>, vector<4x4x8xf32>,
    } else {
    }
    %c0 = arith.constant 0 : index
    %c0_1 = arith.constant 0 : index
    %c0_2 = arith.constant 0 : index
    %c0_3 = arith.constant 0 : index
    %3 = vector.load %arg3[%c0, %c0_1, %c0_2, %c0_3] : memref<1x1x4x32xf32, #tpu.memory_space<vmem>>, vector<1x1x4x32xf32>
    %4 = vector.shape_cast %3 : vector<1x1x4x32xf32> to vector<4x32xf32>
    %c0_4 = arith.constant 0 : index
    %c0_5 = arith.constant 0 : index
    %c0_6 = arith.constant 0 : index
    %c0_7 = arith.constant 0 : index
    %5 = vector.load %arg4[%c0_4, %c0_5, %c0_6, %c0_7] : memref<1x1x4x32xf32, #tpu.memory_space<vmem>>, vector<1x1x4x32xf32>
    %6 = vector.shape_cast %5 : vector<1x1x4x32xf32> to vector<4x32xf32>
    %c0_8 = arith.constant 0 : index
    %c0_9 = arith.constant 0 : index
    %c0_10 = arith.constant 0 : index
    %c0_11 = arith.constant 0 : index
    %7 = vector.load %arg5[%c0_8, %c0_9, %c0_10, %c0_11] : memref<1x1x4x32xf32, #tpu.memory_space<vmem>>, vector<1x1x4x32xf32>
    %8 = vector.shape_cast %7 : vector<1x1x4x32xf32> to vector<4x32xf32>
    %9 = vector.extract_strided_slice %4 {offsets = [0, 0], sizes = [4, 8], strides = [1, 1]} : vector<4x32xf32> to vector<4x8xf32>
    %10 = vector.extract_strided_slice %6 {offsets = [0, 0], sizes = [4, 8], strides = [1, 1]} : vector<4x32xf32> to vector<4x8xf32>
    %11 = vector.extract_strided_slice %8 {offsets = [0, 0], sizes = [4, 8], strides = [1, 1]} : vector<4x32xf32> to vector<4x8xf32>
    %cst = arith.constant dense<0.000000e+00> : vector<4x4xf32>
    %12 = tpu.matmul %9, %10, %cst {dimension_numbers = #tpu.dot_dimension_numbers<[1], [1], [0], [0], [0, 0, 1, 0], [], []>} : vector<4x8xf32>, vector<4x8xf32>, vector<4x4xf32> -> vector<4x4xf32>
    %cst_12 = arith.constant 0.353553385 : f32
    %13 = vector.broadcast %cst_12 : f32 to vector<4x4xf32>
    %14 = arith.mulf %12, %13 : vector<4x4xf32>
    %c0_13 = arith.constant 0 : index
    %c0_14 = arith.constant 0 : index
    %c0_15 = arith.constant 0 : index
    %15 = vector.load %arg7[%c0_13, %c0_14, %c0_15] : memref<4x4x1xf32, #tpu.memory_space<vmem>>, vector<1x4x1xf32>
    %16 = vector.shape_cast %15 : vector<1x4x1xf32> to vector<4x1xf32>
    %cst_16 = arith.constant dense<0xFF800000> : vector<4xf32>
    %17 = vector.multi_reduction <maximumf>, %14, %cst_16 [1] : vector<4x4xf32> to vector<4xf32>
    %18 = vector.shape_cast %17 : vector<4xf32> to vector<4x1xf32>
    %19 = arith.maximumf %16, %18 : vector<4x1xf32>
    %20 = arith.subf %16, %19 : vector<4x1xf32>
    %21 = math.exp %20 : vector<4x1xf32>
    %22 = vector.broadcast %19 : vector<4x1xf32> to vector<4x4xf32>
    %23 = arith.subf %14, %22 : vector<4x4xf32>
    %24 = math.exp %23 : vector<4x4xf32>
    %c0_17 = arith.constant 0 : index
    %c0_18 = arith.constant 0 : index
    %c0_19 = arith.constant 0 : index
    %25 = vector.load %arg8[%c0_17, %c0_18, %c0_19] : memref<4x4x1xf32, #tpu.memory_space<vmem>>, vector<1x4x1xf32>
    %26 = vector.shape_cast %25 : vector<1x4x1xf32> to vector<4x1xf32>
    %27 = arith.mulf %21, %26 : vector<4x1xf32>
    %cst_20 = arith.constant dense<0.000000e+00> : vector<4xf32>
    %28 = vector.multi_reduction <add>, %24, %cst_20 [1] : vector<4x4xf32> to vector<4xf32>
    %29 = vector.shape_cast %28 : vector<4xf32> to vector<4x1xf32>
    %30 = arith.addf %27, %29 : vector<4x1xf32>
    %c0_21 = arith.constant 0 : index
    %c0_22 = arith.constant 0 : index
    %c0_23 = arith.constant 0 : index
    %31 = vector.load %arg8[%c0_21, %c0_22, %c0_23] : memref<4x4x1xf32, #tpu.memory_space<vmem>>, vector<1x4x1xf32>
    %32 = vector.shape_cast %31 : vector<1x4x1xf32> to vector<4x1xf32>
    %33 = vector.shape_cast %30 : vector<4x1xf32> to vector<1x4x1xf32>
    tpu.vector_store %arg8[%c0_21, %c0_22, %c0_23], %33 {strides = array<i32>} : memref<4x4x1xf32, #tpu.memory_space<vmem>>, vector<1x4x1xf32>,
    %c0_24 = arith.constant 0 : index
    %c0_25 = arith.constant 0 : index
    %c0_26 = arith.constant 0 : index
    %34 = vector.load %arg9[%c0_24, %c0_25, %c0_26] : memref<4x4x8xf32, #tpu.memory_space<vmem>>, vector<1x4x8xf32>
    %35 = vector.shape_cast %34 : vector<1x4x8xf32> to vector<4x8xf32>
    %36 = vector.broadcast %21 : vector<4x1xf32> to vector<4x8xf32>
    %37 = arith.mulf %36, %35 : vector<4x8xf32>
    %cst_27 = arith.constant dense<0.000000e+00> : vector<4x8xf32>
    %38 = tpu.matmul %24, %11, %cst_27 {dimension_numbers = #tpu.dot_dimension_numbers<[1], [0], [0], [1], [0, 0, 1, 1], [], []>} : vector<4x4xf32>, vector<4x8xf32>, vector<4x8xf32> -> vector<4x8xf32>
    %39 = arith.addf %37, %38 : vector<4x8xf32>
    %c0_28 = arith.constant 0 : index
    %c0_29 = arith.constant 0 : index
    %c0_30 = arith.constant 0 : index
    %40 = vector.load %arg9[%c0_28, %c0_29, %c0_30] : memref<4x4x8xf32, #tpu.memory_space<vmem>>, vector<1x4x8xf32>
    %41 = vector.shape_cast %40 : vector<1x4x8xf32> to vector<4x8xf32>
    %42 = vector.shape_cast %39 : vector<4x8xf32> to vector<1x4x8xf32>
    tpu.vector_store %arg9[%c0_28, %c0_29, %c0_30], %42 {strides = array<i32>} : memref<4x4x8xf32, #tpu.memory_space<vmem>>, vector<1x4x8xf32>,
    %c0_31 = arith.constant 0 : index
    %c0_32 = arith.constant 0 : index
    %c0_33 = arith.constant 0 : index
    %43 = vector.load %arg7[%c0_31, %c0_32, %c0_33] : memref<4x4x1xf32, #tpu.memory_space<vmem>>, vector<1x4x1xf32>
    %44 = vector.shape_cast %43 : vector<1x4x1xf32> to vector<4x1xf32>
    %45 = vector.shape_cast %19 : vector<4x1xf32> to vector<1x4x1xf32>
    tpu.vector_store %arg7[%c0_31, %c0_32, %c0_33], %45 {strides = array<i32>} : memref<4x4x1xf32, #tpu.memory_space<vmem>>, vector<1x4x1xf32>,
    %46 = vector.extract_strided_slice %4 {offsets = [0, 8], sizes = [4, 8], strides = [1, 1]} : vector<4x32xf32> to vector<4x8xf32>
    %47 = vector.extract_strided_slice %6 {offsets = [0, 8], sizes = [4, 8], strides = [1, 1]} : vector<4x32xf32> to vector<4x8xf32>
    %48 = vector.extract_strided_slice %8 {offsets = [0, 8], sizes = [4, 8], strides = [1, 1]} : vector<4x32xf32> to vector<4x8xf32>
    %cst_34 = arith.constant dense<0.000000e+00> : vector<4x4xf32>
    %49 = tpu.matmul %46, %47, %cst_34 {dimension_numbers = #tpu.dot_dimension_numbers<[1], [1], [0], [0], [0, 0, 1, 0], [], []>} : vector<4x8xf32>, vector<4x8xf32>, vector<4x4xf32> -> vector<4x4xf32>
    %cst_35 = arith.constant 0.353553385 : f32
    %50 = vector.broadcast %cst_35 : f32 to vector<4x4xf32>
    %51 = arith.mulf %49, %50 : vector<4x4xf32>
    %c1 = arith.constant 1 : index
    %c0_36 = arith.constant 0 : index
    %c0_37 = arith.constant 0 : index
    %52 = vector.load %arg7[%c1, %c0_36, %c0_37] : memref<4x4x1xf32, #tpu.memory_space<vmem>>, vector<1x4x1xf32>
    %53 = vector.shape_cast %52 : vector<1x4x1xf32> to vector<4x1xf32>
    %cst_38 = arith.constant dense<0xFF800000> : vector<4xf32>
    %54 = vector.multi_reduction <maximumf>, %51, %cst_38 [1] : vector<4x4xf32> to vector<4xf32>
    %55 = vector.shape_cast %54 : vector<4xf32> to vector<4x1xf32>
    %56 = arith.maximumf %53, %55 : vector<4x1xf32>
    %57 = arith.subf %53, %56 : vector<4x1xf32>
    %58 = math.exp %57 : vector<4x1xf32>
    %59 = vector.broadcast %56 : vector<4x1xf32> to vector<4x4xf32>
    %60 = arith.subf %51, %59 : vector<4x4xf32>
    %61 = math.exp %60 : vector<4x4xf32>
    %c1_39 = arith.constant 1 : index
    %c0_40 = arith.constant 0 : index
    %c0_41 = arith.constant 0 : index
    %62 = vector.load %arg8[%c1_39, %c0_40, %c0_41] : memref<4x4x1xf32, #tpu.memory_space<vmem>>, vector<1x4x1xf32>
    %63 = vector.shape_cast %62 : vector<1x4x1xf32> to vector<4x1xf32>
    %64 = arith.mulf %58, %63 : vector<4x1xf32>
    %cst_42 = arith.constant dense<0.000000e+00> : vector<4xf32>
    %65 = vector.multi_reduction <add>, %61, %cst_42 [1] : vector<4x4xf32> to vector<4xf32>
    %66 = vector.shape_cast %65 : vector<4xf32> to vector<4x1xf32>
    %67 = arith.addf %64, %66 : vector<4x1xf32>
    %c1_43 = arith.constant 1 : index
    %c0_44 = arith.constant 0 : index
    %c0_45 = arith.constant 0 : index
    %68 = vector.load %arg8[%c1_43, %c0_44, %c0_45] : memref<4x4x1xf32, #tpu.memory_space<vmem>>, vector<1x4x1xf32>
    %69 = vector.shape_cast %68 : vector<1x4x1xf32> to vector<4x1xf32>
    %70 = vector.shape_cast %67 : vector<4x1xf32> to vector<1x4x1xf32>
    tpu.vector_store %arg8[%c1_43, %c0_44, %c0_45], %70 {strides = array<i32>} : memref<4x4x1xf32, #tpu.memory_space<vmem>>, vector<1x4x1xf32>,
    %c1_46 = arith.constant 1 : index
    %c0_47 = arith.constant 0 : index
    %c0_48 = arith.constant 0 : index
    %71 = vector.load %arg9[%c1_46, %c0_47, %c0_48] : memref<4x4x8xf32, #tpu.memory_space<vmem>>, vector<1x4x8xf32>
    %72 = vector.shape_cast %71 : vector<1x4x8xf32> to vector<4x8xf32>
    %73 = vector.broadcast %58 : vector<4x1xf32> to vector<4x8xf32>
    %74 = arith.mulf %73, %72 : vector<4x8xf32>
    %cst_49 = arith.constant dense<0.000000e+00> : vector<4x8xf32>
    %75 = tpu.matmul %61, %48, %cst_49 {dimension_numbers = #tpu.dot_dimension_numbers<[1], [0], [0], [1], [0, 0, 1, 1], [], []>} : vector<4x4xf32>, vector<4x8xf32>, vector<4x8xf32> -> vector<4x8xf32>
    %76 = arith.addf %74, %75 : vector<4x8xf32>
    %c1_50 = arith.constant 1 : index
    %c0_51 = arith.constant 0 : index
    %c0_52 = arith.constant 0 : index
    %77 = vector.load %arg9[%c1_50, %c0_51, %c0_52] : memref<4x4x8xf32, #tpu.memory_space<vmem>>, vector<1x4x8xf32>
    %78 = vector.shape_cast %77 : vector<1x4x8xf32> to vector<4x8xf32>
    %79 = vector.shape_cast %76 : vector<4x8xf32> to vector<1x4x8xf32>
    tpu.vector_store %arg9[%c1_50, %c0_51, %c0_52], %79 {strides = array<i32>} : memref<4x4x8xf32, #tpu.memory_space<vmem>>, vector<1x4x8xf32>,
    %c1_53 = arith.constant 1 : index
    %c0_54 = arith.constant 0 : index
    %c0_55 = arith.constant 0 : index
    %80 = vector.load %arg7[%c1_53, %c0_54, %c0_55] : memref<4x4x1xf32, #tpu.memory_space<vmem>>, vector<1x4x1xf32>
    %81 = vector.shape_cast %80 : vector<1x4x1xf32> to vector<4x1xf32>
    %82 = vector.shape_cast %56 : vector<4x1xf32> to vector<1x4x1xf32>
    tpu.vector_store %arg7[%c1_53, %c0_54, %c0_55], %82 {strides = array<i32>} : memref<4x4x1xf32, #tpu.memory_space<vmem>>, vector<1x4x1xf32>,
    %83 = vector.extract_strided_slice %4 {offsets = [0, 16], sizes = [4, 8], strides = [1, 1]} : vector<4x32xf32> to vector<4x8xf32>
    %84 = vector.extract_strided_slice %6 {offsets = [0, 16], sizes = [4, 8], strides = [1, 1]} : vector<4x32xf32> to vector<4x8xf32>
    %85 = vector.extract_strided_slice %8 {offsets = [0, 16], sizes = [4, 8], strides = [1, 1]} : vector<4x32xf32> to vector<4x8xf32>
    %cst_56 = arith.constant dense<0.000000e+00> : vector<4x4xf32>
    %86 = tpu.matmul %83, %84, %cst_56 {dimension_numbers = #tpu.dot_dimension_numbers<[1], [1], [0], [0], [0, 0, 1, 0], [], []>} : vector<4x8xf32>, vector<4x8xf32>, vector<4x4xf32> -> vector<4x4xf32>
    %cst_57 = arith.constant 0.353553385 : f32
    %87 = vector.broadcast %cst_57 : f32 to vector<4x4xf32>
    %88 = arith.mulf %86, %87 : vector<4x4xf32>
    %c2 = arith.constant 2 : index
    %c0_58 = arith.constant 0 : index
    %c0_59 = arith.constant 0 : index
    %89 = vector.load %arg7[%c2, %c0_58, %c0_59] : memref<4x4x1xf32, #tpu.memory_space<vmem>>, vector<1x4x1xf32>
    %90 = vector.shape_cast %89 : vector<1x4x1xf32> to vector<4x1xf32>
    %cst_60 = arith.constant dense<0xFF800000> : vector<4xf32>
    %91 = vector.multi_reduction <maximumf>, %88, %cst_60 [1] : vector<4x4xf32> to vector<4xf32>
    %92 = vector.shape_cast %91 : vector<4xf32> to vector<4x1xf32>
    %93 = arith.maximumf %90, %92 : vector<4x1xf32>
    %94 = arith.subf %90, %93 : vector<4x1xf32>
    %95 = math.exp %94 : vector<4x1xf32>
    %96 = vector.broadcast %93 : vector<4x1xf32> to vector<4x4xf32>
    %97 = arith.subf %88, %96 : vector<4x4xf32>
    %98 = math.exp %97 : vector<4x4xf32>
    %c2_61 = arith.constant 2 : index
    %c0_62 = arith.constant 0 : index
    %c0_63 = arith.constant 0 : index
    %99 = vector.load %arg8[%c2_61, %c0_62, %c0_63] : memref<4x4x1xf32, #tpu.memory_space<vmem>>, vector<1x4x1xf32>
    %100 = vector.shape_cast %99 : vector<1x4x1xf32> to vector<4x1xf32>
    %101 = arith.mulf %95, %100 : vector<4x1xf32>
    %cst_64 = arith.constant dense<0.000000e+00> : vector<4xf32>
    %102 = vector.multi_reduction <add>, %98, %cst_64 [1] : vector<4x4xf32> to vector<4xf32>
    %103 = vector.shape_cast %102 : vector<4xf32> to vector<4x1xf32>
    %104 = arith.addf %101, %103 : vector<4x1xf32>
    %c2_65 = arith.constant 2 : index
    %c0_66 = arith.constant 0 : index
    %c0_67 = arith.constant 0 : index
    %105 = vector.load %arg8[%c2_65, %c0_66, %c0_67] : memref<4x4x1xf32, #tpu.memory_space<vmem>>, vector<1x4x1xf32>
    %106 = vector.shape_cast %105 : vector<1x4x1xf32> to vector<4x1xf32>
    %107 = vector.shape_cast %104 : vector<4x1xf32> to vector<1x4x1xf32>
    tpu.vector_store %arg8[%c2_65, %c0_66, %c0_67], %107 {strides = array<i32>} : memref<4x4x1xf32, #tpu.memory_space<vmem>>, vector<1x4x1xf32>,
    %c2_68 = arith.constant 2 : index
    %c0_69 = arith.constant 0 : index
    %c0_70 = arith.constant 0 : index
    %108 = vector.load %arg9[%c2_68, %c0_69, %c0_70] : memref<4x4x8xf32, #tpu.memory_space<vmem>>, vector<1x4x8xf32>
    %109 = vector.shape_cast %108 : vector<1x4x8xf32> to vector<4x8xf32>
    %110 = vector.broadcast %95 : vector<4x1xf32> to vector<4x8xf32>
    %111 = arith.mulf %110, %109 : vector<4x8xf32>
    %cst_71 = arith.constant dense<0.000000e+00> : vector<4x8xf32>
    %112 = tpu.matmul %98, %85, %cst_71 {dimension_numbers = #tpu.dot_dimension_numbers<[1], [0], [0], [1], [0, 0, 1, 1], [], []>} : vector<4x4xf32>, vector<4x8xf32>, vector<4x8xf32> -> vector<4x8xf32>
    %113 = arith.addf %111, %112 : vector<4x8xf32>
    %c2_72 = arith.constant 2 : index
    %c0_73 = arith.constant 0 : index
    %c0_74 = arith.constant 0 : index
    %114 = vector.load %arg9[%c2_72, %c0_73, %c0_74] : memref<4x4x8xf32, #tpu.memory_space<vmem>>, vector<1x4x8xf32>
    %115 = vector.shape_cast %114 : vector<1x4x8xf32> to vector<4x8xf32>
    %116 = vector.shape_cast %113 : vector<4x8xf32> to vector<1x4x8xf32>
    tpu.vector_store %arg9[%c2_72, %c0_73, %c0_74], %116 {strides = array<i32>} : memref<4x4x8xf32, #tpu.memory_space<vmem>>, vector<1x4x8xf32>,
    %c2_75 = arith.constant 2 : index
    %c0_76 = arith.constant 0 : index
    %c0_77 = arith.constant 0 : index
    %117 = vector.load %arg7[%c2_75, %c0_76, %c0_77] : memref<4x4x1xf32, #tpu.memory_space<vmem>>, vector<1x4x1xf32>
    %118 = vector.shape_cast %117 : vector<1x4x1xf32> to vector<4x1xf32>
    %119 = vector.shape_cast %93 : vector<4x1xf32> to vector<1x4x1xf32>
    tpu.vector_store %arg7[%c2_75, %c0_76, %c0_77], %119 {strides = array<i32>} : memref<4x4x1xf32, #tpu.memory_space<vmem>>, vector<1x4x1xf32>,
    %120 = vector.extract_strided_slice %4 {offsets = [0, 24], sizes = [4, 8], strides = [1, 1]} : vector<4x32xf32> to vector<4x8xf32>
    %121 = vector.extract_strided_slice %6 {offsets = [0, 24], sizes = [4, 8], strides = [1, 1]} : vector<4x32xf32> to vector<4x8xf32>
    %122 = vector.extract_strided_slice %8 {offsets = [0, 24], sizes = [4, 8], strides = [1, 1]} : vector<4x32xf32> to vector<4x8xf32>
    %cst_78 = arith.constant dense<0.000000e+00> : vector<4x4xf32>
    %123 = tpu.matmul %120, %121, %cst_78 {dimension_numbers = #tpu.dot_dimension_numbers<[1], [1], [0], [0], [0, 0, 1, 0], [], []>} : vector<4x8xf32>, vector<4x8xf32>, vector<4x4xf32> -> vector<4x4xf32>
    %cst_79 = arith.constant 0.353553385 : f32
    %124 = vector.broadcast %cst_79 : f32 to vector<4x4xf32>
    %125 = arith.mulf %123, %124 : vector<4x4xf32>
    %c3 = arith.constant 3 : index
    %c0_80 = arith.constant 0 : index
    %c0_81 = arith.constant 0 : index
    %126 = vector.load %arg7[%c3, %c0_80, %c0_81] : memref<4x4x1xf32, #tpu.memory_space<vmem>>, vector<1x4x1xf32>
    %127 = vector.shape_cast %126 : vector<1x4x1xf32> to vector<4x1xf32>
    %cst_82 = arith.constant dense<0xFF800000> : vector<4xf32>
    %128 = vector.multi_reduction <maximumf>, %125, %cst_82 [1] : vector<4x4xf32> to vector<4xf32>
    %129 = vector.shape_cast %128 : vector<4xf32> to vector<4x1xf32>
    %130 = arith.maximumf %127, %129 : vector<4x1xf32>
    %131 = arith.subf %127, %130 : vector<4x1xf32>
    %132 = math.exp %131 : vector<4x1xf32>
    %133 = vector.broadcast %130 : vector<4x1xf32> to vector<4x4xf32>
    %134 = arith.subf %125, %133 : vector<4x4xf32>
    %135 = math.exp %134 : vector<4x4xf32>
    %c3_83 = arith.constant 3 : index
    %c0_84 = arith.constant 0 : index
    %c0_85 = arith.constant 0 : index
    %136 = vector.load %arg8[%c3_83, %c0_84, %c0_85] : memref<4x4x1xf32, #tpu.memory_space<vmem>>, vector<1x4x1xf32>
    %137 = vector.shape_cast %136 : vector<1x4x1xf32> to vector<4x1xf32>
    %138 = arith.mulf %132, %137 : vector<4x1xf32>
    %cst_86 = arith.constant dense<0.000000e+00> : vector<4xf32>
    %139 = vector.multi_reduction <add>, %135, %cst_86 [1] : vector<4x4xf32> to vector<4xf32>
    %140 = vector.shape_cast %139 : vector<4xf32> to vector<4x1xf32>
    %141 = arith.addf %138, %140 : vector<4x1xf32>
    %c3_87 = arith.constant 3 : index
    %c0_88 = arith.constant 0 : index
    %c0_89 = arith.constant 0 : index
    %142 = vector.load %arg8[%c3_87, %c0_88, %c0_89] : memref<4x4x1xf32, #tpu.memory_space<vmem>>, vector<1x4x1xf32>
    %143 = vector.shape_cast %142 : vector<1x4x1xf32> to vector<4x1xf32>
    %144 = vector.shape_cast %141 : vector<4x1xf32> to vector<1x4x1xf32>
    tpu.vector_store %arg8[%c3_87, %c0_88, %c0_89], %144 {strides = array<i32>} : memref<4x4x1xf32, #tpu.memory_space<vmem>>, vector<1x4x1xf32>,
    %c3_90 = arith.constant 3 : index
    %c0_91 = arith.constant 0 : index
    %c0_92 = arith.constant 0 : index
    %145 = vector.load %arg9[%c3_90, %c0_91, %c0_92] : memref<4x4x8xf32, #tpu.memory_space<vmem>>, vector<1x4x8xf32>
    %146 = vector.shape_cast %145 : vector<1x4x8xf32> to vector<4x8xf32>
    %147 = vector.broadcast %132 : vector<4x1xf32> to vector<4x8xf32>
    %148 = arith.mulf %147, %146 : vector<4x8xf32>
    %cst_93 = arith.constant dense<0.000000e+00> : vector<4x8xf32>
    %149 = tpu.matmul %135, %122, %cst_93 {dimension_numbers = #tpu.dot_dimension_numbers<[1], [0], [0], [1], [0, 0, 1, 1], [], []>} : vector<4x4xf32>, vector<4x8xf32>, vector<4x8xf32> -> vector<4x8xf32>
    %150 = arith.addf %148, %149 : vector<4x8xf32>
    %c3_94 = arith.constant 3 : index
    %c0_95 = arith.constant 0 : index
    %c0_96 = arith.constant 0 : index
    %151 = vector.load %arg9[%c3_94, %c0_95, %c0_96] : memref<4x4x8xf32, #tpu.memory_space<vmem>>, vector<1x4x8xf32>
    %152 = vector.shape_cast %151 : vector<1x4x8xf32> to vector<4x8xf32>
    %153 = vector.shape_cast %150 : vector<4x8xf32> to vector<1x4x8xf32>
    tpu.vector_store %arg9[%c3_94, %c0_95, %c0_96], %153 {strides = array<i32>} : memref<4x4x8xf32, #tpu.memory_space<vmem>>, vector<1x4x8xf32>,
    %c3_97 = arith.constant 3 : index
    %c0_98 = arith.constant 0 : index
    %c0_99 = arith.constant 0 : index
    %154 = vector.load %arg7[%c3_97, %c0_98, %c0_99] : memref<4x4x1xf32, #tpu.memory_space<vmem>>, vector<1x4x1xf32>
    %155 = vector.shape_cast %154 : vector<1x4x1xf32> to vector<4x1xf32>
    %156 = vector.shape_cast %130 : vector<4x1xf32> to vector<1x4x1xf32>
    tpu.vector_store %arg7[%c3_97, %c0_98, %c0_99], %156 {strides = array<i32>} : memref<4x4x1xf32, #tpu.memory_space<vmem>>, vector<1x4x1xf32>,
    %c0_i32_100 = arith.constant 0 : i32
    %157 = arith.cmpi eq, %arg2, %c0_i32_100 : i32
    %158 = arith.extui %157 : i1 to i32
    %c0_i32_101 = arith.constant 0 : i32
    %159 = arith.cmpi ne, %158, %c0_i32_101 : i32
    scf.if %159 {
      %c0_102 = arith.constant 0 : index
      %c0_103 = arith.constant 0 : index
      %c0_104 = arith.constant 0 : index
      %160 = vector.load %arg8[%c0_102, %c0_103, %c0_104] : memref<4x4x1xf32, #tpu.memory_space<vmem>>, vector<1x4x1xf32>
      %161 = vector.shape_cast %160 : vector<1x4x1xf32> to vector<4x1xf32>
      %162 = tpu.reciprocal %161 {approx = true} : vector<4x1xf32> -> vector<4x1xf32>
      %c0_105 = arith.constant 0 : index
      %c0_106 = arith.constant 0 : index
      %c0_107 = arith.constant 0 : index
      %163 = vector.load %arg9[%c0_105, %c0_106, %c0_107] : memref<4x4x8xf32, #tpu.memory_space<vmem>>, vector<1x4x8xf32>
      %164 = vector.shape_cast %163 : vector<1x4x8xf32> to vector<4x8xf32>
      %165 = vector.broadcast %162 : vector<4x1xf32> to vector<4x8xf32>
      %166 = arith.mulf %164, %165 : vector<4x8xf32>
      %c0_108 = arith.constant 0 : index
      %c0_109 = arith.constant 0 : index
      %c0_110 = arith.constant 0 : index
      %167 = vector.load %arg6[%c0_108, %c0_109, %c0_110] : memref<1x4x32xf32, #tpu.memory_space<vmem>>, vector<1x4x8xf32>
      %168 = vector.shape_cast %167 : vector<1x4x8xf32> to vector<4x8xf32>
      %169 = vector.shape_cast %166 : vector<4x8xf32> to vector<1x4x8xf32>
      tpu.vector_store %arg6[%c0_108, %c0_109, %c0_110], %169 {strides = array<i32>} : memref<1x4x32xf32, #tpu.memory_space<vmem>>, vector<1x4x8xf32>,
      %c1_111 = arith.constant 1 : index
      %c0_112 = arith.constant 0 : index
      %c0_113 = arith.constant 0 : index
      %170 = vector.load %arg8[%c1_111, %c0_112, %c0_113] : memref<4x4x1xf32, #tpu.memory_space<vmem>>, vector<1x4x1xf32>
      %171 = vector.shape_cast %170 : vector<1x4x1xf32> to vector<4x1xf32>
      %172 = tpu.reciprocal %171 {approx = true} : vector<4x1xf32> -> vector<4x1xf32>
      %c1_114 = arith.constant 1 : index
      %c0_115 = arith.constant 0 : index
      %c0_116 = arith.constant 0 : index
      %173 = vector.load %arg9[%c1_114, %c0_115, %c0_116] : memref<4x4x8xf32, #tpu.memory_space<vmem>>, vector<1x4x8xf32>
      %174 = vector.shape_cast %173 : vector<1x4x8xf32> to vector<4x8xf32>
      %175 = vector.broadcast %172 : vector<4x1xf32> to vector<4x8xf32>
      %176 = arith.mulf %174, %175 : vector<4x8xf32>
      %c0_117 = arith.constant 0 : index
      %c0_118 = arith.constant 0 : index
      %c8 = arith.constant 8 : index
      %177 = vector.load %arg6[%c0_117, %c0_118, %c8] : memref<1x4x32xf32, #tpu.memory_space<vmem>>, vector<1x4x8xf32>
      %178 = vector.shape_cast %177 : vector<1x4x8xf32> to vector<4x8xf32>
      %179 = vector.shape_cast %176 : vector<4x8xf32> to vector<1x4x8xf32>
      tpu.vector_store %arg6[%c0_117, %c0_118, %c8], %179 {strides = array<i32>} : memref<1x4x32xf32, #tpu.memory_space<vmem>>, vector<1x4x8xf32>,
      %c2_119 = arith.constant 2 : index
      %c0_120 = arith.constant 0 : index
      %c0_121 = arith.constant 0 : index
      %180 = vector.load %arg8[%c2_119, %c0_120, %c0_121] : memref<4x4x1xf32, #tpu.memory_space<vmem>>, vector<1x4x1xf32>
      %181 = vector.shape_cast %180 : vector<1x4x1xf32> to vector<4x1xf32>
      %182 = tpu.reciprocal %181 {approx = true} : vector<4x1xf32> -> vector<4x1xf32>
      %c2_122 = arith.constant 2 : index
      %c0_123 = arith.constant 0 : index
      %c0_124 = arith.constant 0 : index
      %183 = vector.load %arg9[%c2_122, %c0_123, %c0_124] : memref<4x4x8xf32, #tpu.memory_space<vmem>>, vector<1x4x8xf32>
      %184 = vector.shape_cast %183 : vector<1x4x8xf32> to vector<4x8xf32>
      %185 = vector.broadcast %182 : vector<4x1xf32> to vector<4x8xf32>
      %186 = arith.mulf %184, %185 : vector<4x8xf32>
      %c0_125 = arith.constant 0 : index
      %c0_126 = arith.constant 0 : index
      %c16 = arith.constant 16 : index
      %187 = vector.load %arg6[%c0_125, %c0_126, %c16] : memref<1x4x32xf32, #tpu.memory_space<vmem>>, vector<1x4x8xf32>
      %188 = vector.shape_cast %187 : vector<1x4x8xf32> to vector<4x8xf32>
      %189 = vector.shape_cast %186 : vector<4x8xf32> to vector<1x4x8xf32>
      tpu.vector_store %arg6[%c0_125, %c0_126, %c16], %189 {strides = array<i32>} : memref<1x4x32xf32, #tpu.memory_space<vmem>>, vector<1x4x8xf32>,
      %c3_127 = arith.constant 3 : index
      %c0_128 = arith.constant 0 : index
      %c0_129 = arith.constant 0 : index
      %190 = vector.load %arg8[%c3_127, %c0_128, %c0_129] : memref<4x4x1xf32, #tpu.memory_space<vmem>>, vector<1x4x1xf32>
      %191 = vector.shape_cast %190 : vector<1x4x1xf32> to vector<4x1xf32>
      %192 = tpu.reciprocal %191 {approx = true} : vector<4x1xf32> -> vector<4x1xf32>
      %c3_130 = arith.constant 3 : index
      %c0_131 = arith.constant 0 : index
      %c0_132 = arith.constant 0 : index
      %193 = vector.load %arg9[%c3_130, %c0_131, %c0_132] : memref<4x4x8xf32, #tpu.memory_space<vmem>>, vector<1x4x8xf32>
      %194 = vector.shape_cast %193 : vector<1x4x8xf32> to vector<4x8xf32>
      %195 = vector.broadcast %192 : vector<4x1xf32> to vector<4x8xf32>
      %196 = arith.mulf %194, %195 : vector<4x8xf32>
      %c0_133 = arith.constant 0 : index
      %c0_134 = arith.constant 0 : index
      %c24 = arith.constant 24 : index
      %197 = vector.load %arg6[%c0_133, %c0_134, %c24] : memref<1x4x32xf32, #tpu.memory_space<vmem>>, vector<1x4x8xf32>
      %198 = vector.shape_cast %197 : vector<1x4x8xf32> to vector<4x8xf32>
      %199 = vector.shape_cast %196 : vector<4x8xf32> to vector<1x4x8xf32>
      tpu.vector_store %arg6[%c0_133, %c0_134, %c24], %199 {strides = array<i32>} : memref<1x4x32xf32, #tpu.memory_space<vmem>>, vector<1x4x8xf32>,
    } else {
    }
    return
  }
  func.func @transform_0(%arg0: i32, %arg1: i32, %arg2: i32) -> (i32, i32, i32, i32) {
    %c0_i32 = arith.constant 0 : i32
    %c0_i32_0 = arith.constant 0 : i32
    %c0_i32_1 = arith.constant 0 : i32
    return %c0_i32, %arg0, %arg1, %c0_i32_0 : i32, i32, i32, i32
  }
  func.func @transform_1(%arg0: i32, %arg1: i32, %arg2: i32) -> (i32, i32, i32, i32) {
    %c1_i32 = arith.constant 1 : i32
    %c0_i32 = arith.constant 0 : i32
    %c0_i32_0 = arith.constant 0 : i32
    return %c1_i32, %arg0, %arg2, %c0_i32 : i32, i32, i32, i32
  }
  func.func @transform_2(%arg0: i32, %arg1: i32, %arg2: i32) -> (i32, i32, i32, i32) {
    %c2_i32 = arith.constant 2 : i32
    %c0_i32 = arith.constant 0 : i32
    %c0_i32_0 = arith.constant 0 : i32
    return %c2_i32, %arg0, %arg2, %c0_i32 : i32, i32, i32, i32
  }
  func.func @transform_3(%arg0: i32, %arg1: i32, %arg2: i32) -> (i32, i32, i32) {
    %c0_i32 = arith.constant 0 : i32
    %c0_i32_0 = arith.constant 0 : i32
    return %arg0, %arg1, %c0_i32 : i32, i32, i32
  }
}

module attributes {stable_mosaic.version = 11 : i64} {
  func.func @_fused_linear_kernel(%arg0: i32, %arg1: i32, %arg2: i32, %arg3: memref<8x32xf32, #tpu.memory_space<vmem>>, %arg4: memref<32x32xf32, #tpu.memory_space<vmem>>, %arg5: memref<1x32xf32, #tpu.memory_space<vmem>>, %arg6: memref<1x32xf32, #tpu.memory_space<vmem>>, %arg7: memref<1x32xf32, #tpu.memory_space<vmem>>, %arg8: memref<8x32xf32, #tpu.memory_space<vmem>>, %arg9: memref<8x32xf32, #tpu.memory_space<vmem>>) attributes {dimension_semantics = [#tpu.dimension_semantics<parallel>, #tpu.dimension_semantics<parallel>, #tpu.dimension_semantics<arbitrary>], iteration_bounds = array<i64: 1, 1, 1>, scalar_prefetch = 0 : i64, scratch_operands = 1 : i64, tpu.core_type = #tpu.core_type<tc>, window_params = [{transform_indices = @transform_0, window_bounds = array<i64: 8, 32>}, {transform_indices = @transform_1, window_bounds = array<i64: 32, 32>}, {transform_indices = @transform_2, window_bounds = array<i64: 1, 32>}, {pipeline_mode = #tpu.pipeline_mode<synchronous>, transform_indices = @transform_3, window_bounds = array<i64: 1, 32>}, {pipeline_mode = #tpu.pipeline_mode<synchronous>, transform_indices = @transform_4, window_bounds = array<i64: 1, 32>}, {transform_indices = @transform_5, window_bounds = array<i64: 8, 32>}]} {
    %c0_i32 = arith.constant 0 : i32
    %0 = arith.cmpi eq, %arg2, %c0_i32 : i32
    %1 = arith.extui %0 : i1 to i32
    %c0_i32_0 = arith.constant 0 : i32
    %2 = arith.cmpi ne, %1, %c0_i32_0 : i32
    scf.if %2 {
      %cst_19 = arith.constant 0.000000e+00 : f32
      %36 = vector.broadcast %cst_19 : f32 to vector<8x32xf32>
      %c0_20 = arith.constant 0 : index
      %c0_21 = arith.constant 0 : index
      %37 = vector.load %arg9[%c0_20, %c0_21] : memref<8x32xf32, #tpu.memory_space<vmem>>, vector<8x32xf32>
      tpu.vector_store %arg9[%c0_20, %c0_21], %36 {strides = array<i32>} : memref<8x32xf32, #tpu.memory_space<vmem>>, vector<8x32xf32>,
    } else {
    }
    %c0 = arith.constant 0 : index
    %c0_1 = arith.constant 0 : index
    %3 = vector.load %arg3[%c0, %c0_1] : memref<8x32xf32, #tpu.memory_space<vmem>>, vector<8x32xf32>
    %c0_2 = arith.constant 0 : index
    %c0_3 = arith.constant 0 : index
    %4 = vector.load %arg6[%c0_2, %c0_3] : memref<1x32xf32, #tpu.memory_space<vmem>>, vector<1x32xf32>
    %c0_4 = arith.constant 0 : index
    %c0_5 = arith.constant 0 : index
    %5 = vector.load %arg7[%c0_4, %c0_5] : memref<1x32xf32, #tpu.memory_space<vmem>>, vector<1x32xf32>
    %cst = arith.constant dense<0.000000e+00> : vector<8xf32>
    %6 = vector.multi_reduction <add>, %3, %cst [1] : vector<8x32xf32> to vector<8xf32>
    %7 = vector.shape_cast %6 : vector<8xf32> to vector<8x1xf32>
    %cst_6 = arith.constant 3.200000e+01 : f32
    %8 = vector.broadcast %cst_6 : f32 to vector<8x1xf32>
    %9 = arith.divf %7, %8 : vector<8x1xf32>
    %10 = vector.broadcast %9 : vector<8x1xf32> to vector<8x32xf32>
    %11 = arith.subf %3, %10 : vector<8x32xf32>
    %12 = arith.mulf %11, %11 : vector<8x32xf32>
    %cst_7 = arith.constant dense<0.000000e+00> : vector<8xf32>
    %13 = vector.multi_reduction <add>, %12, %cst_7 [1] : vector<8x32xf32> to vector<8xf32>
    %14 = vector.shape_cast %13 : vector<8xf32> to vector<8x1xf32>
    %cst_8 = arith.constant 3.200000e+01 : f32
    %15 = vector.broadcast %cst_8 : f32 to vector<8x1xf32>
    %16 = arith.divf %14, %15 : vector<8x1xf32>
    %17 = vector.broadcast %9 : vector<8x1xf32> to vector<8x32xf32>
    %18 = arith.subf %3, %17 : vector<8x32xf32>
    %cst_9 = arith.constant 9.99999974E-6 : f32
    %19 = vector.broadcast %cst_9 : f32 to vector<8x1xf32>
    %20 = arith.addf %16, %19 : vector<8x1xf32>
    %21 = math.rsqrt %20 : vector<8x1xf32>
    %22 = vector.broadcast %21 : vector<8x1xf32> to vector<8x32xf32>
    %23 = arith.mulf %18, %22 : vector<8x32xf32>
    %24 = vector.broadcast %4 : vector<1x32xf32> to vector<8x32xf32>
    %25 = arith.mulf %23, %24 : vector<8x32xf32>
    %26 = vector.broadcast %5 : vector<1x32xf32> to vector<8x32xf32>
    %27 = arith.addf %25, %26 : vector<8x32xf32>
    %c0_10 = arith.constant 0 : index
    %c0_11 = arith.constant 0 : index
    %28 = vector.load %arg9[%c0_10, %c0_11] : memref<8x32xf32, #tpu.memory_space<vmem>>, vector<8x32xf32>
    %c0_12 = arith.constant 0 : index
    %c0_13 = arith.constant 0 : index
    %29 = vector.load %arg4[%c0_12, %c0_13] : memref<32x32xf32, #tpu.memory_space<vmem>>, vector<32x32xf32>
    %cst_14 = arith.constant dense<0.000000e+00> : vector<8x32xf32>
    %30 = tpu.matmul %27, %29, %cst_14 {dimension_numbers = #tpu.dot_dimension_numbers<[1], [0], [0], [1], [0, 0, 1, 1], [], []>} : vector<8x32xf32>, vector<32x32xf32>, vector<8x32xf32> -> vector<8x32xf32>
    %31 = arith.addf %28, %30 : vector<8x32xf32>
    %c0_15 = arith.constant 0 : index
    %c0_16 = arith.constant 0 : index
    %32 = vector.load %arg9[%c0_15, %c0_16] : memref<8x32xf32, #tpu.memory_space<vmem>>, vector<8x32xf32>
    tpu.vector_store %arg9[%c0_15, %c0_16], %31 {strides = array<i32>} : memref<8x32xf32, #tpu.memory_space<vmem>>, vector<8x32xf32>,
    %c0_i32_17 = arith.constant 0 : i32
    %33 = arith.cmpi eq, %arg2, %c0_i32_17 : i32
    %34 = arith.extui %33 : i1 to i32
    %c0_i32_18 = arith.constant 0 : i32
    %35 = arith.cmpi ne, %34, %c0_i32_18 : i32
    scf.if %35 {
      %c0_19 = arith.constant 0 : index
      %c0_20 = arith.constant 0 : index
      %36 = vector.load %arg9[%c0_19, %c0_20] : memref<8x32xf32, #tpu.memory_space<vmem>>, vector<8x32xf32>
      %c0_21 = arith.constant 0 : index
      %c0_22 = arith.constant 0 : index
      %37 = vector.load %arg5[%c0_21, %c0_22] : memref<1x32xf32, #tpu.memory_space<vmem>>, vector<1x32xf32>
      %38 = vector.broadcast %37 : vector<1x32xf32> to vector<8x32xf32>
      %39 = arith.addf %36, %38 : vector<8x32xf32>
      %40 = arith.mulf %39, %39 : vector<8x32xf32>
      %41 = arith.mulf %39, %40 : vector<8x32xf32>
      %cst_23 = arith.constant 4.471500e-02 : f32
      %42 = vector.broadcast %cst_23 : f32 to vector<8x32xf32>
      %43 = arith.mulf %42, %41 : vector<8x32xf32>
      %44 = arith.addf %39, %43 : vector<8x32xf32>
      %cst_24 = arith.constant 0.797884583 : f32
      %45 = vector.broadcast %cst_24 : f32 to vector<8x32xf32>
      %46 = arith.mulf %45, %44 : vector<8x32xf32>
      %47 = math.tanh %46 : vector<8x32xf32>
      %cst_25 = arith.constant 1.000000e+00 : f32
      %48 = vector.broadcast %cst_25 : f32 to vector<8x32xf32>
      %49 = arith.addf %48, %47 : vector<8x32xf32>
      %cst_26 = arith.constant 5.000000e-01 : f32
      %50 = vector.broadcast %cst_26 : f32 to vector<8x32xf32>
      %51 = arith.mulf %50, %49 : vector<8x32xf32>
      %52 = arith.mulf %39, %51 : vector<8x32xf32>
      %c0_27 = arith.constant 0 : index
      %c0_28 = arith.constant 0 : index
      %53 = vector.load %arg8[%c0_27, %c0_28] : memref<8x32xf32, #tpu.memory_space<vmem>>, vector<8x32xf32>
      tpu.vector_store %arg8[%c0_27, %c0_28], %52 {strides = array<i32>} : memref<8x32xf32, #tpu.memory_space<vmem>>, vector<8x32xf32>,
    } else {
    }
    return
  }
  func.func @transform_0(%arg0: i32, %arg1: i32, %arg2: i32) -> (i32, i32) {
    %c0_i32 = arith.constant 0 : i32
    return %arg0, %arg2 : i32, i32
  }
  func.func @transform_1(%arg0: i32, %arg1: i32, %arg2: i32) -> (i32, i32) {
    %c0_i32 = arith.constant 0 : i32
    return %arg2, %arg1 : i32, i32
  }
  func.func @transform_2(%arg0: i32, %arg1: i32, %arg2: i32) -> (i32, i32) {
    %c0_i32 = arith.constant 0 : i32
    %c0_i32_0 = arith.constant 0 : i32
    return %c0_i32, %arg1 : i32, i32
  }
  func.func @transform_3(%arg0: i32, %arg1: i32, %arg2: i32) -> (i32, i32) {
    %c0_i32 = arith.constant 0 : i32
    %c0_i32_0 = arith.constant 0 : i32
    %c0_i32_1 = arith.constant 0 : i32
    return %c0_i32, %c0_i32_0 : i32, i32
  }
  func.func @transform_4(%arg0: i32, %arg1: i32, %arg2: i32) -> (i32, i32) {
    %c0_i32 = arith.constant 0 : i32
    %c0_i32_0 = arith.constant 0 : i32
    %c0_i32_1 = arith.constant 0 : i32
    return %c0_i32, %c0_i32_0 : i32, i32
  }
  func.func @transform_5(%arg0: i32, %arg1: i32, %arg2: i32) -> (i32, i32) {
    %c0_i32 = arith.constant 0 : i32
    return %arg0, %arg1 : i32, i32
  }
}

module attributes {stable_mosaic.version = 11 : i64} {
  func.func @_fused_linear_kernel(%arg0: i32, %arg1: i32, %arg2: i32, %arg3: memref<8x128xf32, #tpu.memory_space<vmem>>, %arg4: memref<128x32xf32, #tpu.memory_space<vmem>>, %arg5: memref<1x32xf32, #tpu.memory_space<vmem>>, %arg6: memref<8x32xf32, #tpu.memory_space<vmem>>, %arg7: memref<8x32xf32, #tpu.memory_space<vmem>>, %arg8: memref<8x32xf32, #tpu.memory_space<vmem>>) attributes {dimension_semantics = [#tpu.dimension_semantics<parallel>, #tpu.dimension_semantics<parallel>, #tpu.dimension_semantics<arbitrary>], iteration_bounds = array<i64: 1, 1, 1>, scalar_prefetch = 0 : i64, scratch_operands = 1 : i64, tpu.core_type = #tpu.core_type<tc>, window_params = [{transform_indices = @transform_0, window_bounds = array<i64: 8, 128>}, {transform_indices = @transform_1, window_bounds = array<i64: 128, 32>}, {transform_indices = @transform_2, window_bounds = array<i64: 1, 32>}, {transform_indices = @transform_3, window_bounds = array<i64: 8, 32>}, {transform_indices = @transform_4, window_bounds = array<i64: 8, 32>}]} {
    %c0_i32 = arith.constant 0 : i32
    %0 = arith.cmpi eq, %arg2, %c0_i32 : i32
    %1 = arith.extui %0 : i1 to i32
    %c0_i32_0 = arith.constant 0 : i32
    %2 = arith.cmpi ne, %1, %c0_i32_0 : i32
    scf.if %2 {
      %cst_10 = arith.constant 0.000000e+00 : f32
      %12 = vector.broadcast %cst_10 : f32 to vector<8x32xf32>
      %c0_11 = arith.constant 0 : index
      %c0_12 = arith.constant 0 : index
      %13 = vector.load %arg8[%c0_11, %c0_12] : memref<8x32xf32, #tpu.memory_space<vmem>>, vector<8x32xf32>
      tpu.vector_store %arg8[%c0_11, %c0_12], %12 {strides = array<i32>} : memref<8x32xf32, #tpu.memory_space<vmem>>, vector<8x32xf32>,
    } else {
    }
    %c0 = arith.constant 0 : index
    %c0_1 = arith.constant 0 : index
    %3 = vector.load %arg3[%c0, %c0_1] : memref<8x128xf32, #tpu.memory_space<vmem>>, vector<8x128xf32>
    %c0_2 = arith.constant 0 : index
    %c0_3 = arith.constant 0 : index
    %4 = vector.load %arg8[%c0_2, %c0_3] : memref<8x32xf32, #tpu.memory_space<vmem>>, vector<8x32xf32>
    %c0_4 = arith.constant 0 : index
    %c0_5 = arith.constant 0 : index
    %5 = vector.load %arg4[%c0_4, %c0_5] : memref<128x32xf32, #tpu.memory_space<vmem>>, vector<128x32xf32>
    %cst = arith.constant dense<0.000000e+00> : vector<8x32xf32>
    %6 = tpu.matmul %3, %5, %cst {dimension_numbers = #tpu.dot_dimension_numbers<[1], [0], [0], [1], [0, 0, 1, 1], [], []>} : vector<8x128xf32>, vector<128x32xf32>, vector<8x32xf32> -> vector<8x32xf32>
    %7 = arith.addf %4, %6 : vector<8x32xf32>
    %c0_6 = arith.constant 0 : index
    %c0_7 = arith.constant 0 : index
    %8 = vector.load %arg8[%c0_6, %c0_7] : memref<8x32xf32, #tpu.memory_space<vmem>>, vector<8x32xf32>
    tpu.vector_store %arg8[%c0_6, %c0_7], %7 {strides = array<i32>} : memref<8x32xf32, #tpu.memory_space<vmem>>, vector<8x32xf32>,
    %c0_i32_8 = arith.constant 0 : i32
    %9 = arith.cmpi eq, %arg2, %c0_i32_8 : i32
    %10 = arith.extui %9 : i1 to i32
    %c0_i32_9 = arith.constant 0 : i32
    %11 = arith.cmpi ne, %10, %c0_i32_9 : i32
    scf.if %11 {
      %c0_10 = arith.constant 0 : index
      %c0_11 = arith.constant 0 : index
      %12 = vector.load %arg8[%c0_10, %c0_11] : memref<8x32xf32, #tpu.memory_space<vmem>>, vector<8x32xf32>
      %c0_12 = arith.constant 0 : index
      %c0_13 = arith.constant 0 : index
      %13 = vector.load %arg5[%c0_12, %c0_13] : memref<1x32xf32, #tpu.memory_space<vmem>>, vector<1x32xf32>
      %14 = vector.broadcast %13 : vector<1x32xf32> to vector<8x32xf32>
      %15 = arith.addf %12, %14 : vector<8x32xf32>
      %c0_14 = arith.constant 0 : index
      %c0_15 = arith.constant 0 : index
      %16 = vector.load %arg6[%c0_14, %c0_15] : memref<8x32xf32, #tpu.memory_space<vmem>>, vector<8x32xf32>
      %17 = arith.addf %15, %16 : vector<8x32xf32>
      %c0_16 = arith.constant 0 : index
      %c0_17 = arith.constant 0 : index
      %18 = vector.load %arg7[%c0_16, %c0_17] : memref<8x32xf32, #tpu.memory_space<vmem>>, vector<8x32xf32>
      tpu.vector_store %arg7[%c0_16, %c0_17], %17 {strides = array<i32>} : memref<8x32xf32, #tpu.memory_space<vmem>>, vector<8x32xf32>,
    } else {
    }
    return
  }
  func.func @transform_0(%arg0: i32, %arg1: i32, %arg2: i32) -> (i32, i32) {
    %c0_i32 = arith.constant 0 : i32
    return %arg0, %arg2 : i32, i32
  }
  func.func @transform_1(%arg0: i32, %arg1: i32, %arg2: i32) -> (i32, i32) {
    %c0_i32 = arith.constant 0 : i32
    return %arg2, %arg1 : i32, i32
  }
  func.func @transform_2(%arg0: i32, %arg1: i32, %arg2: i32) -> (i32, i32) {
    %c0_i32 = arith.constant 0 : i32
    %c0_i32_0 = arith.constant 0 : i32
    return %c0_i32, %arg1 : i32, i32
  }
  func.func @transform_3(%arg0: i32, %arg1: i32, %arg2: i32) -> (i32, i32) {
    %c0_i32 = arith.constant 0 : i32
    return %arg0, %arg1 : i32, i32
  }
  func.func @transform_4(%arg0: i32, %arg1: i32, %arg2: i32) -> (i32, i32) {
    %c0_i32 = arith.constant 0 : i32
    return %arg0, %arg1 : i32, i32
  }
}

module attributes {stable_mosaic.version = 11 : i64} {
  func.func @_fused_linear_kernel(%arg0: i32, %arg1: i32, %arg2: i32, %arg3: memref<8x32xf32, #tpu.memory_space<vmem>>, %arg4: memref<32x32xf32, #tpu.memory_space<vmem>>, %arg5: memref<1x32xf32, #tpu.memory_space<vmem>>, %arg6: memref<8x32xf32, #tpu.memory_space<vmem>>, %arg7: memref<8x32xf32, #tpu.memory_space<vmem>>) attributes {dimension_semantics = [#tpu.dimension_semantics<parallel>, #tpu.dimension_semantics<parallel>, #tpu.dimension_semantics<arbitrary>], iteration_bounds = array<i64: 1, 1, 1>, scalar_prefetch = 0 : i64, scratch_operands = 1 : i64, tpu.core_type = #tpu.core_type<tc>, window_params = [{transform_indices = @transform_0, window_bounds = array<i64: 8, 32>}, {transform_indices = @transform_1, window_bounds = array<i64: 32, 32>}, {transform_indices = @transform_2, window_bounds = array<i64: 1, 32>}, {transform_indices = @transform_3, window_bounds = array<i64: 8, 32>}]} {
    %c0_i32 = arith.constant 0 : i32
    %0 = arith.cmpi eq, %arg2, %c0_i32 : i32
    %1 = arith.extui %0 : i1 to i32
    %c0_i32_0 = arith.constant 0 : i32
    %2 = arith.cmpi ne, %1, %c0_i32_0 : i32
    scf.if %2 {
      %cst_10 = arith.constant 0.000000e+00 : f32
      %12 = vector.broadcast %cst_10 : f32 to vector<8x32xf32>
      %c0_11 = arith.constant 0 : index
      %c0_12 = arith.constant 0 : index
      %13 = vector.load %arg7[%c0_11, %c0_12] : memref<8x32xf32, #tpu.memory_space<vmem>>, vector<8x32xf32>
      tpu.vector_store %arg7[%c0_11, %c0_12], %12 {strides = array<i32>} : memref<8x32xf32, #tpu.memory_space<vmem>>, vector<8x32xf32>,
    } else {
    }
    %c0 = arith.constant 0 : index
    %c0_1 = arith.constant 0 : index
    %3 = vector.load %arg3[%c0, %c0_1] : memref<8x32xf32, #tpu.memory_space<vmem>>, vector<8x32xf32>
    %c0_2 = arith.constant 0 : index
    %c0_3 = arith.constant 0 : index
    %4 = vector.load %arg7[%c0_2, %c0_3] : memref<8x32xf32, #tpu.memory_space<vmem>>, vector<8x32xf32>
    %c0_4 = arith.constant 0 : index
    %c0_5 = arith.constant 0 : index
    %5 = vector.load %arg4[%c0_4, %c0_5] : memref<32x32xf32, #tpu.memory_space<vmem>>, vector<32x32xf32>
    %cst = arith.constant dense<0.000000e+00> : vector<8x32xf32>
    %6 = tpu.matmul %3, %5, %cst {dimension_numbers = #tpu.dot_dimension_numbers<[1], [0], [0], [1], [0, 0, 1, 1], [], []>} : vector<8x32xf32>, vector<32x32xf32>, vector<8x32xf32> -> vector<8x32xf32>
    %7 = arith.addf %4, %6 : vector<8x32xf32>
    %c0_6 = arith.constant 0 : index
    %c0_7 = arith.constant 0 : index
    %8 = vector.load %arg7[%c0_6, %c0_7] : memref<8x32xf32, #tpu.memory_space<vmem>>, vector<8x32xf32>
    tpu.vector_store %arg7[%c0_6, %c0_7], %7 {strides = array<i32>} : memref<8x32xf32, #tpu.memory_space<vmem>>, vector<8x32xf32>,
    %c0_i32_8 = arith.constant 0 : i32
    %9 = arith.cmpi eq, %arg2, %c0_i32_8 : i32
    %10 = arith.extui %9 : i1 to i32
    %c0_i32_9 = arith.constant 0 : i32
    %11 = arith.cmpi ne, %10, %c0_i32_9 : i32
    scf.if %11 {
      %c0_10 = arith.constant 0 : index
      %c0_11 = arith.constant 0 : index
      %12 = vector.load %arg7[%c0_10, %c0_11] : memref<8x32xf32, #tpu.memory_space<vmem>>, vector<8x32xf32>
      %c0_12 = arith.constant 0 : index
      %c0_13 = arith.constant 0 : index
      %13 = vector.load %arg5[%c0_12, %c0_13] : memref<1x32xf32, #tpu.memory_space<vmem>>, vector<1x32xf32>
      %14 = vector.broadcast %13 : vector<1x32xf32> to vector<8x32xf32>
      %15 = arith.addf %12, %14 : vector<8x32xf32>
      %16 = arith.mulf %15, %15 : vector<8x32xf32>
      %17 = arith.mulf %15, %16 : vector<8x32xf32>
      %cst_14 = arith.constant 4.471500e-02 : f32
      %18 = vector.broadcast %cst_14 : f32 to vector<8x32xf32>
      %19 = arith.mulf %18, %17 : vector<8x32xf32>
      %20 = arith.addf %15, %19 : vector<8x32xf32>
      %cst_15 = arith.constant 0.797884583 : f32
      %21 = vector.broadcast %cst_15 : f32 to vector<8x32xf32>
      %22 = arith.mulf %21, %20 : vector<8x32xf32>
      %23 = math.tanh %22 : vector<8x32xf32>
      %cst_16 = arith.constant 1.000000e+00 : f32
      %24 = vector.broadcast %cst_16 : f32 to vector<8x32xf32>
      %25 = arith.addf %24, %23 : vector<8x32xf32>
      %cst_17 = arith.constant 5.000000e-01 : f32
      %26 = vector.broadcast %cst_17 : f32 to vector<8x32xf32>
      %27 = arith.mulf %26, %25 : vector<8x32xf32>
      %28 = arith.mulf %15, %27 : vector<8x32xf32>
      %c0_18 = arith.constant 0 : index
      %c0_19 = arith.constant 0 : index
      %29 = vector.load %arg6[%c0_18, %c0_19] : memref<8x32xf32, #tpu.memory_space<vmem>>, vector<8x32xf32>
      tpu.vector_store %arg6[%c0_18, %c0_19], %28 {strides = array<i32>} : memref<8x32xf32, #tpu.memory_space<vmem>>, vector<8x32xf32>,
    } else {
    }
    return
  }
  func.func @transform_0(%arg0: i32, %arg1: i32, %arg2: i32) -> (i32, i32) {
    %c0_i32 = arith.constant 0 : i32
    return %arg0, %arg2 : i32, i32
  }
  func.func @transform_1(%arg0: i32, %arg1: i32, %arg2: i32) -> (i32, i32) {
    %c0_i32 = arith.constant 0 : i32
    return %arg2, %arg1 : i32, i32
  }
  func.func @transform_2(%arg0: i32, %arg1: i32, %arg2: i32) -> (i32, i32) {
    %c0_i32 = arith.constant 0 : i32
    %c0_i32_0 = arith.constant 0 : i32
    return %c0_i32, %arg1 : i32, i32
  }
  func.func @transform_3(%arg0: i32, %arg1: i32, %arg2: i32) -> (i32, i32) {
    %c0_i32 = arith.constant 0 : i32
    return %arg0, %arg1 : i32, i32
  }
}

module attributes {stable_mosaic.version = 11 : i64} {
  func.func @_fused_linear_kernel(%arg0: i32, %arg1: i32, %arg2: i32, %arg3: memref<8x32xf32, #tpu.memory_space<vmem>>, %arg4: memref<32x192xf32, #tpu.memory_space<vmem>>, %arg5: memref<1x192xf32, #tpu.memory_space<vmem>>, %arg6: memref<8x192xf32, #tpu.memory_space<vmem>>, %arg7: memref<8x192xf32, #tpu.memory_space<vmem>>) attributes {dimension_semantics = [#tpu.dimension_semantics<parallel>, #tpu.dimension_semantics<parallel>, #tpu.dimension_semantics<arbitrary>], iteration_bounds = array<i64: 1, 1, 1>, scalar_prefetch = 0 : i64, scratch_operands = 1 : i64, tpu.core_type = #tpu.core_type<tc>, window_params = [{transform_indices = @transform_0, window_bounds = array<i64: 8, 32>}, {transform_indices = @transform_1, window_bounds = array<i64: 32, 192>}, {transform_indices = @transform_2, window_bounds = array<i64: 1, 192>}, {transform_indices = @transform_3, window_bounds = array<i64: 8, 192>}]} {
    %c0_i32 = arith.constant 0 : i32
    %0 = arith.cmpi eq, %arg2, %c0_i32 : i32
    %1 = arith.extui %0 : i1 to i32
    %c0_i32_0 = arith.constant 0 : i32
    %2 = arith.cmpi ne, %1, %c0_i32_0 : i32
    scf.if %2 {
      %cst_10 = arith.constant 0.000000e+00 : f32
      %12 = vector.broadcast %cst_10 : f32 to vector<8x192xf32>
      %c0_11 = arith.constant 0 : index
      %c0_12 = arith.constant 0 : index
      %13 = vector.load %arg7[%c0_11, %c0_12] : memref<8x192xf32, #tpu.memory_space<vmem>>, vector<8x192xf32>
      tpu.vector_store %arg7[%c0_11, %c0_12], %12 {strides = array<i32>} : memref<8x192xf32, #tpu.memory_space<vmem>>, vector<8x192xf32>,
    } else {
    }
    %c0 = arith.constant 0 : index
    %c0_1 = arith.constant 0 : index
    %3 = vector.load %arg3[%c0, %c0_1] : memref<8x32xf32, #tpu.memory_space<vmem>>, vector<8x32xf32>
    %c0_2 = arith.constant 0 : index
    %c0_3 = arith.constant 0 : index
    %4 = vector.load %arg7[%c0_2, %c0_3] : memref<8x192xf32, #tpu.memory_space<vmem>>, vector<8x192xf32>
    %c0_4 = arith.constant 0 : index
    %c0_5 = arith.constant 0 : index
    %5 = vector.load %arg4[%c0_4, %c0_5] : memref<32x192xf32, #tpu.memory_space<vmem>>, vector<32x192xf32>
    %cst = arith.constant dense<0.000000e+00> : vector<8x192xf32>
    %6 = tpu.matmul %3, %5, %cst {dimension_numbers = #tpu.dot_dimension_numbers<[1], [0], [0], [1], [0, 0, 1, 1], [], []>} : vector<8x32xf32>, vector<32x192xf32>, vector<8x192xf32> -> vector<8x192xf32>
    %7 = arith.addf %4, %6 : vector<8x192xf32>
    %c0_6 = arith.constant 0 : index
    %c0_7 = arith.constant 0 : index
    %8 = vector.load %arg7[%c0_6, %c0_7] : memref<8x192xf32, #tpu.memory_space<vmem>>, vector<8x192xf32>
    tpu.vector_store %arg7[%c0_6, %c0_7], %7 {strides = array<i32>} : memref<8x192xf32, #tpu.memory_space<vmem>>, vector<8x192xf32>,
    %c0_i32_8 = arith.constant 0 : i32
    %9 = arith.cmpi eq, %arg2, %c0_i32_8 : i32
    %10 = arith.extui %9 : i1 to i32
    %c0_i32_9 = arith.constant 0 : i32
    %11 = arith.cmpi ne, %10, %c0_i32_9 : i32
    scf.if %11 {
      %c0_10 = arith.constant 0 : index
      %c0_11 = arith.constant 0 : index
      %12 = vector.load %arg7[%c0_10, %c0_11] : memref<8x192xf32, #tpu.memory_space<vmem>>, vector<8x192xf32>
      %c0_12 = arith.constant 0 : index
      %c0_13 = arith.constant 0 : index
      %13 = vector.load %arg5[%c0_12, %c0_13] : memref<1x192xf32, #tpu.memory_space<vmem>>, vector<1x192xf32>
      %14 = vector.broadcast %13 : vector<1x192xf32> to vector<8x192xf32>
      %15 = arith.addf %12, %14 : vector<8x192xf32>
      %c0_14 = arith.constant 0 : index
      %c0_15 = arith.constant 0 : index
      %16 = vector.load %arg6[%c0_14, %c0_15] : memref<8x192xf32, #tpu.memory_space<vmem>>, vector<8x192xf32>
      tpu.vector_store %arg6[%c0_14, %c0_15], %15 {strides = array<i32>} : memref<8x192xf32, #tpu.memory_space<vmem>>, vector<8x192xf32>,
    } else {
    }
    return
  }
  func.func @transform_0(%arg0: i32, %arg1: i32, %arg2: i32) -> (i32, i32) {
    %c0_i32 = arith.constant 0 : i32
    return %arg0, %arg2 : i32, i32
  }
  func.func @transform_1(%arg0: i32, %arg1: i32, %arg2: i32) -> (i32, i32) {
    %c0_i32 = arith.constant 0 : i32
    return %arg2, %arg1 : i32, i32
  }
  func.func @transform_2(%arg0: i32, %arg1: i32, %arg2: i32) -> (i32, i32) {
    %c0_i32 = arith.constant 0 : i32
    %c0_i32_0 = arith.constant 0 : i32
    return %c0_i32, %arg1 : i32, i32
  }
  func.func @transform_3(%arg0: i32, %arg1: i32, %arg2: i32) -> (i32, i32) {
    %c0_i32 = arith.constant 0 : i32
    return %arg0, %arg1 : i32, i32
  }
}

</mosaic_0001>

<bundles_post_ra>
// kernel: vit_forward.21
= control target key start
LH: loop header
LB: loop body
LE: loop exit
PB: predicated region body
PF: predicated region fallthrough
CT: control target
= control target key end

     0   :  { %s632_s12 = smov 0   ;;  %s634_s13 = smov 0   ;;  %s688_s0 = inlined_call_operand.vmem [shape: f32[32,32], index: 0, kind: input, shape index: {}]   ;;  %s689_s1 = inlined_call_operand.vmem [shape: f32[2,32,32], index: 1, kind: input, shape index: {}]   ;;  %s690_s2 = inlined_call_operand.vmem [shape: f32[2,1,32], index: 2, kind: input, shape index: {}]   ;;  %s691_s3 = inlined_call_operand.vmem [shape: f32[2,32,32], index: 3, kind: output, shape index: {}]  }
   0x1   :  { %s636_s14 = smov 0  }
   0x2 LB: > { %s28_s15 = sadd.s32 1, %s606_s13  ;;  %p516_p0 = scmp.ge.s32.totalorder %s610_s14, 1  ;;  %s610_s14 = sphi %s636_s14, %s13_s14   ;;  %s606_s13 = sphi %s634_s13, %s693_s13   ;;  %s602_s12 = sphi %s632_s12, %s692_s12  }
   0x3   : > { %p30_p1 = scmp.ge.s32.totalorder %s28_s15, 2  ;;  %p189_p2 = scmp.lt.s32.totalorder %s610_s14, 3 }
   0x5   : > { %s695_s15 = smov (%p30_p1, %s28_s15), 0  ;;  %p190_p3 = pnand %p516_p0, %p189_p2 }
   0x6   : > { %p240_p4 = scmp.lt.s32.totalorder (!%p190_p3), %s602_s12, 1  ;;  %v267_v0 = vld [vmem:[%s688_s0] sm:$0xff] (!%p190_p3)  ;;  %vm282_vm0 = vcmask (!%p190_p3), 261120   ;;  %v269_v1 = vld [vmem:[%s688_s0 + $0x10] sm:$0xff] (!%p190_p3)  ;;  %v268_v8 = vld [vmem:[%s688_s0 + $0x8] sm:$0xff] (!%p190_p3) }
   0x7   : > { %193 = sbr.rel (%p190_p3) target bundleno = 244 (0xf4), region = 32  ;;  %546 = vmatprep.mubr.msk.f32.mxu0 (!%p190_p3), %vm282_vm0, %v267_v0  ;;  %549 = vmatprep.mubr.msk.f32.mxu1 (!%p190_p3), %vm282_vm0, %v269_v1  ;;  %v270_v9 = vld [vmem:[%s688_s0 + $0x18] sm:$0xff] (!%p190_p3) }
   0xe   : > { %s697_s12 = smov (!%p240_p4, %s602_s12), 1 }
   0xf   : > { %s528_s20 = sshll.u32 %s697_s12, 5  ;;  %s253_s30 = scalar_lea.vmem %s690_s2, %s697_s12 }
  0x10   : > { %s247_s23 = scalar_lea.vmem %s689_s1, %s528_s20  ;;  %v521_v10 = vld [vmem:[%s253_s30] ss:$0 sm:$0xff]  ;;  %s265_s6 = scalar_lea.vmem %s691_s3, %s528_s20 }
  0x11   : > { %v271_v2 = vld [vmem:[%s247_s23] sm:$0xff]  ;;  %v272_v3 = vld [vmem:[%s247_s23 + $0x8] sm:$0xff]  ;;  %v273_v4 = vld [vmem:[%s247_s23 + $0x10] sm:$0xff] }
  0x12   : > { %v552_v5 = vpack.c.bf16 %v272_v3, %v271_v2  ;;  %v274_v6 = vld [vmem:[%s247_s23 + $0x18] sm:$0xff] }
  0x13   : > { %v556_v7 = vpack.c.bf16 %v274_v6, %v273_v4 }
  0x14   : > { %553 = vmatprep.subr.bf16.mxu0 %v552_v5  ;;  %560 = vmatprep.subr.bf16.mxu1 %v552_v5 }
  0x15   : > { %555 = vmatpush3.bf16.msra.mxu0 %v552_v5  ;;  %562 = vmatpush3.bf16.msra.mxu1 %v552_v5 }
  0x16   : > { %557 = vmatprep.subr.bf16.mxu0 %v556_v7  ;;  %561 = vmatprep.subr.bf16.mxu1 %v556_v7 }
  0x19   : > { %559 = vmatpush3.bf16.msra.mxu0 %v556_v7  ;;  %563 = vmatpush3.bf16.msra.mxu1 %v556_v7 }
  0x1c   : > { %547 = vmatmul.mubr.msk.f32.vlgmr.msra.gmra.mrb[0].mxu0 %vm282_vm0, %v268_v8  ;;  %550 = vmatmul.mubr.msk.f32.vlgmr.msra.gmra.mrb[0].mxu1 %vm282_vm0, %v270_v9 }
  0xef   : > { %v548_v11 = vpop.f32.mrb[0].mxu0  ;;  %v551_v12 = vpop.f32.mrb[0].mxu1 }
  0xf0   : > { %v367_v13 = vadd.f32 %v548_v11, %v521_v10  ;;  %v377_v14 = vadd.f32 %v551_v12, %v521_v10  ;;  %v361_v15 = vpop.f32.mrb[1].mxu0  ;;  %v371_v16 = vpop.f32.mrb[1].mxu1 }
  0xf1   : > { %v362_v17 = vadd.f32 %v521_v10, %v361_v15  ;;  %v372_v18 = vadd.f32 %v521_v10, %v371_v16 }
  0xf2   : > { %381 = vst.msk [vmem:[%s265_s6 + $0x8] sm:$0xff] %vm282_vm0, %v367_v13  ;;  %383 = vst.msk [vmem:[%s265_s6 + $0x18] sm:$0xff] %vm282_vm0, %v377_v14 }
  0xf3   : > { %380 = vst.msk [vmem:[%s265_s6] sm:$0xff] %vm282_vm0, %v362_v17  ;;  %382 = vst.msk [vmem:[%s265_s6 + $0x10] sm:$0xff] %vm282_vm0, %v372_v18 }
  0xf4 PF: > { %s13_s14 = sadd.s32 1, %s610_s14   ;;  %s692_s12 = smov %s606_s13 }
  0xf5   : > { %p10_p5 = scmp.ge.s32.totalorder %s13_s14, 4   ;;  %s693_s13 = smov %s695_s15 }
  0xf7   :  { %12 = sbr.rel (!%p10_p5) target bundleno = 2 (0x2), region = 68 }

// kernel: vit_forward.20
= control target key start
LH: loop header
LB: loop body
LE: loop exit
PB: predicated region body
PF: predicated region fallthrough
CT: control target
= control target key end

     0   :  { %vm18_vm0 = vcmask 253952   ;;  %v140_v0 = vmov 0.0|0.0   ;;  %v141_v4 = vmov 0.0   ;;  %vm142_vm1 = vmmov 0   ;;  %s187_s1 = inlined_call_operand.vmem [shape: f32[32,32], index: 1, kind: input, shape index: {}]   ;;  %s188_s0 = inlined_call_operand.vmem [shape: f32[1,32], index: 0, kind: input, shape index: {}]   ;;  %s189_s2 = inlined_call_operand.vmem [shape: f32[1,32], index: 2, kind: input, shape index: {}]   ;;  %s190_s3 = inlined_call_operand.vmem [shape: f32[1,32], index: 3, kind: output, shape index: {}]  }
   0x1   :  { %131 = vmatprep.subr.bf16.mxu0 %v140_v0  ;;  %v22_v1 = vld [vmem:[%s187_s1] sm:$0xff]  ;;  %v23_v2 = vld [vmem:[%s187_s1 + $0x8] sm:$0xff]  ;;  %v24_v3 = vld [vmem:[%s187_s1 + $0x10] sm:$0xff]  ;;  %19 = vst.msk [vmem:[#allocation2] sm:$0x1] %vm18_vm0, %v141_v4  ;;  %128 = vmatprep.mubr.msk.f32.mxu0 %vm142_vm1, %v141_v4  ;;  %vm26_vm2 = vcmask 261120  }
   0x2   :  { %v132_v5 = vpack.c.bf16 %v23_v2, %v22_v1  ;;  %v25_v6 = vld [vmem:[%s187_s1 + $0x18] sm:$0xff]  ;;  %v20_v8 = vld [vmem:[%s188_s0] sm:$0x1] }
   0x3   :  { %v135_v7 = vpack.c.bf16 %v25_v6, %v24_v3  ;;  %v107_v13 = vld [vmem:[%s189_s2] sm:$0x1] }
   0x4   :  { %133 = vmatpush3.bf16.msra.mxu0 %v132_v5 }
   0x5   :  { %134 = vmatprep.subr.bf16.mxu0 %v140_v0 }
   0x8   :  { %136 = vmatpush3.bf16.msra.mxu0 %v135_v7  ;;  %v21_v9 = vld [vmem:[#allocation2] sm:$0x1] }
   0xb   :  { %129 = vmatmul.mubr.msk.f32.vlgmr.msra.gmra.mrb[0].mxu0 %vm26_vm2, %v20_v8 }
  0xde   :  { %v96_v10 = vpop.f32.mrb[0].mxu0 }
  0xdf   :  { %v100_v11 = vadd.f32 %v96_v10, %v21_v9  ;;  %v130_v12 = vpop.f32.mrb[1].mxu0 }
  0xe1   :  { %102 = vst.msk [vmem:[#allocation2] sm:$0x1] %vm18_vm0, %v100_v11 }
  0xe8   :  { %v106_v14 = vld [vmem:[#allocation2] sm:$0x1] }
  0xe9   :  { %v108_v15 = vadd.f32 %v107_v13, %v106_v14 }
  0xeb   :  { %109 = vst.msk [vmem:[%s190_s3] sm:$0x1] %vm18_vm0, %v108_v15 }

// kernel: vit_forward.19
= control target key start
LH: loop header
LB: loop body
LE: loop exit
PB: predicated region body
PF: predicated region fallthrough
CT: control target
= control target key end

     0   :  { %v1009_v0 = vmov 0.0|0.0   ;;  %vm1010_vm0 = vmmov 0   ;;  %v1011_v8 = vmov 0.0   ;;  %vm49_vm1 = vcmask 1041409   ;;  %s1464_s1 = inlined_call_operand.vmem [shape: f32[4,64,32], index: 1, kind: input, shape index: {}]   ;;  %s1465_s0 = inlined_call_operand.vmem [shape: f32[8,4,64], index: 0, kind: input, shape index: {}]   ;;  %s1466_s2 = inlined_call_operand.vmem [shape: f32[4,1,32], index: 2, kind: input, shape index: {}]   ;;  %s1467_s3 = inlined_call_operand.vmem [shape: f32[4,1,32], index: 3, kind: input, shape index: {}]   ;;  %s1468_s4 = inlined_call_operand.vmem [shape: f32[8,4,32], index: 4, kind: output, shape index: {}]  }
   0x1   :  { %957 = vmatprep.subr.bf16.mxu0 %v1009_v0  ;;  %969 = vmatprep.subr.bf16.mxu1 %v1009_v0  ;;  %v25_v1 = vld [vmem:[%s1464_s1] sm:$0xff]  ;;  %v26_v2 = vld [vmem:[%s1464_s1 + $0x8] sm:$0xff]  ;;  %v27_v6 = vld [vmem:[%s1464_s1 + $0x10] sm:$0xff]  ;;  %vm52_vm2 = vcmask 1042434   ;;  %vm55_vm3 = vcmask 1043459   ;;  %vm58_vm4 = vcmask 1044484  }
   0x2   :  { %v806_v3 = vld [vmem:[%s1464_s1 + $0x40] sm:$0xff]  ;;  %v958_v4 = vpack.c.bf16 %v26_v2, %v25_v1  ;;  %v807_v5 = vld [vmem:[%s1464_s1 + $0x48] sm:$0xff]  ;;  %v28_v7 = vld [vmem:[%s1464_s1 + $0x18] sm:$0xff]  ;;  %897 = vmatprep.mubr.msk.f32.mxu0 %vm1010_vm0, %v1011_v8  ;;  %916 = vmatprep.mubr.msk.f32.mxu1 %vm1010_vm0, %v1011_v8  ;;  %vm61_vm5 = vcmask 1045509   ;;  %vm64_vm6 = vcmask 1046534   ;;  %vm67_vm7 = vcmask 1047559  }
   0x3   :  { %v970_v9 = vpack.c.bf16 %v807_v5, %v806_v3  ;;  %v808_v10 = vld [vmem:[%s1464_s1 + $0x50] sm:$0xff]  ;;  %v809_v11 = vld [vmem:[%s1464_s1 + $0x58] sm:$0xff]  ;;  %v961_v12 = vpack.c.bf16 %v28_v7, %v27_v6  ;;  %v29_v13 = vld [vmem:[%s1464_s1 + $0x20] sm:$0xff]  ;;  %vm69_vm8 = vcmask 523264   ;;  %vm208_vm9 = vcmask 253952  }
   0x4   :  { %959 = vmatpush3.bf16.msra.mxu0 %v958_v4  ;;  %v973_v14 = vpack.c.bf16 %v809_v11, %v808_v10  ;;  %v30_v15 = vld [vmem:[%s1464_s1 + $0x28] sm:$0xff]  ;;  %v810_v16 = vld [vmem:[%s1464_s1 + $0x60] sm:$0xff]  ;;  %v31_v18 = vld [vmem:[%s1464_s1 + $0x30] sm:$0xff] }
   0x5   :  { %971 = vmatpush3.bf16.msra.mxu1 %v970_v9  ;;  %960 = vmatprep.subr.bf16.mxu0 %v1009_v0  ;;  %v811_v17 = vld [vmem:[%s1464_s1 + $0x68] sm:$0xff]  ;;  %v32_v19 = vld [vmem:[%s1464_s1 + $0x38] sm:$0xff]  ;;  %v18_v20 = vld [vmem:[%s1465_s0 + $0x4] sm:$0x1]  ;;  %v964_v25 = vpack.c.bf16 %v30_v15, %v29_v13 }
   0x6   :  { %972 = vmatprep.subr.bf16.mxu1 %v1009_v0  ;;  %v812_v21 = vld [vmem:[%s1464_s1 + $0x70] sm:$0xff]  ;;  %v19_v22 = vld [vmem:[%s1465_s0 + $0x8] sm:$0x1]  ;;  %v20_v23 = vld [vmem:[%s1465_s0 + $0xc] sm:$0x1]  ;;  %v976_v29 = vpack.c.bf16 %v811_v17, %v810_v16  ;;  %v48_v32 = vrot.slane %v18_v20, 7  ;;  %v967_v39 = vpack.c.bf16 %v32_v19, %v31_v18 }
   0x7   :  { %v21_v24 = vld [vmem:[%s1465_s0 + $0x10] sm:$0x1]  ;;  %v17_v26 = vld [vmem:[%s1465_s0] sm:$0x1]  ;;  %v22_v27 = vld [vmem:[%s1465_s0 + $0x14] sm:$0x1] }
   0x8   :  { %962 = vmatpush3.bf16.msra.mxu0 %v961_v12  ;;  %v23_v28 = vld [vmem:[%s1465_s0 + $0x18] sm:$0x1]  ;;  %v24_v31 = vld [vmem:[%s1465_s0 + $0x1c] sm:$0x1]  ;;  %v51_v33 = vrot.slane %v19_v22, 6  ;;  %v54_v34 = vrot.slane %v20_v23, 5  ;;  %v50_v40 = vsel %vm49_vm1, %v48_v32, %v17_v26 }
   0x9   :  { %974 = vmatpush3.bf16.msra.mxu1 %v973_v14  ;;  %963 = vmatprep.subr.bf16.mxu0 %v1009_v0  ;;  %v813_v30 = vld [vmem:[%s1464_s1 + $0x78] sm:$0xff]  ;;  %v57_v35 = vrot.slane %v21_v24, 4  ;;  %v60_v36 = vrot.slane %v22_v27, 3  ;;  %v217_v37 = vld [vmem:[%s1465_s0 + $0x1] sm:$0x1]  ;;  %v63_v46 = vrot.slane %v23_v28, 2 }
   0xa   :  { %975 = vmatprep.subr.bf16.mxu1 %v1009_v0  ;;  %v218_v38 = vld [vmem:[%s1465_s0 + $0x5] sm:$0x1]  ;;  %v219_v41 = vld [vmem:[%s1465_s0 + $0x9] sm:$0x1]  ;;  %v220_v42 = vld [vmem:[%s1465_s0 + $0xd] sm:$0x1]  ;;  %v979_v44 = vpack.c.bf16 %v813_v30, %v812_v21  ;;  %v53_v45 = vsel %vm52_vm2, %v51_v33, %v50_v40 }
   0xb   :  { %v221_v43 = vld [vmem:[%s1465_s0 + $0x11] sm:$0x1]  ;;  %v66_v47 = vrot.slane %v24_v31, 1  ;;  %v222_v48 = vld [vmem:[%s1465_s0 + $0x15] sm:$0x1]  ;;  %v819_v49 = vld [vmem:[%s1464_s1 + $0x80] sm:$0xff]  ;;  %v56_v50 = vsel %vm55_vm3, %v54_v34, %v53_v45 }
   0xc   :  { %965 = vmatpush3.bf16.msra.mxu0 %v964_v25  ;;  %v223_v51 = vld [vmem:[%s1465_s0 + $0x19] sm:$0x1]  ;;  %v250_v52 = vrot.slane %v218_v38, 7  ;;  %v252_v53 = vrot.slane %v219_v41, 6  ;;  %v254_v54 = vrot.slane %v220_v42, 5  ;;  %v820_v55 = vld [vmem:[%s1464_s1 + $0x88] sm:$0xff]  ;;  %v59_v56 = vsel %vm58_vm4, %v57_v35, %v56_v50 }
   0xd   :  { %977 = vmatpush3.bf16.msra.mxu1 %v976_v29  ;;  %966 = vmatprep.subr.bf16.mxu0 %v1009_v0  ;;  %v224_v57 = vld [vmem:[%s1465_s0 + $0x1d] sm:$0x1]  ;;  %v256_v58 = vrot.slane %v221_v43, 4  ;;  %v62_v59 = vsel %vm61_vm5, %v60_v36, %v59_v56  ;;  %v258_v61 = vrot.slane %v222_v48, 3  ;;  %v260_v1 = vrot.slane %v223_v51, 2  ;;  %v832_v3 = vld [vmem:[%s1464_s1 + $0xc0] sm:$0xff] }
   0xe   :  { %978 = vmatprep.subr.bf16.mxu1 %v1009_v0  ;;  %v251_v60 = vsel %vm49_vm1, %v250_v52, %v217_v37  ;;  %v65_v62 = vsel %vm64_vm6, %v63_v46, %v62_v59  ;;  %v982_v2 = vpack.c.bf16 %v820_v55, %v819_v49  ;;  %v833_v4 = vld [vmem:[%s1464_s1 + $0xc8] sm:$0xff]  ;;  %v262_v7 = vrot.slane %v224_v57, 1  ;;  %v821_v9 = vld [vmem:[%s1464_s1 + $0x90] sm:$0xff]  ;;  %v822_v10 = vld [vmem:[%s1464_s1 + $0x98] sm:$0xff] }
   0xf   :  { %v253_v63 = vsel %vm52_vm2, %v252_v53, %v251_v60  ;;  %v68_v5 = vsel %vm67_vm7, %v66_v47, %v65_v62  ;;  %v411_v12 = vld [vmem:[%s1465_s0 + $0x2] sm:$0x1]  ;;  %v412_v13 = vld [vmem:[%s1465_s0 + $0x6] sm:$0x1]  ;;  %v413_v14 = vld [vmem:[%s1465_s0 + $0xa] sm:$0x1]  ;;  %v994_v16 = vpack.c.bf16 %v833_v4, %v832_v3  ;;  %v985_v21 = vpack.c.bf16 %v822_v10, %v821_v9 }
  0x10   :  { %968 = vmatpush3.bf16.msra.mxu0 %v967_v39  ;;  %v255_v6 = vsel %vm55_vm3, %v254_v54, %v253_v63  ;;  %v414_v17 = vld [vmem:[%s1465_s0 + $0xe] sm:$0x1]  ;;  %v415_v18 = vld [vmem:[%s1465_s0 + $0x12] sm:$0x1]  ;;  %v416_v19 = vld [vmem:[%s1465_s0 + $0x16] sm:$0x1] }
  0x11   :  { %980 = vmatpush3.bf16.msra.mxu1 %v979_v44  ;;  %981 = vmatprep.subr.bf16.mxu0 %v1009_v0  ;;  %v257_v11 = vsel %vm58_vm4, %v256_v58, %v255_v6  ;;  %v834_v22 = vld [vmem:[%s1464_s1 + $0xd0] sm:$0xff]  ;;  %v835_v23 = vld [vmem:[%s1464_s1 + $0xd8] sm:$0xff]  ;;  %v823_v24 = vld [vmem:[%s1464_s1 + $0xa0] sm:$0xff]  ;;  %v444_v25 = vrot.slane %v412_v13, 7  ;;  %v446_v26 = vrot.slane %v413_v14, 6  ;;  %v448_v30 = vrot.slane %v414_v17, 5 }
  0x12   :  { %993 = vmatprep.subr.bf16.mxu1 %v1009_v0  ;;  %v259_v15 = vsel %vm61_vm5, %v258_v61, %v257_v11  ;;  %v824_v28 = vld [vmem:[%s1464_s1 + $0xa8] sm:$0xff]  ;;  %v417_v29 = vld [vmem:[%s1465_s0 + $0x1a] sm:$0x1]  ;;  %v450_v31 = vrot.slane %v415_v18, 4  ;;  %v452_v32 = vrot.slane %v416_v19, 3  ;;  %v836_v33 = vld [vmem:[%s1464_s1 + $0xe0] sm:$0xff]  ;;  %v997_v38 = vpack.c.bf16 %v835_v23, %v834_v22 }
  0x13   :  { %898 = vmatmul.mubr.msk.f32.vlgmr.msra.gmra.mrb[0].mxu0 %vm69_vm8, %v68_v5  ;;  %v261_v20 = vsel %vm64_vm6, %v260_v1, %v259_v15  ;;  %v445_v34 = vsel %vm49_vm1, %v444_v25, %v411_v12  ;;  %v605_v35 = vld [vmem:[%s1465_s0 + $0x3] sm:$0x1]  ;;  %v606_v36 = vld [vmem:[%s1465_s0 + $0x7] sm:$0x1]  ;;  %v607_v37 = vld [vmem:[%s1465_s0 + $0xb] sm:$0x1]  ;;  %v988_v43 = vpack.c.bf16 %v824_v28, %v823_v24  ;;  %v155_v15 = vlaneseq }
  0x14   :  { %983 = vmatpush3.bf16.msra.mxu0 %v982_v2  ;;  %935 = vmatprep.mubr.msk.f32.mxu0 %vm1010_vm0, %v1011_v8  ;;  %v263_v27 = vsel %vm67_vm7, %v262_v7, %v261_v20  ;;  %v447_v39 = vsel %vm52_vm2, %v446_v26, %v445_v34  ;;  %v608_v40 = vld [vmem:[%s1465_s0 + $0xf] sm:$0x1]  ;;  %v609_v41 = vld [vmem:[%s1465_s0 + $0x13] sm:$0x1]  ;;  %v610_v42 = vld [vmem:[%s1465_s0 + $0x17] sm:$0x1] }
  0x15   :  { %984 = vmatprep.subr.bf16.mxu0 %v1009_v0  ;;  %917 = vmatmul.mubr.msk.f32.vlgmr.msra.gmra.mrb[0].mxu1 %vm69_vm8, %v263_v27  ;;  %v825_v44 = vld [vmem:[%s1464_s1 + $0xb0] sm:$0xff]  ;;  %v418_v45 = vld [vmem:[%s1465_s0 + $0x1e] sm:$0x1]  ;;  %v449_v46 = vsel %vm55_vm3, %v448_v30, %v447_v39  ;;  %v638_v47 = vrot.slane %v606_v36, 7  ;;  %v640_v48 = vrot.slane %v607_v37, 6  ;;  %v454_v51 = vrot.slane %v417_v29, 2 }
  0x16   :  { %995 = vmatpush3.bf16.msra.mxu1 %v994_v16  ;;  %954 = vmatprep.mubr.msk.f32.mxu1 %vm1010_vm0, %v1011_v8  ;;  %v837_v8 = vld [vmem:[%s1464_s1 + $0xe8] sm:$0xff]  ;;  %v826_v49 = vld [vmem:[%s1464_s1 + $0xb8] sm:$0xff]  ;;  %v451_v50 = vsel %vm58_vm4, %v450_v31, %v449_v46  ;;  %v642_v53 = vrot.slane %v608_v40, 5  ;;  %v644_v54 = vrot.slane %v609_v41, 4  ;;  %v646_v57 = vrot.slane %v610_v42, 3  ;;  %v838_v61 = vld [vmem:[%s1464_s1 + $0xf0] sm:$0xff] }
  0x17   :  { %996 = vmatprep.subr.bf16.mxu1 %v1009_v0  ;;  %v611_v52 = vld [vmem:[%s1465_s0 + $0x1b] sm:$0x1]  ;;  %v453_v55 = vsel %vm61_vm5, %v452_v32, %v451_v50  ;;  %v639_v56 = vsel %vm49_vm1, %v638_v47, %v605_v35  ;;  %v1000_v58 = vpack.c.bf16 %v837_v8, %v836_v33  ;;  %v991_v60 = vpack.c.bf16 %v826_v49, %v825_v44  ;;  %v612_v1 = vld [vmem:[%s1465_s0 + $0x1f] sm:$0x1]  ;;  %v805_v19 = vld [vmem:[%s1467_s3] ss:$0 sm:$0xff] }
  0x18   :  { %986 = vmatpush3.bf16.msra.mxu0 %v985_v21  ;;  %v641_v59 = vsel %vm52_vm2, %v640_v48, %v639_v56  ;;  %v839_v62 = vld [vmem:[%s1464_s1 + $0xf8] sm:$0xff]  ;;  %v456_v63 = vrot.slane %v418_v45, 1  ;;  %v648_v3 = vrot.slane %v611_v52, 2  ;;  %v455_v4 = vsel %vm64_vm6, %v454_v51, %v453_v55  ;;  %v815_v22 = vld [vmem:[%s1466_s2 + $0x1] ss:$0 sm:$0xff] }
  0x19   :  { %987 = vmatprep.subr.bf16.mxu0 %v1009_v0  ;;  %v643_v2 = vsel %vm55_vm3, %v642_v53, %v641_v59  ;;  %v1003_v7 = vpack.c.bf16 %v839_v62, %v838_v61  ;;  %v650_v9 = vrot.slane %v612_v1, 1  ;;  %v1012_v13 = vmov 1966171168   ;;  %v818_v26 = vld [vmem:[%s1467_s3 + $0x1] ss:$0 sm:$0xff] }
  0x1a   :  { %998 = vmatpush3.bf16.msra.mxu1 %v997_v38  ;;  %v645_v5 = vsel %vm58_vm4, %v644_v54, %v643_v2  ;;  %v457_v10 = vsel %vm67_vm7, %v456_v63, %v455_v4  ;;  %v153_v14 = vunpack.c.l.s4 %v1012_v13  ;;  %v156_v17 = vshrl.u32 %v155_v15, 7  ;;  %v828_v54 = vld [vmem:[%s1466_s2 + $0x2] ss:$0 sm:$0xff]  ;;  %v841_v59 = vld [vmem:[%s1466_s2 + $0x3] ss:$0 sm:$0xff] }
  0x1b   :  { %999 = vmatprep.subr.bf16.mxu1 %v1009_v0  ;;  %v647_v6 = vsel %vm61_vm5, %v646_v57, %v645_v5  ;;  %v831_v57 = vld [vmem:[%s1467_s3 + $0x2] ss:$0 sm:$0xff]  ;;  %v844_v63 = vld [vmem:[%s1467_s3 + $0x3] ss:$0 sm:$0xff] }
  0x1c   :  { %989 = vmatpush3.bf16.msra.mxu0 %v988_v43  ;;  %v649_v11 = vsel %vm64_vm6, %v648_v3, %v647_v6  ;;  %v154_v16 = vunpack.c.0.s8 %v153_v14 }
  0x1d   :  { %990 = vmatprep.subr.bf16.mxu0 %v1009_v0  ;;  %v651_v12 = vsel %vm67_vm7, %v650_v9, %v649_v11 }
  0x1e   :  { %1001 = vmatpush3.bf16.msra.mxu1 %v1000_v58  ;;  %v1292_v21 = vsub.s32 %v154_v16, %v156_v17 }
  0x1f   :  { %1002 = vmatprep.subr.bf16.mxu1 %v1009_v0  ;;  %v803_v0 = vld [vmem:[%s1466_s2] ss:$0 sm:$0xff] }
  0x20   :  { %992 = vmatpush3.bf16.msra.mxu0 %v991_v60 }
  0x22   :  { %1004 = vmatpush3.bf16.msra.mxu1 %v1003_v7 }
  0x23   :  { %936 = vmatmul.mubr.msk.f32.vlgmr.msra.gmra.mrb[2].mxu0 %vm69_vm8, %v457_v10 }
  0x25   :  { %955 = vmatmul.mubr.msk.f32.vlgmr.msra.gmra.mrb[2].mxu1 %vm69_vm8, %v651_v12 }
  0xe6   :  { %v138_v18 = vpop.f32.mrb[0].mxu0 }
  0xe7   :  { %v139_v20 = vadd.f32 %v803_v0, %v138_v18  ;;  %v899_v23 = vpop.f32.mrb[1].mxu0 }
  0xe8   :  { %v332_v25 = vpop.f32.mrb[0].mxu1 }
  0xe9   :  { %v149_v24 = vadd.f32 %v805_v19, %v139_v20  ;;  %v333_v27 = vadd.f32 %v815_v22, %v332_v25  ;;  %v918_v28 = vpop.f32.mrb[1].mxu1 }
  0xeb   :  { %v151_v29 = vcombine.high %v149_v24, %v149_v24  ;;  %v158_v30 = vrot.slane %v149_v24, %v1292_v21  ;;  %v344_v31 = vadd.f32 %v818_v26, %v333_v27 }
  0xed   :  { %v165_v32 = vrot.slane %v151_v29, %v1292_v21  ;;  %v166_v33 = vcombine.high %v158_v30, %v158_v30  ;;  %v174_v34 = vrot.slane %v158_v30, %v1292_v21  ;;  %v346_v35 = vcombine.high %v344_v31, %v344_v31 }
  0xee   :  { %v353_v36 = vrot.slane %v344_v31, %v1292_v21 }
  0xef   :  { %v167_v37 = vcombine.high %v165_v32, %v165_v32  ;;  %v181_v38 = vrot.slane %v165_v32, %v1292_v21  ;;  %v188_v39 = vrot.slane %v166_v33, %v1292_v21  ;;  %v196_v40 = vcombine.high %v174_v34, %v174_v34  ;;  %209 = vst.msk [vmem:[%s1468_s4] sm:$0x1] %vm208_vm9, %v174_v34 }
  0xf0   :  { %v360_v41 = vrot.slane %v346_v35, %v1292_v21  ;;  %v361_v42 = vcombine.high %v353_v36, %v353_v36  ;;  %v369_v43 = vrot.slane %v353_v36, %v1292_v21 }
  0xf1   :  { %v195_v8 = vrot.slane %v167_v37, %v1292_v21  ;;  %v197_v44 = vcombine.high %v181_v38, %v181_v38  ;;  %v198_v45 = vcombine.high %v188_v39, %v188_v39  ;;  %210 = vst.msk [vmem:[%s1468_s4 + $0x4] sm:$0x1] %vm208_vm9, %v188_v39  ;;  %211 = vst.msk [vmem:[%s1468_s4 + $0x8] sm:$0x1] %vm208_vm9, %v196_v40 }
  0xf2   :  { %213 = vst.msk [vmem:[%s1468_s4 + $0x10] sm:$0x1] %vm208_vm9, %v181_v38  ;;  %v362_v46 = vcombine.high %v360_v41, %v360_v41  ;;  %v376_v47 = vrot.slane %v360_v41, %v1292_v21  ;;  %v383_v48 = vrot.slane %v361_v42, %v1292_v21  ;;  %v391_v49 = vcombine.high %v369_v43, %v369_v43 }
  0xf3   :  { %403 = vst.msk [vmem:[%s1468_s4 + $0x1] sm:$0x1] %vm208_vm9, %v369_v43  ;;  %v199_v50 = vcombine.high %v195_v8, %v195_v8  ;;  %212 = vst.msk [vmem:[%s1468_s4 + $0xc] sm:$0x1] %vm208_vm9, %v198_v45 }
  0xf4   :  { %214 = vst.msk [vmem:[%s1468_s4 + $0x14] sm:$0x1] %vm208_vm9, %v195_v8  ;;  %215 = vst.msk [vmem:[%s1468_s4 + $0x18] sm:$0x1] %vm208_vm9, %v197_v44  ;;  %v390_v51 = vrot.slane %v362_v46, %v1292_v21  ;;  %v392_v52 = vcombine.high %v376_v47, %v376_v47  ;;  %v393_v53 = vcombine.high %v383_v48, %v383_v48 }
  0xf5   :  { %404 = vst.msk [vmem:[%s1468_s4 + $0x5] sm:$0x1] %vm208_vm9, %v383_v48  ;;  %405 = vst.msk [vmem:[%s1468_s4 + $0x9] sm:$0x1] %vm208_vm9, %v391_v49 }
  0xf6   :  { %407 = vst.msk [vmem:[%s1468_s4 + $0x11] sm:$0x1] %vm208_vm9, %v376_v47  ;;  %216 = vst.msk [vmem:[%s1468_s4 + $0x1c] sm:$0x1] %vm208_vm9, %v199_v50  ;;  %v394_v55 = vcombine.high %v390_v51, %v390_v51  ;;  %v526_v56 = vpop.f32.mrb[2].mxu0 }
  0xf7   :  { %406 = vst.msk [vmem:[%s1468_s4 + $0xd] sm:$0x1] %vm208_vm9, %v393_v53  ;;  %408 = vst.msk [vmem:[%s1468_s4 + $0x15] sm:$0x1] %vm208_vm9, %v390_v51  ;;  %v527_v58 = vadd.f32 %v828_v54, %v526_v56  ;;  %v937_v60 = vpop.f32.mrb[3].mxu0 }
  0xf8   :  { %409 = vst.msk [vmem:[%s1468_s4 + $0x19] sm:$0x1] %vm208_vm9, %v392_v52  ;;  %410 = vst.msk [vmem:[%s1468_s4 + $0x1d] sm:$0x1] %vm208_vm9, %v394_v55  ;;  %v720_v62 = vpop.f32.mrb[2].mxu1 }
  0xf9   :  { %v538_v61 = vadd.f32 %v831_v57, %v527_v58  ;;  %v721_v1 = vadd.f32 %v841_v59, %v720_v62  ;;  %v956_v2 = vpop.f32.mrb[3].mxu1 }
  0xfb   :  { %v540_v3 = vcombine.high %v538_v61, %v538_v61  ;;  %v547_v4 = vrot.slane %v538_v61, %v1292_v21  ;;  %v732_v5 = vadd.f32 %v844_v63, %v721_v1 }
  0xfd   :  { %v554_v6 = vrot.slane %v540_v3, %v1292_v21  ;;  %v555_v7 = vcombine.high %v547_v4, %v547_v4  ;;  %v563_v9 = vrot.slane %v547_v4, %v1292_v21  ;;  %v734_v10 = vcombine.high %v732_v5, %v732_v5 }
  0xfe   :  { %v741_v11 = vrot.slane %v732_v5, %v1292_v21 }
  0xff   :  { %v556_v12 = vcombine.high %v554_v6, %v554_v6  ;;  %v570_v13 = vrot.slane %v554_v6, %v1292_v21  ;;  %v577_v14 = vrot.slane %v555_v7, %v1292_v21  ;;  %v585_v15 = vcombine.high %v563_v9, %v563_v9  ;;  %597 = vst.msk [vmem:[%s1468_s4 + $0x2] sm:$0x1] %vm208_vm9, %v563_v9 }
 0x100   :  { %v748_v16 = vrot.slane %v734_v10, %v1292_v21  ;;  %v749_v17 = vcombine.high %v741_v11, %v741_v11  ;;  %v757_v0 = vrot.slane %v741_v11, %v1292_v21 }
 0x101   :  { %v584_v18 = vrot.slane %v556_v12, %v1292_v21  ;;  %v586_v19 = vcombine.high %v570_v13, %v570_v13  ;;  %v587_v20 = vcombine.high %v577_v14, %v577_v14  ;;  %598 = vst.msk [vmem:[%s1468_s4 + $0x6] sm:$0x1] %vm208_vm9, %v577_v14  ;;  %599 = vst.msk [vmem:[%s1468_s4 + $0xa] sm:$0x1] %vm208_vm9, %v585_v15 }
 0x102   :  { %601 = vst.msk [vmem:[%s1468_s4 + $0x12] sm:$0x1] %vm208_vm9, %v570_v13  ;;  %v750_v22 = vcombine.high %v748_v16, %v748_v16  ;;  %v764_v23 = vrot.slane %v748_v16, %v1292_v21  ;;  %v771_v24 = vrot.slane %v749_v17, %v1292_v21  ;;  %v779_v25 = vcombine.high %v757_v0, %v757_v0 }
 0x103   :  { %791 = vst.msk [vmem:[%s1468_s4 + $0x3] sm:$0x1] %vm208_vm9, %v757_v0  ;;  %v588_v26 = vcombine.high %v584_v18, %v584_v18  ;;  %600 = vst.msk [vmem:[%s1468_s4 + $0xe] sm:$0x1] %vm208_vm9, %v587_v20 }
 0x104   :  { %602 = vst.msk [vmem:[%s1468_s4 + $0x16] sm:$0x1] %vm208_vm9, %v584_v18  ;;  %603 = vst.msk [vmem:[%s1468_s4 + $0x1a] sm:$0x1] %vm208_vm9, %v586_v19  ;;  %v778_v27 = vrot.slane %v750_v22, %v1292_v21  ;;  %v780_v28 = vcombine.high %v764_v23, %v764_v23  ;;  %v781_v29 = vcombine.high %v771_v24, %v771_v24 }
 0x105   :  { %792 = vst.msk [vmem:[%s1468_s4 + $0x7] sm:$0x1] %vm208_vm9, %v771_v24  ;;  %793 = vst.msk [vmem:[%s1468_s4 + $0xb] sm:$0x1] %vm208_vm9, %v779_v25 }
 0x106   :  { %795 = vst.msk [vmem:[%s1468_s4 + $0x13] sm:$0x1] %vm208_vm9, %v764_v23  ;;  %604 = vst.msk [vmem:[%s1468_s4 + $0x1e] sm:$0x1] %vm208_vm9, %v588_v26  ;;  %v782_v21 = vcombine.high %v778_v27, %v778_v27 }
 0x107   :  { %794 = vst.msk [vmem:[%s1468_s4 + $0xf] sm:$0x1] %vm208_vm9, %v781_v29  ;;  %796 = vst.msk [vmem:[%s1468_s4 + $0x17] sm:$0x1] %vm208_vm9, %v778_v27 }
 0x108   :  { %797 = vst.msk [vmem:[%s1468_s4 + $0x1b] sm:$0x1] %vm208_vm9, %v780_v28  ;;  %798 = vst.msk [vmem:[%s1468_s4 + $0x1f] sm:$0x1] %vm208_vm9, %v782_v21 }

// kernel: vit_forward.22
= control target key start
LH: loop header
LB: loop body
LE: loop exit
PB: predicated region body
PF: predicated region fallthrough
CT: control target
= control target key end

     0   :  { %vm48_vm0 = vcmask 60416   ;;  %s1813_s29 = smov 120   ;;  %s1814_s30 = smov 112   ;;  %v89_v54 = vlaneseq  ;;  %vm123_vm1 = vcmask 1041409   ;;  %vm125_vm2 = vcmask 1042434   ;;  %s2553_s0 = inlined_call_operand.vmem [shape: f32[1,32], index: 0, kind: input, shape index: {}]   ;;  %s2554_s1 = inlined_call_operand.vmem [shape: f32[2,8,4,32], index: 1, kind: input, shape index: {}, may-alias: {1,2}]   ;;  %s2555_s2 = inlined_call_operand.vmem [shape: f32[2,8,4,32], index: 2, kind: input, shape index: {}, may-alias: {1,2}]   ;;  %s2556_s3 = inlined_call_operand.vmem [shape: f32[8,32], index: 3, kind: output, shape index: {}]  }
   0x1   :  { %v1734_v0 = vld [vmem:[%s2553_s0] ss:$0 sm:$0xff]  ;;  %v20_v1 = vld [vmem:[%s2554_s1 + $0x8] sm:$0xf]  ;;  %v21_v5 = vld [vmem:[%s2554_s1 + $0xc] sm:$0xf] }
   0x2   :  { %v18_v2 = vld [vmem:[%s2554_s1] sm:$0xf]  ;;  %v42_v3 = vmul.f32 %v1734_v0, %v20_v1  ;;  %v19_v6 = vld [vmem:[%s2554_s1 + $0x4] sm:$0xf]  ;;  %v43_v7 = vmul.f32 %v1734_v0, %v21_v5  ;;  %v23_v9 = vld [vmem:[%s2554_s1 + $0x14] sm:$0xf] }
   0x3   :  { %v40_v4 = vmul.f32 %v1734_v0, %v18_v2  ;;  %v41_v8 = vmul.f32 %v1734_v0, %v19_v6  ;;  %v22_v10 = vld [vmem:[%s2554_s1 + $0x10] sm:$0xf]  ;;  %v45_v15 = vmul.f32 %v1734_v0, %v23_v9  ;;  %v25_v17 = vld [vmem:[%s2554_s1 + $0x1c] sm:$0xf]  ;;  %v24_v18 = vld [vmem:[%s2554_s1 + $0x18] sm:$0xf] }
   0x4   :  { %v55_v11 = vsel %vm48_vm0, %v42_v3, 0.0  ;;  %v58_v13 = vsel %vm48_vm0, %v43_v7, 0.0  ;;  %v44_v16 = vmul.f32 %v1734_v0, %v22_v10  ;;  %v47_v21 = vmul.f32 %v1734_v0, %v25_v17  ;;  %s1815_s1 = smov 104  }
   0x5   :  { %v49_v12 = vsel %vm48_vm0, %v40_v4, 0.0  ;;  %56 = vadd.xlane.f32.xlu1 %v55_v11  ;;  %v52_v14 = vsel %vm48_vm0, %v41_v8, 0.0  ;;  %v64_v19 = vsel %vm48_vm0, %v45_v15, 0.0  ;;  %v46_v22 = vmul.f32 %v1734_v0, %v24_v18 }
   0x6   :  { %50 = vadd.xlane.f32.xlu0 %v49_v12  ;;  %v61_v20 = vsel %vm48_vm0, %v44_v16, 0.0  ;;  %v70_v23 = vsel %vm48_vm0, %v47_v21, 0.0  ;;  %v90_v60 = vand.u32 127, %v89_v54  ;;  %v1894_v61 = vshrl.u32 %v89_v54, 7 }
   0x7   :  { %v67_v24 = vsel %vm48_vm0, %v46_v22, 0.0  ;;  %vm127_vm3 = vcmask 1043459   ;;  %vm129_vm4 = vcmask 1044484   ;;  %vm131_vm5 = vcmask 1045509  }
   0x8   :  { %vm133_vm6 = vcmask 1046534   ;;  %vm135_vm7 = vcmask 1047559   ;;  %vm138_vm8 = vcmask 31744   ;;  %vm452_vm9 = vcmask 64512  }
   0x9   :  { %59 = vadd.xlane.f32.xlu1 %v58_v13  ;;  %vm807_vm10 = vcmask 126016   ;;  %vm880_vm11 = vcmask 130112   ;;  %vm1227_vm12 = vcmask 191616   ;;  %vm1647_vm13 = vcmask 257216  }
   0xa   :  { %53 = vadd.xlane.f32.xlu0 %v52_v14  ;;  %vm1300_vm14 = vcmask 195712   ;;  %vm1720_vm15 = vcmask 261312  }
   0xd   :  { %65 = vadd.xlane.f32.xlu1 %v64_v19 }
   0xe   :  { %62 = vadd.xlane.f32.xlu0 %v61_v20 }
  0x11   :  { %71 = vadd.xlane.f32.xlu1 %v70_v23 }
  0x12   :  { %68 = vadd.xlane.f32.xlu0 %v67_v24 }
  0x22   :  { %462 = vrot.lane.b32.xlu1 %v40_v4, %s1813_s29 }
  0x26   :  { %882 = vrot.lane.b32.xlu1 %v40_v4, %s1814_s30 }
  0x28   :  { %464 = vrot.lane.b32.xlu0 %v41_v8, %s1813_s29 }
  0x2a   :  { %886 = vrot.lane.b32.xlu1 %v42_v3, %s1814_s30 }
  0x2c   :  { %466 = vrot.lane.b32.xlu0 %v42_v3, %s1813_s29 }
  0x2e   :  { %1304 = vrot.lane.b32.xlu1 %v41_v8, %s1815_s1 }
  0x30   :  { %468 = vrot.lane.b32.xlu0 %v43_v7, %s1813_s29 }
  0x32   :  { %1306 = vrot.lane.b32.xlu1 %v42_v3, %s1815_s1  ;;  %v1901_v3 = vsub.s32 %v90_v60, %v1894_v61 }
  0x34   :  { %470 = vrot.lane.b32.xlu0 %v44_v16, %s1813_s29 }
  0x36   :  { %890 = vrot.lane.b32.xlu1 %v44_v16, %s1814_s30 }
  0x38   :  { %884 = vrot.lane.b32.xlu0 %v41_v8, %s1814_s30 }
  0x3a   :  { %474 = vrot.lane.b32.xlu1 %v46_v22, %s1813_s29 }
  0x3c   :  { %1302 = vrot.lane.b32.xlu0 %v40_v4, %s1815_s1 }
  0x3e   :  { %1310 = vrot.lane.b32.xlu1 %v44_v16, %s1815_s1 }
  0x40   :  { %888 = vrot.lane.b32.xlu0 %v43_v7, %s1814_s30 }
  0x42   :  { %894 = vrot.lane.b32.xlu1 %v46_v22, %s1814_s30 }
  0x44   :  { %472 = vrot.lane.b32.xlu0 %v45_v15, %s1813_s29 }
  0x46   :  { %896 = vrot.lane.b32.xlu1 %v47_v21, %s1814_s30 }
  0x48   :  { %1308 = vrot.lane.b32.xlu0 %v43_v7, %s1815_s1 }
  0x4a   :  { %1316 = vrot.lane.b32.xlu1 %v47_v21, %s1815_s1 }
  0x4c   :  { %892 = vrot.lane.b32.xlu0 %v45_v15, %s1814_s30 }
  0x50   :  { %476 = vrot.lane.b32.xlu0 %v47_v21, %s1813_s29 }
  0x54   :  { %1312 = vrot.lane.b32.xlu0 %v45_v15, %s1815_s1 }
  0x58   :  { %1314 = vrot.lane.b32.xlu0 %v46_v22, %s1815_s1 }
  0x92   :  { %v57_v25 = vpop.xlane.xlu1 %56 }
  0x93   :  { %v51_v26 = vpop.xlane.xlu0 %50  ;;  %v1905_v6 = vmul.f32 0.35355338, %v57_v25 }
  0x94   :  { %v1903_v4 = vmul.f32 0.35355338, %v51_v26 }
  0x95   :  { %v102_v14 = vrot.slane %v1905_v6, %v1901_v3 }
  0x96   :  { %v1872_v27 = vpop.xlane.xlu1 %59  ;;  %v94_v10 = vrot.slane %v1903_v4, %v1901_v3 }
  0x97   :  { %v54_v28 = vpop.xlane.xlu0 %53  ;;  %v1914_v11 = vmul.f32 0.35355338, %v1872_v27 }
  0x98   :  { %v1897_v0 = vmul.f32 0.35355338, %v54_v28 }
  0x99   :  { %v106_v19 = vrot.slane %v1914_v11, %v1901_v3 }
  0x9a   :  { %v1874_v29 = vpop.xlane.xlu1 %65  ;;  %v98_v8 = vrot.slane %v1897_v0, %v1901_v3 }
  0x9b   :  { %v1876_v30 = vpop.xlane.xlu0 %62  ;;  %v1929_v23 = vmul.f32 0.35355338, %v1874_v29 }
  0x9c   :  { %v124_v16 = vsel %vm123_vm1, %v98_v8, %v94_v10  ;;  %v1921_v17 = vmul.f32 0.35355338, %v1876_v30 }
  0x9d   :  { %v126_v21 = vsel %vm125_vm2, %v102_v14, %v124_v16  ;;  %v114_v29 = vrot.slane %v1929_v23, %v1901_v3 }
  0x9e   :  { %v1878_v31 = vpop.xlane.xlu1 %71  ;;  %v110_v25 = vrot.slane %v1921_v17, %v1901_v3  ;;  %v128_v30 = vsel %vm127_vm3, %v106_v19, %v126_v21 }
  0x9f   :  { %v1880_v32 = vpop.xlane.xlu0 %68 }
  0xa0   :  { %v1934_v26 = vmul.f32 0.35355338, %v1880_v32 }
  0xa2   :  { %v463_v33 = vpop.permute.xlu1 %462  ;;  %v118_v32 = vrot.slane %v1934_v26, %v1901_v3 }
  0xa3   :  { %v465_v34 = vpop.permute.xlu0 %464  ;;  %v486_v35 = vsel %vm48_vm0, %v463_v33, 0.0 }
  0xa4   :  { %v489_v36 = vsel %vm48_vm0, %v465_v34, 0.0  ;;  %487 = vadd.xlane.f32.xlu0 %v486_v35  ;;  %v1942_v34 = vmul.f32 0.35355338, %v1878_v31 }
  0xa5   :  { %490 = vadd.xlane.f32.xlu1 %v489_v36  ;;  %v130_v36 = vsel %vm129_vm4, %v110_v25, %v128_v30 }
  0xa6   :  { %v883_v38 = vpop.permute.xlu1 %882  ;;  %v132_v31 = vsel %vm131_vm5, %v114_v29, %v130_v36 }
  0xa7   :  { %v467_v37 = vpop.permute.xlu0 %466  ;;  %v906_v40 = vsel %vm48_vm0, %v883_v38, 0.0 }
  0xa8   :  { %v492_v39 = vsel %vm48_vm0, %v467_v37, 0.0 }
  0xa9   :  { %493 = vadd.xlane.f32.xlu0 %v492_v39  ;;  %907 = vadd.xlane.f32.xlu1 %v906_v40  ;;  %v122_v40 = vrot.slane %v1942_v34, %v1901_v3 }
  0xaa   :  { %v887_v42 = vpop.permute.xlu1 %886 }
  0xab   :  { %v469_v41 = vpop.permute.xlu0 %468  ;;  %v912_v44 = vsel %vm48_vm0, %v887_v42, 0.0  ;;  %v134_v42 = vsel %vm133_vm6, %v118_v32, %v132_v31 }
  0xac   :  { %v495_v43 = vsel %vm48_vm0, %v469_v41, 0.0 }
  0xad   :  { %496 = vadd.xlane.f32.xlu0 %v495_v43  ;;  %913 = vadd.xlane.f32.xlu1 %v912_v44  ;;  %v136_v43 = vsel %vm135_vm7, %v122_v40, %v134_v42 }
  0xae   :  { %v1305_v46 = vpop.permute.xlu1 %1304  ;;  %v139_v44 = vsel %vm138_vm8, %v136_v43, -inf }
  0xaf   :  { %v471_v45 = vpop.permute.xlu0 %470  ;;  %v1329_v47 = vsel %vm48_vm0, %v1305_v46, 0.0 }
  0xb0   :  { %v498_v57 = vsel %vm48_vm0, %v471_v45, 0.0  ;;  %v1816_v45 = vmov 0  }
  0xb1   :  { %1330 = vadd.xlane.f32.xlu1 %v1329_v47  ;;  %1740 = vset.pattern.permute.xlu0 %v1816_v45 }
  0xb2   :  { %v1307_v49 = vpop.permute.xlu1 %1306  ;;  %1739 = vset.pattern.permute.xlu1 %v1816_v45 }
  0xb3   :  { %v885_v48 = vpop.permute.xlu0 %884  ;;  %v1332_v59 = vsel %vm48_vm0, %v1307_v49, 0.0 }
  0xb4   :  { %v909_v50 = vsel %vm48_vm0, %v885_v48, 0.0 }
  0xb5   :  { %910 = vadd.xlane.f32.xlu0 %v909_v50 }
  0xb6   :  { %v891_v52 = vpop.permute.xlu1 %890 }
  0xb7   :  { %v1303_v51 = vpop.permute.xlu0 %1302  ;;  %v918_v2 = vsel %vm48_vm0, %v891_v52, 0.0 }
  0xb8   :  { %v1326_v53 = vsel %vm48_vm0, %v1303_v51, 0.0 }
  0xb9   :  { %1327 = vadd.xlane.f32.xlu0 %v1326_v53 }
  0xba   :  { %v475_v56 = vpop.permute.xlu1 %474 }
  0xbb   :  { %v889_v55 = vpop.permute.xlu0 %888  ;;  %v504_v9 = vsel %vm48_vm0, %v475_v56, 0.0 }
  0xbc   :  { %v915_v58 = vsel %vm48_vm0, %v889_v55, 0.0 }
  0xbd   :  { %499 = vadd.xlane.f32.xlu0 %v498_v57  ;;  %916 = vadd.xlane.f32.xlu1 %v915_v58 }
  0xbe   :  { %v1311_v1 = vpop.permute.xlu1 %1310 }
  0xbf   :  { %v473_v62 = vpop.permute.xlu0 %472  ;;  %v1338_v18 = vsel %vm48_vm0, %v1311_v1, 0.0 }
  0xc0   :  { %v501_v63 = vsel %vm48_vm0, %v473_v62, 0.0 }
  0xc1   :  { %1333 = vadd.xlane.f32.xlu0 %v1332_v59  ;;  %502 = vadd.xlane.f32.xlu1 %v501_v63 }
  0xc2   :  { %v895_v13 = vpop.permute.xlu1 %894 }
  0xc3   :  { %v1309_v5 = vpop.permute.xlu0 %1308  ;;  %v924_v27 = vsel %vm48_vm0, %v895_v13, 0.0 }
  0xc4   :  { %v1335_v7 = vsel %vm48_vm0, %v1309_v5, 0.0 }
  0xc5   :  { %919 = vadd.xlane.f32.xlu0 %v918_v2  ;;  %1336 = vadd.xlane.f32.xlu1 %v1335_v7 }
  0xc6   :  { %v897_v24 = vpop.permute.xlu1 %896 }
  0xc7   :  { %v893_v12 = vpop.permute.xlu0 %892  ;;  %v927_v35 = vsel %vm48_vm0, %v897_v24, 0.0 }
  0xc8   :  { %v921_v15 = vsel %vm48_vm0, %v893_v12, 0.0 }
  0xc9   :  { %505 = vadd.xlane.f32.xlu0 %v504_v9  ;;  %922 = vadd.xlane.f32.xlu1 %v921_v15 }
  0xca   :  { %v1317_v38 = vpop.permute.xlu1 %1316 }
  0xcb   :  { %v477_v20 = vpop.permute.xlu0 %476  ;;  %v1347_v41 = vsel %vm48_vm0, %v1317_v38, 0.0 }
  0xcc   :  { %v507_v22 = vsel %vm48_vm0, %v477_v20, 0.0 }
  0xcd   :  { %1339 = vadd.xlane.f32.xlu0 %v1338_v18  ;;  %508 = vadd.xlane.f32.xlu1 %v507_v22 }
  0xcf   :  { %v1313_v28 = vpop.permute.xlu0 %1312 }
  0xd0   :  { %v1341_v33 = vsel %vm48_vm0, %v1313_v28, 0.0 }
  0xd1   :  { %925 = vadd.xlane.f32.xlu0 %v924_v27  ;;  %1342 = vadd.xlane.f32.xlu1 %v1341_v33 }
  0xd3   :  { %v1315_v37 = vpop.permute.xlu0 %1314 }
  0xd4   :  { %v1344_v39 = vsel %vm48_vm0, %v1315_v37, 0.0 }
  0xd5   :  { %928 = vadd.xlane.f32.xlu0 %v927_v35  ;;  %1345 = vadd.xlane.f32.xlu1 %v1344_v39 }
  0xd9   :  { %1348 = vadd.xlane.f32.xlu0 %v1347_v41 }
  0xdd   :  { %140 = vmax.xlane.f32.xlu0 %v139_v44 }
 0x131   :  { %v488_v46 = vpop.xlane.xlu0 %487 }
 0x132   :  { %v491_v47 = vpop.xlane.xlu1 %490  ;;  %v1958_v60 = vmul.f32 0.35355338, %v488_v46 }
 0x133   :  { %v1956_v59 = vmul.f32 0.35355338, %v491_v47 }
 0x134   :  { %v529_v8 = vrot.slane %v1958_v60, %v1901_v3 }
 0x135   :  { %v533_v7 = vrot.slane %v1956_v59, %v1901_v3 }
 0x136   :  { %v494_v48 = vpop.xlane.xlu0 %493  ;;  %v908_v49 = vpop.xlane.xlu1 %907 }
 0x137   :  { %v1960_v62 = vmul.f32 0.35355338, %v494_v48  ;;  %v558_v19 = vsel %vm123_vm1, %v533_v7, %v529_v8  ;;  %v1983_v20 = vmul.f32 0.35355338, %v908_v49 }
 0x139   :  { %v537_v10 = vrot.slane %v1960_v62, %v1901_v3  ;;  %v949_v37 = vrot.slane %v1983_v20, %v1901_v3 }
 0x13a   :  { %v497_v50 = vpop.xlane.xlu0 %496  ;;  %v914_v51 = vpop.xlane.xlu1 %913 }
 0x13b   :  { %v1962_v2 = vmul.f32 0.35355338, %v497_v50  ;;  %v559_v22 = vsel %vm125_vm2, %v537_v10, %v558_v19  ;;  %v1988_v24 = vmul.f32 0.35355338, %v914_v51 }
 0x13d   :  { %v541_v14 = vrot.slane %v1962_v2, %v1901_v3  ;;  %v957_v31 = vrot.slane %v1988_v24, %v1901_v3 }
 0x13e   :  { %v1331_v53 = vpop.xlane.xlu1 %1330 }
 0x13f   :  { %v560_v30 = vsel %vm127_vm3, %v541_v14, %v559_v22  ;;  %v2018_v48 = vmul.f32 0.35355338, %v1331_v53 }
 0x142   :  { %v911_v52 = vpop.xlane.xlu0 %910 }
 0x143   :  { %v1976_v15 = vmul.f32 0.35355338, %v911_v52 }
 0x145   :  { %v953_v33 = vrot.slane %v1976_v15, %v1901_v3 }
 0x146   :  { %v1328_v54 = vpop.xlane.xlu0 %1327 }
 0x147   :  { %v978_v44 = vsel %vm123_vm1, %v953_v33, %v949_v37  ;;  %v2023_v51 = vmul.f32 0.35355338, %v1328_v54  ;;  %v1373_v54 = vrot.slane %v2018_v48, %v1901_v3 }
 0x14a   :  { %v917_v55 = vpop.xlane.xlu1 %916  ;;  %v500_v56 = vpop.xlane.xlu0 %499 }
 0x14b   :  { %v1964_v5 = vmul.f32 0.35355338, %v500_v56  ;;  %v1995_v29 = vmul.f32 0.35355338, %v917_v55  ;;  %v979_v55 = vsel %vm125_vm2, %v957_v31, %v978_v44 }
 0x14d   :  { %v545_v18 = vrot.slane %v1964_v5, %v1901_v3  ;;  %v961_v45 = vrot.slane %v1995_v29, %v1901_v3 }
 0x14e   :  { %v503_v57 = vpop.xlane.xlu1 %502  ;;  %v1334_v58 = vpop.xlane.xlu0 %1333 }
 0x14f   :  { %v1970_v9 = vmul.f32 0.35355338, %v503_v57  ;;  %v561_v36 = vsel %vm129_vm4, %v545_v18, %v560_v30  ;;  %v2028_v56 = vmul.f32 0.35355338, %v1334_v58  ;;  %v1369_v58 = vrot.slane %v2023_v51, %v1901_v3 }
 0x151   :  { %v549_v21 = vrot.slane %v1970_v9, %v1901_v3  ;;  %v1377_v19 = vrot.slane %v2028_v56, %v1901_v3 }
 0x152   :  { %v1337_v63 = vpop.xlane.xlu1 %1336  ;;  %v920_v1 = vpop.xlane.xlu0 %919 }
 0x153   :  { %v1999_v35 = vmul.f32 0.35355338, %v920_v1  ;;  %v562_v40 = vsel %vm131_vm5, %v549_v21, %v561_v36  ;;  %v980_v1 = vsel %vm127_vm3, %v961_v45, %v979_v55  ;;  %v2033_v7 = vmul.f32 0.35355338, %v1337_v63 }
 0x154   :  { %v2063_v36 = vsub.s32 2, %v1894_v61  ;;  %v2084_v55 = vsub.s32 1, %v1894_v61 }
 0x155   :  { %v965_v49 = vrot.slane %v1999_v35, %v1901_v3 }
 0x156   :  { %v923_v12 = vpop.xlane.xlu1 %922  ;;  %v506_v13 = vpop.xlane.xlu0 %505 }
 0x157   :  { %v1978_v16 = vmul.f32 0.35355338, %v506_v13  ;;  %v2004_v38 = vmul.f32 0.35355338, %v923_v12  ;;  %v981_v12 = vsel %vm129_vm4, %v965_v49, %v980_v1 }
 0x159   :  { %v553_v25 = vrot.slane %v1978_v16, %v1901_v3  ;;  %v969_v52 = vrot.slane %v2004_v38, %v1901_v3 }
 0x15a   :  { %v509_v27 = vpop.xlane.xlu1 %508  ;;  %v1340_v28 = vpop.xlane.xlu0 %1339 }
 0x15b   :  { %v1997_v32 = vmul.f32 0.35355338, %v509_v27  ;;  %v563_v43 = vsel %vm133_vm6, %v553_v25, %v562_v40  ;;  %v2040_v13 = vmul.f32 0.35355338, %v1340_v28  ;;  %v982_v63 = vsel %vm131_vm5, %v969_v52, %v981_v12 }
 0x15c   :  { %v2055_v27 = vsub.s32 0, %v1894_v61  ;;  %v1381_v28 = vrot.slane %v2033_v7, %v1901_v3  ;;  %v1398_v40 = vsel %vm123_vm1, %v1373_v54, %v1369_v58 }
 0x15d   :  { %v557_v39 = vrot.slane %v1997_v32, %v1901_v3  ;;  %v1385_v37 = vrot.slane %v2040_v13, %v1901_v3 }
 0x15e   :  { %v1343_v41 = vpop.xlane.xlu1 %1342  ;;  %v926_v42 = vpop.xlane.xlu0 %925 }
 0x15f   :  { %v2015_v46 = vmul.f32 0.35355338, %v926_v42  ;;  %v564_v47 = vsel %vm135_vm7, %v557_v39, %v563_v43  ;;  %v2044_v14 = vmul.f32 0.35355338, %v1343_v41  ;;  %v2072_v41 = vsub.s32 3, %v1894_v61 }
 0x160   :  { %v566_v50 = vsel %vm138_vm8, %v564_v47, -inf  ;;  %v1399_v42 = vsel %vm125_vm2, %v1377_v19, %v1398_v40 }
 0x161   :  { %567 = vmax.xlane.f32.xlu1 %v566_v50  ;;  %v973_v57 = vrot.slane %v2015_v46, %v1901_v3  ;;  %v1389_v31 = vrot.slane %v2044_v14, %v1901_v3  ;;  %v1400_v45 = vsel %vm127_vm3, %v1381_v28, %v1399_v42  ;;  %v2103_v28 = vsub.s32 6, %v1894_v61 }
 0x162   :  { %v929_v53 = vpop.xlane.xlu0 %928  ;;  %v1346_v8 = vpop.xlane.xlu1 %1345  ;;  %v1401_v52 = vsel %vm129_vm4, %v1385_v37, %v1400_v45 }
 0x163   :  { %v2035_v10 = vmul.f32 0.35355338, %v929_v53  ;;  %v2051_v21 = vmul.f32 0.35355338, %v1346_v8  ;;  %v983_v25 = vsel %vm133_vm6, %v973_v57, %v982_v63  ;;  %v2087_v57 = vsub.s32 4, %v1894_v61 }
 0x164   :  { %v1402_v54 = vsel %vm131_vm5, %v1389_v31, %v1401_v52  ;;  %v2096_v63 = vsub.s32 5, %v1894_v61  ;;  %v2109_v31 = vsub.s32 7, %v1894_v61 }
 0x165   :  { %v977_v18 = vrot.slane %v2035_v10, %v1901_v3  ;;  %v1393_v43 = vrot.slane %v2051_v21, %v1901_v3 }
 0x166   :  { %v1349_v22 = vpop.xlane.xlu0 %1348 }
 0x167   :  { %v2059_v30 = vmul.f32 0.35355338, %v1349_v22  ;;  %v984_v33 = vsel %vm135_vm7, %v977_v18, %v983_v25  ;;  %v1403_v12 = vsel %vm133_vm6, %v1393_v43, %v1402_v54 }
 0x168   :  { %v986_v39 = vsel %vm138_vm8, %v984_v33, -inf }
 0x169   :  { %987 = vmax.xlane.f32.xlu1 %v986_v39  ;;  %v1397_v47 = vrot.slane %v2059_v30, %v1901_v3 }
 0x16a   :  { %v141_v44 = vpop.xlane.xlu0 %140 }
 0x16b   :  { %v146_v49 = vrot.slane %v141_v44, %v2055_v27  ;;  %v154_v50 = vrot.slane %v141_v44, %v2063_v36  ;;  %v158_v53 = vrot.slane %v141_v44, %v2072_v41  ;;  %v1404_v18 = vsel %vm135_vm7, %v1397_v47, %v1403_v12 }
 0x16c   :  { %v150_v19 = vrot.slane %v141_v44, %v2084_v55  ;;  %v162_v22 = vrot.slane %v141_v44, %v2087_v57  ;;  %v166_v37 = vrot.slane %v141_v44, %v2096_v63  ;;  %v170_v42 = vrot.slane %v141_v44, %v2103_v28 }
 0x16d   :  { %v183_v1 = vsub.f32 %v1903_v4, %v146_v49  ;;  %v185_v8 = vsub.f32 %v1905_v6, %v154_v50  ;;  %v186_v25 = vsub.f32 %v1914_v11, %v158_v53  ;;  %v1406_v6 = vsel %vm138_vm8, %v1404_v18, -inf }
 0x16e   :  { %1407 = vmax.xlane.f32.xlu0 %v1406_v6  ;;  %v184_v33 = vsub.f32 %v1897_v0, %v150_v19  ;;  %v187_v39 = vsub.f32 %v1921_v17, %v162_v22  ;;  %v188_v43 = vsub.f32 %v1929_v23, %v166_v37  ;;  %v174_v0 = vrot.slane %v141_v44, %v2109_v31 }
 0x16f   :  { %v191_v58 = vmul.f32 1.442695, %v183_v1  ;;  %v195_v4 = vmul.f32 1.442695, %v185_v8  ;;  %v197_v40 = vmul.f32 1.442695, %v186_v25  ;;  %v189_v17 = vsub.f32 %v1934_v26, %v170_v42 }
 0x170   :  { %v193_v11 = vmul.f32 1.442695, %v184_v33  ;;  %v199_v45 = vmul.f32 1.442695, %v187_v39  ;;  %v201_v49 = vmul.f32 1.442695, %v188_v43  ;;  %v190_v50 = vsub.f32 %v1942_v34, %v174_v0 }
 0x171   :  { %1741 = vpow2.f32 %v191_v58  ;;  %v203_v23 = vmul.f32 1.442695, %v189_v17 }
 0x172   :  { %1743 = vpow2.f32 %v195_v4  ;;  %v205_v53 = vmul.f32 1.442695, %v190_v50 }
 0x173   :  { %1745 = vpow2.f32 %v197_v40 }
 0x174   :  { %1747 = vpow2.f32 %v193_v11 }
 0x175   :  { %1749 = vpow2.f32 %v199_v45 }
 0x176   :  { %1751 = vpow2.f32 %v201_v49 }
 0x177   :  { %1753 = vpow2.f32 %v203_v23 }
 0x178   :  { %1755 = vpow2.f32 %v205_v53 }
 0x17b   :  { %v2113_v47 = vpop.eup %1741 }
 0x17c   :  { %216 = vperm.xlu1 %1739, %v2113_v47   ;;  %v2118_v61 = vpop.eup %1743 }
 0x17d   :  { %v2122_v52 = vpop.eup %1745 }
 0x17e   :  { %v2125_v1 = vpop.eup %1747 }
 0x17f   :  { %v2127_v44 = vpop.eup %1749 }
 0x180   :  { %222 = vperm.xlu1 %1739, %v2118_v61   ;;  %v2131_v26 = vpop.eup %1751 }
 0x181   :  { %v2134_v34 = vpop.eup %1753 }
 0x182   :  { %v2137_v8 = vpop.eup %1755 }
 0x184   :  { %225 = vperm.xlu1 %1739, %v2122_v52   ;;  %219 = vperm.xlu0 %1740, %v2125_v1  }
 0x188   :  { %228 = vperm.xlu1 %1739, %v2127_v44  }
 0x18c   :  { %231 = vperm.xlu1 %1739, %v2131_v26  }
 0x190   :  { %234 = vperm.xlu1 %1739, %v2134_v34  }
 0x194   :  { %237 = vperm.xlu1 %1739, %v2137_v8  }
 0x1ee   :  { %v568_v54 = vpop.xlane.xlu1 %567 }
 0x1ef   :  { %v573_v12 = vrot.slane %v568_v54, %v2055_v27  ;;  %v577_v58 = vrot.slane %v568_v54, %v2084_v55  ;;  %v581_v18 = vrot.slane %v568_v54, %v2063_v36  ;;  %v585_v19 = vrot.slane %v568_v54, %v2072_v41 }
 0x1f0   :  { %v593_v22 = vrot.slane %v568_v54, %v2096_v63  ;;  %v589_v33 = vrot.slane %v568_v54, %v2087_v57  ;;  %v597_v11 = vrot.slane %v568_v54, %v2103_v28  ;;  %v601_v45 = vrot.slane %v568_v54, %v2109_v31 }
 0x1f1   :  { %v610_v25 = vsub.f32 %v1958_v60, %v573_v12  ;;  %v611_v4 = vsub.f32 %v1956_v59, %v577_v58  ;;  %v613_v6 = vsub.f32 %v1962_v2, %v585_v19  ;;  %v612_v37 = vsub.f32 %v1960_v62, %v581_v18 }
 0x1f2   :  { %v615_v42 = vsub.f32 %v1970_v9, %v593_v22  ;;  %v614_v60 = vsub.f32 %v1964_v5, %v589_v33  ;;  %v616_v2 = vsub.f32 %v1978_v16, %v597_v11  ;;  %v617_v49 = vsub.f32 %v1997_v32, %v601_v45 }
 0x1f3   :  { %v618_v39 = vmul.f32 1.442695, %v610_v25  ;;  %v620_v40 = vmul.f32 1.442695, %v611_v4  ;;  %v624_v43 = vmul.f32 1.442695, %v613_v6 }
 0x1f4   :  { %v622_v59 = vmul.f32 1.442695, %v612_v37  ;;  %v628_v62 = vmul.f32 1.442695, %v615_v42  ;;  %v626_v9 = vmul.f32 1.442695, %v614_v60 }
 0x1f5   :  { %1757 = vpow2.f32 %v618_v39  ;;  %v630_v5 = vmul.f32 1.442695, %v616_v2  ;;  %v632_v53 = vmul.f32 1.442695, %v617_v49 }
 0x1f6   :  { %1759 = vpow2.f32 %v620_v40  ;;  %v2154_v0 = vpop.xlane.xlu1 %987 }
 0x1f7   :  { %1761 = vpow2.f32 %v624_v43  ;;  %v993_v17 = vrot.slane %v2154_v0, %v2055_v27  ;;  %v997_v50 = vrot.slane %v2154_v0, %v2084_v55  ;;  %v1001_v32 = vrot.slane %v2154_v0, %v2063_v36 }
 0x1f8   :  { %1763 = vpow2.f32 %v622_v59 }
 0x1f9   :  { %1765 = vpow2.f32 %v628_v62  ;;  %v1030_v23 = vsub.f32 %v1983_v20, %v993_v17  ;;  %v1031_v58 = vsub.f32 %v1976_v15, %v997_v50  ;;  %v1017_v20 = vrot.slane %v2154_v0, %v2103_v28 }
 0x1fa   :  { %1767 = vpow2.f32 %v626_v9  ;;  %v1021_v15 = vrot.slane %v2154_v0, %v2109_v31  ;;  %v1032_v6 = vsub.f32 %v1988_v24, %v1001_v32  ;;  %v1005_v17 = vrot.slane %v2154_v0, %v2072_v41 }
 0x1fb   :  { %v2165_v16 = vpop.xlane.xlu0 %1407  ;;  %1769 = vpow2.f32 %v630_v5  ;;  %v1038_v19 = vmul.f32 1.442695, %v1030_v23  ;;  %v1040_v33 = vmul.f32 1.442695, %v1031_v58  ;;  %v1036_v37 = vsub.f32 %v2015_v46, %v1017_v20  ;;  %v217_v20 = vpop.permute.xlu1 %216 }
 0x1fc   :  { %v1421_v18 = vrot.slane %v2165_v16, %v2063_v36  ;;  %1771 = vpow2.f32 %v632_v53  ;;  %v1413_v39 = vrot.slane %v2165_v16, %v2055_v27  ;;  %v1037_v42 = vsub.f32 %v2035_v10, %v1021_v15 }
 0x1fd   :  { %1773 = vpow2.f32 %v1038_v19  ;;  %v1042_v24 = vmul.f32 1.442695, %v1032_v6  ;;  %v1417_v43 = vrot.slane %v2165_v16, %v2084_v55  ;;  %v1050_v46 = vmul.f32 1.442695, %v1036_v37 }
 0x1fe   :  { %v1452_v25 = vsub.f32 %v2028_v56, %v1421_v18  ;;  %1775 = vpow2.f32 %v1040_v33  ;;  %v1441_v45 = vrot.slane %v2165_v16, %v2109_v31  ;;  %v1450_v60 = vsub.f32 %v2023_v51, %v1413_v39 }
 0x1ff   :  { %v2163_v54 = vpop.eup %1757  ;;  %v1052_v10 = vmul.f32 1.442695, %v1037_v42  ;;  %v1451_v62 = vsub.f32 %v2018_v48, %v1417_v43  ;;  %v1009_v48 = vrot.slane %v2154_v0, %v2087_v57  ;;  %v1033_v5 = vsub.f32 %v1995_v29, %v1005_v17  ;;  %v223_v37 = vpop.permute.xlu1 %222 }
 0x200   :  { %v2167_v12 = vpop.eup %1759  ;;  %643 = vperm.xlu0 %1740, %v2163_v54   ;;  %v1462_v40 = vmul.f32 1.442695, %v1452_v25  ;;  %v1457_v49 = vsub.f32 %v2059_v30, %v1441_v45  ;;  %v1458_v51 = vmul.f32 1.442695, %v1450_v60  ;;  %v1425_v18 = vrot.slane %v2165_v16, %v2072_v41 }
 0x201   :  { %646 = vperm.xlu1 %1739, %v2167_v12   ;;  %v2178_v22 = vpop.eup %1761  ;;  %v1460_v50 = vmul.f32 1.442695, %v1451_v62  ;;  %v1034_v30 = vsub.f32 %v1999_v35, %v1009_v48  ;;  %v1044_v58 = vmul.f32 1.442695, %v1033_v5  ;;  %v1013_v25 = vrot.slane %v2154_v0, %v2096_v63 }
 0x202   :  { %v2181_v4 = vpop.eup %1763  ;;  %1777 = vpow2.f32 %v1462_v40  ;;  %v1472_v23 = vmul.f32 1.442695, %v1457_v49  ;;  %v1453_v35 = vsub.f32 %v2033_v7, %v1425_v18  ;;  %v1429_v40 = vrot.slane %v2165_v16, %v2087_v57 }
 0x203   :  { %v2191_v56 = vpop.eup %1765  ;;  %1779 = vpow2.f32 %v1042_v24  ;;  %v1046_v15 = vmul.f32 1.442695, %v1034_v30  ;;  %v1035_v39 = vsub.f32 %v2004_v38, %v1013_v25  ;;  %v1433_v43 = vrot.slane %v2165_v16, %v2096_v63  ;;  %v226_v38 = vpop.permute.xlu1 %225 }
 0x204   :  { %652 = vperm.xlu0 %1740, %v2178_v22   ;;  %v2193_v11 = vpop.eup %1767  ;;  %1781 = vpow2.f32 %v1050_v46  ;;  %v1464_v0 = vmul.f32 1.442695, %v1453_v35  ;;  %v1454_v46 = vsub.f32 %v2040_v13, %v1429_v40  ;;  %v1437_v60 = vrot.slane %v2165_v16, %v2103_v28 }
 0x205   :  { %649 = vperm.xlu1 %1739, %v2181_v4   ;;  %v2203_v59 = vpop.eup %1769  ;;  %1783 = vpow2.f32 %v1052_v10  ;;  %v1048_v7 = vmul.f32 1.442695, %v1035_v39  ;;  %v1455_v10 = vsub.f32 %v2044_v14, %v1433_v43  ;;  %v220_v14 = vpop.permute.xlu0 %219  ;;  %v254_v35 = vrot.slane %v226_v38, %v1901_v3 }
 0x206   :  { %v2205_v2 = vpop.eup %1771  ;;  %1785 = vpow2.f32 %v1458_v51  ;;  %v1466_v62 = vmul.f32 1.442695, %v1454_v46  ;;  %v1456_v13 = vsub.f32 %v2051_v21, %v1437_v60 }
 0x207   :  { %v2213_v9 = vpop.eup %1773  ;;  %1787 = vpow2.f32 %v1460_v50  ;;  %v229_v49 = vpop.permute.xlu1 %228  ;;  %v1468_v51 = vmul.f32 1.442695, %v1455_v10 }
 0x208   :  { %658 = vperm.xlu0 %1740, %v2191_v56   ;;  %v2219_v53 = vpop.eup %1775  ;;  %1789 = vpow2.f32 %v1472_v23  ;;  %v1470_v48 = vmul.f32 1.442695, %v1456_v13  ;;  %v246_v23 = vrot.slane %v220_v14, %v1901_v3  ;;  %v258_v40 = vrot.slane %v229_v49, %v1901_v3 }
 0x209   :  { %655 = vperm.xlu1 %1739, %v2193_v11   ;;  %1791 = vpow2.f32 %v1044_v58  ;;  %v242_v58 = vrot.slane %v217_v20, %v1901_v3 }
 0x20a   :  { %1793 = vpow2.f32 %v1046_v15  ;;  %v250_v15 = vrot.slane %v223_v37, %v1901_v3 }
 0x20b   :  { %1795 = vpow2.f32 %v1464_v0  ;;  %v232_v5 = vpop.permute.xlu1 %231  ;;  %v271_v18 = vsel %vm123_vm1, %v246_v23, %v242_v58 }
 0x20c   :  { %661 = vperm.xlu0 %1740, %v2203_v59   ;;  %v2221_v32 = vpop.eup %1777  ;;  %1797 = vpow2.f32 %v1048_v7  ;;  %v272_v39 = vsel %vm125_vm2, %v250_v15, %v271_v18  ;;  %v262_v7 = vrot.slane %v232_v5, %v1901_v3 }
 0x20d   :  { %664 = vperm.xlu1 %1739, %v2205_v2   ;;  %v2228_v29 = vpop.eup %1779  ;;  %1799 = vpow2.f32 %v1466_v62  ;;  %v273_v46 = vsel %vm127_vm3, %v254_v35, %v272_v39 }
 0x20e   :  { %v2230_v19 = vpop.eup %1781  ;;  %1801 = vpow2.f32 %v1468_v51  ;;  %v274_v37 = vsel %vm129_vm4, %v258_v40, %v273_v46 }
 0x20f   :  { %v2237_v6 = vpop.eup %1783  ;;  %1803 = vpow2.f32 %v1470_v48  ;;  %v235_v21 = vpop.permute.xlu1 %234  ;;  %v275_v38 = vsel %vm131_vm5, %v262_v7, %v274_v37 }
 0x210   :  { %1063 = vperm.xlu0 %1740, %v2213_v9   ;;  %v2239_v33 = vpop.eup %1785  ;;  %v266_v43 = vrot.slane %v235_v21, %v1901_v3 }
 0x211   :  { %1489 = vperm.xlu1 %1739, %v2221_v32   ;;  %v2246_v42 = vpop.eup %1787 }
 0x212   :  { %v2248_v24 = vpop.eup %1789  ;;  %v276_v10 = vsel %vm133_vm6, %v266_v43, %v275_v38 }
 0x213   :  { %v2255_v45 = vpop.eup %1791  ;;  %v238_v0 = vpop.permute.xlu1 %237 }
 0x214   :  { %1066 = vperm.xlu0 %1740, %v2219_v53   ;;  %v2261_v17 = vpop.eup %1793  ;;  %v270_v60 = vrot.slane %v238_v0, %v1901_v3 }
 0x215   :  { %1081 = vperm.xlu1 %1739, %v2230_v19   ;;  %v2265_v50 = vpop.eup %1795 }
 0x216   :  { %v2268_v16 = vpop.eup %1797  ;;  %v277_v62 = vsel %vm135_vm7, %v270_v60, %v276_v10 }
 0x217   :  { %v2272_v30 = vpop.eup %1799  ;;  %v279_v49 = vsel %vm138_vm8, %v277_v62, 0.0 }
 0x218   :  { %1069 = vperm.xlu0 %1740, %v2228_v29   ;;  %v2277_v25 = vpop.eup %1801 }
 0x219   :  { %1084 = vperm.xlu1 %1739, %v2237_v6   ;;  %v2285_v20 = vpop.eup %1803 }
 0x21c   :  { %1483 = vperm.xlu0 %1740, %v2239_v33  }
 0x21d   :  { %1504 = vperm.xlu1 %1739, %v2248_v24  }
 0x220   :  { %1486 = vperm.xlu0 %1740, %v2246_v42  }
 0x224   :  { %1072 = vperm.xlu0 %1740, %v2255_v45  }
 0x228   :  { %1075 = vperm.xlu0 %1740, %v2261_v17  }
 0x22c   :  { %1492 = vperm.xlu0 %1740, %v2265_v50  }
 0x230   :  { %1078 = vperm.xlu0 %1740, %v2268_v16  }
 0x234   :  { %1495 = vperm.xlu0 %1740, %v2272_v30  }
 0x238   :  { %1498 = vperm.xlu0 %1740, %v2277_v25  }
 0x23c   :  { %1501 = vperm.xlu0 %1740, %v2285_v20  }
 0x241   :  { %280 = vadd.xlane.f32.xlu1 %v279_v49 }
 0x27f   :  { %v644_v13 = vpop.permute.xlu0 %643 }
 0x280   :  { %v647_v51 = vpop.permute.xlu1 %646  ;;  %v669_v5 = vrot.slane %v644_v13, %v1901_v3 }
 0x281   :  { %v673_v48 = vrot.slane %v647_v51, %v1901_v3 }
 0x283   :  { %v653_v14 = vpop.permute.xlu0 %652  ;;  %v698_v58 = vsel %vm123_vm1, %v673_v48, %v669_v5 }
 0x284   :  { %v650_v23 = vpop.permute.xlu1 %649  ;;  %v681_v18 = vrot.slane %v653_v14, %v1901_v3 }
 0x285   :  { %v677_v21 = vrot.slane %v650_v23, %v1901_v3 }
 0x287   :  { %v699_v15 = vsel %vm125_vm2, %v677_v21, %v698_v58  ;;  %v659_v35 = vpop.permute.xlu0 %658 }
 0x288   :  { %v656_v39 = vpop.permute.xlu1 %655  ;;  %v689_v0 = vrot.slane %v659_v35, %v1901_v3  ;;  %v700_v7 = vsel %vm127_vm3, %v681_v18, %v699_v15 }
 0x289   :  { %v685_v40 = vrot.slane %v656_v39, %v1901_v3 }
 0x28b   :  { %v701_v43 = vsel %vm129_vm4, %v685_v40, %v700_v7  ;;  %v662_v46 = vpop.permute.xlu0 %661 }
 0x28c   :  { %v665_v60 = vpop.permute.xlu1 %664  ;;  %v693_v37 = vrot.slane %v662_v46, %v1901_v3  ;;  %v702_v38 = vsel %vm131_vm5, %v689_v0, %v701_v43 }
 0x28d   :  { %v697_v10 = vrot.slane %v665_v60, %v1901_v3 }
 0x28e   :  { %v703_v62 = vsel %vm133_vm6, %v693_v37, %v702_v38 }
 0x28f   :  { %v1064_v49 = vpop.permute.xlu0 %1063  ;;  %v704_v13 = vsel %vm135_vm7, %v697_v10, %v703_v62 }
 0x290   :  { %v706_v51 = vsel %vm138_vm8, %v704_v13, 0.0  ;;  %v1490_v21 = vpop.permute.xlu1 %1489  ;;  %v1089_v0 = vrot.slane %v1064_v49, %v1901_v3 }
 0x291   :  { %707 = vadd.xlane.f32.xlu1 %v706_v51 }
 0x293   :  { %v1067_v48 = vpop.permute.xlu0 %1066 }
 0x294   :  { %v1082_v15 = vpop.permute.xlu1 %1081  ;;  %v1093_v35 = vrot.slane %v1067_v48, %v1901_v3 }
 0x295   :  { %v1113_v13 = vrot.slane %v1082_v15, %v1901_v3 }
 0x296   :  { %v1118_v46 = vsel %vm123_vm1, %v1093_v35, %v1089_v0 }
 0x297   :  { %v1070_v5 = vpop.permute.xlu0 %1069 }
 0x298   :  { %v1097_v39 = vrot.slane %v1070_v5, %v1901_v3  ;;  %v1085_v60 = vpop.permute.xlu1 %1084 }
 0x299   :  { %v1117_v49 = vrot.slane %v1085_v60, %v1901_v3 }
 0x29a   :  { %v1119_v37 = vsel %vm125_vm2, %v1097_v39, %v1118_v46  ;;  %v1517_v46 = vrot.slane %v1490_v21, %v1901_v3 }
 0x29b   :  { %v1484_v14 = vpop.permute.xlu0 %1483 }
 0x29c   :  { %v1509_v39 = vrot.slane %v1484_v14, %v1901_v3 }
 0x29f   :  { %v1487_v23 = vpop.permute.xlu0 %1486 }
 0x2a0   :  { %v1513_v5 = vrot.slane %v1487_v23, %v1901_v3 }
 0x2a2   :  { %v1538_v15 = vsel %vm123_vm1, %v1513_v5, %v1509_v39 }
 0x2a3   :  { %v1073_v58 = vpop.permute.xlu0 %1072 }
 0x2a4   :  { %v1101_v7 = vrot.slane %v1073_v58, %v1901_v3 }
 0x2a6   :  { %v1120_v10 = vsel %vm127_vm3, %v1101_v7, %v1119_v37  ;;  %v1505_v37 = vpop.permute.xlu1 %1504 }
 0x2a7   :  { %v1076_v18 = vpop.permute.xlu0 %1075 }
 0x2a8   :  { %v1105_v43 = vrot.slane %v1076_v18, %v1901_v3 }
 0x2aa   :  { %v1121_v51 = vsel %vm129_vm4, %v1105_v43, %v1120_v10 }
 0x2ab   :  { %v1493_v40 = vpop.permute.xlu0 %1492 }
 0x2ac   :  { %v1521_v7 = vrot.slane %v1493_v40, %v1901_v3 }
 0x2af   :  { %v1079_v38 = vpop.permute.xlu0 %1078 }
 0x2b0   :  { %v1109_v62 = vrot.slane %v1079_v38, %v1901_v3  ;;  %v1539_v38 = vsel %vm125_vm2, %v1517_v46, %v1538_v15 }
 0x2b1   :  { %v1540_v10 = vsel %vm127_vm3, %v1521_v7, %v1539_v38 }
 0x2b2   :  { %v1122_v48 = vsel %vm131_vm5, %v1109_v62, %v1121_v51  ;;  %v1537_v51 = vrot.slane %v1505_v37, %v1901_v3 }
 0x2b3   :  { %v1496_v58 = vpop.permute.xlu0 %1495  ;;  %v1123_v18 = vsel %vm133_vm6, %v1113_v13, %v1122_v48 }
 0x2b4   :  { %v1124_v35 = vsel %vm135_vm7, %v1117_v49, %v1123_v18  ;;  %v1525_v60 = vrot.slane %v1496_v58, %v1901_v3 }
 0x2b5   :  { %v1126_v0 = vsel %vm138_vm8, %v1124_v35, 0.0 }
 0x2b6   :  { %1127 = vadd.xlane.f32.xlu1 %v1126_v0  ;;  %v1541_v62 = vsel %vm129_vm4, %v1525_v60, %v1540_v10 }
 0x2b7   :  { %v1499_v43 = vpop.permute.xlu0 %1498 }
 0x2b8   :  { %v1529_v23 = vrot.slane %v1499_v43, %v1901_v3 }
 0x2ba   :  { %v1542_v40 = vsel %vm131_vm5, %v1529_v23, %v1541_v62 }
 0x2bb   :  { %v1502_v14 = vpop.permute.xlu0 %1501 }
 0x2bc   :  { %v1533_v13 = vrot.slane %v1502_v14, %v1901_v3 }
 0x2be   :  { %v1543_v21 = vsel %vm133_vm6, %v1533_v13, %v1542_v40 }
 0x2bf   :  { %v1544_v49 = vsel %vm135_vm7, %v1537_v51, %v1543_v21 }
 0x2c0   :  { %v1546_v48 = vsel %vm138_vm8, %v1544_v49, 0.0 }
 0x2c1   :  { %1547 = vadd.xlane.f32.xlu0 %v1546_v48 }
 0x2ce   :  { %v281_v5 = vpop.xlane.xlu1 %280 }
 0x2cf   :  { %1805 = vrcp.f32 %v281_v5 }
 0x2d9   :  { %v1806_v58 = vpop.eup %1805 }
 0x2da   :  { %v287_v18 = vrot.slane %v1806_v58, %v2055_v27  ;;  %v291_v39 = vrot.slane %v1806_v58, %v2084_v55  ;;  %v295_v0 = vrot.slane %v1806_v58, %v2063_v36  ;;  %v299_v7 = vrot.slane %v1806_v58, %v2072_v41 }
 0x2db   :  { %v303_v46 = vrot.slane %v1806_v58, %v2087_v57  ;;  %v307_v60 = vrot.slane %v1806_v58, %v2096_v63  ;;  %v311_v23 = vrot.slane %v1806_v58, %v2103_v28  ;;  %v315_v37 = vrot.slane %v1806_v58, %v2109_v31 }
 0x2dc   :  { %v324_v35 = vmul.f32 %v2113_v47, %v287_v18  ;;  %v325_v3 = vmul.f32 %v2125_v1, %v291_v39  ;;  %v326_v15 = vmul.f32 %v2118_v61, %v295_v0  ;;  %v327_v43 = vmul.f32 %v2122_v52, %v299_v7 }
 0x2dd   :  { %v328_v47 = vmul.f32 %v2127_v44, %v303_v46  ;;  %v329_v1 = vmul.f32 %v2131_v26, %v307_v60  ;;  %v330_v61 = vmul.f32 %v2134_v34, %v311_v23  ;;  %v331_v52 = vmul.f32 %v2137_v8, %v315_v37 }
 0x2de   :  { %334 = vperm.xlu0 %1740, %v324_v35  }
 0x2e2   :  { %339 = vperm.xlu0 %1740, %v325_v3  }
 0x2e6   :  { %344 = vperm.xlu0 %1740, %v326_v15  }
 0x2ea   :  { %349 = vperm.xlu0 %1740, %v327_v43  }
 0x2ee   :  { %354 = vperm.xlu0 %1740, %v328_v47  }
 0x2f2   :  { %359 = vperm.xlu0 %1740, %v329_v1  }
 0x2f6   :  { %364 = vperm.xlu0 %1740, %v330_v61  }
 0x2fa   :  { %369 = vperm.xlu0 %1740, %v331_v52  }
 0x31e   :  { %v708_v38 = vpop.xlane.xlu1 %707 }
 0x31f   :  { %1807 = vrcp.f32 %v708_v38 }
 0x329   :  { %v1808_v10 = vpop.eup %1807 }
 0x32a   :  { %v730_v44 = vrot.slane %v1808_v10, %v2087_v57  ;;  %v714_v14 = vrot.slane %v1808_v10, %v2055_v27  ;;  %v742_v13 = vrot.slane %v1808_v10, %v2109_v31  ;;  %v718_v34 = vrot.slane %v1808_v10, %v2084_v55 }
 0x32b   :  { %v722_v40 = vrot.slane %v1808_v10, %v2063_v36  ;;  %v734_v49 = vrot.slane %v1808_v10, %v2096_v63 }
 0x32c   :  { %v755_v26 = vmul.f32 %v2193_v11, %v730_v44  ;;  %v751_v62 = vmul.f32 %v2163_v54, %v714_v14  ;;  %v758_v8 = vmul.f32 %v2205_v2, %v742_v13  ;;  %v752_v51 = vmul.f32 %v2167_v12, %v718_v34  ;;  %v2427_v14 = vld [vmem:[%s2555_s2 + $0x2c] sm:$0xf] }
 0x32d   :  { %v753_v21 = vmul.f32 %v2181_v4, %v722_v40  ;;  %v726_v11 = vrot.slane %v1808_v10, %v2072_v41  ;;  %v756_v48 = vmul.f32 %v2191_v56, %v734_v49  ;;  %v738_v2 = vrot.slane %v1808_v10, %v2103_v28 }
 0x32e   :  { %781 = vperm.xlu1 %1739, %v755_v26   ;;  %761 = vperm.xlu0 %1740, %v751_v62  }
 0x32f   :  { %v754_v54 = vmul.f32 %v2178_v22, %v726_v11  ;;  %v757_v12 = vmul.f32 %v2203_v59, %v738_v2 }
 0x332   :  { %796 = vperm.xlu1 %1739, %v758_v8   ;;  %766 = vperm.xlu0 %1740, %v752_v51   ;;  %v2438_v8 = vld [vmem:[%s2555_s2 + $0x30] sm:$0xf] }
 0x336   :  { %771 = vperm.xlu0 %1740, %v753_v21  }
 0x33a   :  { %776 = vperm.xlu0 %1740, %v754_v54  }
 0x33e   :  { %786 = vperm.xlu0 %1740, %v756_v48  }
 0x342   :  { %791 = vperm.xlu0 %1740, %v757_v12  }
 0x343   :  { %v1128_v5 = vpop.xlane.xlu1 %1127 }
 0x344   :  { %1809 = vrcp.f32 %v1128_v5 }
 0x34e   :  { %v1810_v58 = vpop.eup %1809  ;;  %v1548_v4 = vpop.xlane.xlu0 %1547 }
 0x34f   :  { %v1134_v18 = vrot.slane %v1810_v58, %v2055_v27  ;;  %v1138_v35 = vrot.slane %v1810_v58, %v2084_v55  ;;  %1811 = vrcp.f32 %v1548_v4  ;;  %v1142_v56 = vrot.slane %v1810_v58, %v2063_v36 }
 0x350   :  { %v1146_v3 = vrot.slane %v1810_v58, %v2072_v41  ;;  %v1150_v15 = vrot.slane %v1810_v58, %v2087_v57  ;;  %v1154_v7 = vrot.slane %v1810_v58, %v2096_v63  ;;  %v1158_v43 = vrot.slane %v1810_v58, %v2103_v28 }
 0x351   :  { %v1171_v22 = vmul.f32 %v2213_v9, %v1134_v18  ;;  %v1172_v39 = vmul.f32 %v2219_v53, %v1138_v35  ;;  %v1173_v59 = vmul.f32 %v2228_v29, %v1142_v56  ;;  %v1162_v46 = vrot.slane %v1810_v58, %v2109_v31 }
 0x352   :  { %v1174_v0 = vmul.f32 %v2255_v45, %v1146_v3  ;;  %v1175_v9 = vmul.f32 %v2261_v17, %v1150_v15  ;;  %v1176_v53 = vmul.f32 %v2268_v16, %v1154_v7  ;;  %v1177_v29 = vmul.f32 %v2230_v19, %v1158_v43  ;;  %v2401_v19 = vld [vmem:[%s2555_s2 + $0x24] sm:$0xf] }
 0x353   :  { %1181 = vperm.xlu1 %1739, %v1171_v22   ;;  %1186 = vperm.xlu0 %1740, %v1172_v39   ;;  %v1178_v45 = vmul.f32 %v2237_v6, %v1162_v46  ;;  %v2452_v39 = vld [vmem:[%s2555_s2 + $0x38] sm:$0xf] }
 0x357   :  { %1191 = vperm.xlu1 %1739, %v1173_v59   ;;  %1196 = vperm.xlu0 %1740, %v1174_v0  }
 0x359   :  { %v1812_v47 = vpop.eup %1811 }
 0x35a   :  { %v1558_v60 = vrot.slane %v1812_v47, %v2084_v55  ;;  %v1554_v1 = vrot.slane %v1812_v47, %v2055_v27  ;;  %v1566_v61 = vrot.slane %v1812_v47, %v2072_v41  ;;  %v1562_v37 = vrot.slane %v1812_v47, %v2063_v36  ;;  %v2410_v36 = vld [vmem:[%s2555_s2 + $0x20] sm:$0xf]  ;;  %v2415_v41 = vld [vmem:[%s2555_s2 + $0x28] sm:$0xf] }
 0x35b   :  { %1201 = vperm.xlu1 %1739, %v1175_v9   ;;  %1206 = vperm.xlu0 %1740, %v1176_v53   ;;  %v1574_v27 = vrot.slane %v1812_v47, %v2096_v63  ;;  %v1578_v44 = vrot.slane %v1812_v47, %v2103_v28 }
 0x35c   :  { %v1592_v16 = vmul.f32 %v2246_v42, %v1558_v60  ;;  %v1591_v23 = vmul.f32 %v2239_v33, %v1554_v1  ;;  %v1594_v6 = vmul.f32 %v2265_v50, %v1566_v61  ;;  %v1593_v42 = vmul.f32 %v2221_v32, %v1562_v37 }
 0x35d   :  { %v335_v17 = vpop.permute.xlu0 %334  ;;  %v1570_v33 = vrot.slane %v1812_v47, %v2087_v57  ;;  %v1596_v50 = vmul.f32 %v2277_v25, %v1574_v27  ;;  %v1582_v32 = vrot.slane %v1812_v47, %v2109_v31  ;;  %v1597_v28 = vmul.f32 %v2285_v20, %v1578_v44  ;;  %v2459_v47 = vld [vmem:[%s2555_s2 + $0x3c] sm:$0xf] }
 0x35e   :  { %v372_v57 = vmul.f32 %v2410_v36, %v335_v17 }
 0x35f   :  { %1211 = vperm.xlu1 %1739, %v1177_v29   ;;  %1216 = vperm.xlu0 %1740, %v1178_v45   ;;  %v1595_v10 = vmul.f32 %v2272_v30, %v1570_v33  ;;  %v1598_v30 = vmul.f32 %v2248_v24, %v1582_v32  ;;  %v2445_v24 = vld [vmem:[%s2555_s2 + $0x34] sm:$0xf] }
 0x360   :  { %v380_v62 = vsel %vm48_vm0, %v372_v57, 0.0 }
 0x361   :  { %v340_v55 = vpop.permute.xlu0 %339  ;;  %v381_v21 = vrot.slane %v380_v62, 4 }
 0x362   :  { %v373_v52 = vmul.f32 %v2401_v19, %v340_v55 }
 0x363   :  { %1606 = vperm.xlu0 %1740, %v1592_v16   ;;  %1601 = vperm.xlu1 %1739, %v1591_v23   ;;  %v382_v12 = vadd.f32 %v381_v21, %v380_v62 }
 0x364   :  { %v387_v26 = vsel %vm48_vm0, %v373_v52, 0.0 }
 0x365   :  { %v345_v63 = vpop.permute.xlu0 %344  ;;  %v388_v34 = vrot.slane %v387_v26, 4  ;;  %v383_v59 = vrot.slane %v382_v12, 2 }
 0x366   :  { %v374_v38 = vmul.f32 %v2415_v41, %v345_v63 }
 0x367   :  { %1616 = vperm.xlu0 %1740, %v1594_v6   ;;  %1611 = vperm.xlu1 %1739, %v1593_v42   ;;  %v389_v48 = vadd.f32 %v388_v34, %v387_v26  ;;  %v384_v60 = vadd.f32 %v383_v59, %v382_v12 }
 0x368   :  { %v394_v25 = vsel %vm48_vm0, %v374_v38, 0.0 }
 0x369   :  { %v350_v31 = vpop.permute.xlu0 %349  ;;  %v395_v51 = vrot.slane %v394_v25, 4  ;;  %v390_v35 = vrot.slane %v389_v48, 2  ;;  %v385_v52 = vrot.slane %v384_v60, 1 }
 0x36a   :  { %v375_v13 = vmul.f32 %v2427_v14, %v350_v31 }
 0x36b   :  { %1626 = vperm.xlu0 %1740, %v1596_v50   ;;  %1621 = vperm.xlu1 %1739, %v1595_v10   ;;  %v396_v20 = vadd.f32 %v395_v51, %v394_v25  ;;  %v391_v43 = vadd.f32 %v390_v35, %v389_v48  ;;  %v386_v31 = vadd.f32 %v385_v52, %v384_v60 }
 0x36c   :  { %v401_v40 = vsel %vm48_vm0, %v375_v13, 0.0 }
 0x36d   :  { %v402_v11 = vrot.slane %v401_v40, 4  ;;  %v355_v54 = vpop.permute.xlu0 %354  ;;  %v397_v56 = vrot.slane %v396_v20, 2  ;;  %v392_v55 = vrot.slane %v391_v43, 1 }
 0x36e   :  { %v376_v49 = vmul.f32 %v2438_v8, %v355_v54 }
 0x36f   :  { %1636 = vperm.xlu0 %1740, %v1598_v30   ;;  %1631 = vperm.xlu1 %1739, %v1597_v28   ;;  %v403_v5 = vadd.f32 %v402_v11, %v401_v40  ;;  %v398_v29 = vadd.f32 %v397_v56, %v396_v20  ;;  %v393_v38 = vadd.f32 %v392_v55, %v391_v43 }
 0x370   :  { %v408_v2 = vsel %vm48_vm0, %v376_v49, 0.0 }
 0x371   :  { %v409_v58 = vrot.slane %v408_v2, 4  ;;  %v360_v4 = vpop.permute.xlu0 %359  ;;  %v404_v0 = vrot.slane %v403_v5, 2  ;;  %v399_v42 = vrot.slane %v398_v29, 1  ;;  %v444_v34 = vsel %vm123_vm1, %v393_v38, %v386_v31 }
 0x372   :  { %v377_v18 = vmul.f32 %v2445_v24, %v360_v4 }
 0x373   :  { %v410_v22 = vadd.f32 %v409_v58, %v408_v2  ;;  %v405_v1 = vadd.f32 %v404_v0, %v403_v5  ;;  %v400_v25 = vadd.f32 %v399_v42, %v398_v29 }
 0x374   :  { %v415_v3 = vsel %vm48_vm0, %v377_v18, 0.0 }
 0x375   :  { %v416_v15 = vrot.slane %v415_v3, 4  ;;  %v365_v7 = vpop.permute.xlu0 %364  ;;  %v411_v9 = vrot.slane %v410_v22, 2  ;;  %v406_v63 = vrot.slane %v405_v1, 1  ;;  %v445_v21 = vsel %vm125_vm2, %v400_v25, %v444_v34 }
 0x376   :  { %v378_v53 = vmul.f32 %v2452_v39, %v365_v7 }
 0x377   :  { %v417_v46 = vadd.f32 %v416_v15, %v415_v3  ;;  %v412_v61 = vadd.f32 %v411_v9, %v410_v22  ;;  %v407_v62 = vadd.f32 %v406_v63, %v405_v1 }
 0x378   :  { %v422_v45 = vsel %vm48_vm0, %v378_v53, 0.0 }
 0x379   :  { %v418_v17 = vrot.slane %v417_v46, 2  ;;  %v423_v16 = vrot.slane %v422_v45, 4  ;;  %v370_v23 = vpop.permute.xlu0 %369  ;;  %v413_v57 = vrot.slane %v412_v61, 1  ;;  %v446_v54 = vsel %vm127_vm3, %v407_v62, %v445_v21 }
 0x37a   :  { %v379_v37 = vmul.f32 %v2459_v47, %v370_v23 }
 0x37b   :  { %v419_v27 = vadd.f32 %v418_v17, %v417_v46  ;;  %v424_v6 = vadd.f32 %v423_v16, %v422_v45  ;;  %v414_v28 = vadd.f32 %v413_v57, %v412_v61 }
 0x37c   :  { %v429_v33 = vsel %vm48_vm0, %v379_v37, 0.0 }
 0x37d   :  { %v425_v50 = vrot.slane %v424_v6, 2  ;;  %v430_v32 = vrot.slane %v429_v33, 4  ;;  %v420_v10 = vrot.slane %v419_v27, 1  ;;  %v447_v48 = vsel %vm129_vm4, %v414_v28, %v446_v54 }
 0x37f   :  { %v426_v44 = vadd.f32 %v425_v50, %v424_v6  ;;  %v431_v26 = vadd.f32 %v430_v32, %v429_v33  ;;  %v421_v51 = vadd.f32 %v420_v10, %v419_v27 }
 0x381   :  { %v427_v13 = vrot.slane %v426_v44, 1  ;;  %v432_v30 = vrot.slane %v431_v26, 2  ;;  %v448_v20 = vsel %vm131_vm5, %v421_v51, %v447_v48 }
 0x383   :  { %v433_v40 = vadd.f32 %v432_v30, %v431_v26  ;;  %v428_v11 = vadd.f32 %v427_v13, %v426_v44 }
 0x385   :  { %v434_v49 = vrot.slane %v433_v40, 1  ;;  %v449_v12 = vsel %vm133_vm6, %v428_v11, %v448_v20 }
 0x387   :  { %v435_v2 = vadd.f32 %v434_v49, %v433_v40 }
 0x389   :  { %v450_v5 = vsel %vm135_vm7, %v435_v2, %v449_v12 }
 0x38a   :  { %453 = vst.msk [vmem:[%s2556_s3] sm:$0xff] %vm452_vm9, %v450_v5 }
 0x3ad   :  { %v782_v58 = vpop.permute.xlu1 %781  ;;  %v762_v4 = vpop.permute.xlu0 %761 }
 0x3ae   :  { %v799_v18 = vmul.f32 %v2410_v36, %v762_v4  ;;  %v803_v56 = vmul.f32 %v2438_v8, %v782_v58 }
 0x3b0   :  { %v808_v35 = vsel %vm807_vm10, %v799_v18, 0.0  ;;  %v836_v43 = vsel %vm807_vm10, %v803_v56, 0.0 }
 0x3b1   :  { %v767_v22 = vpop.permute.xlu0 %766  ;;  %v797_v3 = vpop.permute.xlu1 %796  ;;  %v809_v0 = vrot.slane %v808_v35, 4  ;;  %v837_v1 = vrot.slane %v836_v43, 4 }
 0x3b2   :  { %v800_v59 = vmul.f32 %v2401_v19, %v767_v22  ;;  %v806_v7 = vmul.f32 %v2459_v47, %v797_v3 }
 0x3b3   :  { %v810_v45 = vadd.f32 %v809_v0, %v808_v35  ;;  %v838_v33 = vadd.f32 %v837_v1, %v836_v43 }
 0x3b4   :  { %v815_v15 = vsel %vm807_vm10, %v800_v59, 0.0  ;;  %v857_v17 = vsel %vm807_vm10, %v806_v7, 0.0 }
 0x3b5   :  { %v816_v9 = vrot.slane %v815_v15, 4  ;;  %v772_v53 = vpop.permute.xlu0 %771  ;;  %v811_v55 = vrot.slane %v810_v45, 2  ;;  %v858_v27 = vrot.slane %v857_v17, 4  ;;  %v839_v31 = vrot.slane %v838_v33, 2 }
 0x3b6   :  { %v801_v46 = vmul.f32 %v2415_v41, %v772_v53 }
 0x3b7   :  { %v817_v29 = vadd.f32 %v816_v9, %v815_v15  ;;  %v812_v10 = vadd.f32 %v811_v55, %v810_v45  ;;  %v859_v44 = vadd.f32 %v858_v27, %v857_v17  ;;  %v840_v48 = vadd.f32 %v839_v31, %v838_v33 }
 0x3b8   :  { %v822_v60 = vsel %vm807_vm10, %v801_v46, 0.0 }
 0x3b9   :  { %v777_v16 = vpop.permute.xlu0 %776  ;;  %v818_v23 = vrot.slane %v817_v29, 2  ;;  %v823_v61 = vrot.slane %v822_v60, 4  ;;  %v813_v11 = vrot.slane %v812_v10, 1  ;;  %v860_v54 = vrot.slane %v859_v44, 2 }
 0x3ba   :  { %v802_v37 = vmul.f32 %v2427_v14, %v777_v16  ;;  %v841_v3 = vrot.slane %v840_v48, 1 }
 0x3bb   :  { %v824_v6 = vadd.f32 %v823_v61, %v822_v60  ;;  %v819_v50 = vadd.f32 %v818_v23, %v817_v29  ;;  %v814_v35 = vadd.f32 %v813_v11, %v812_v10  ;;  %v861_v22 = vadd.f32 %v860_v54, %v859_v44 }
 0x3bc   :  { %v829_v42 = vsel %vm807_vm10, %v802_v37, 0.0  ;;  %v842_v29 = vadd.f32 %v841_v3, %v840_v48 }
 0x3bd   :  { %v830_v52 = vrot.slane %v829_v42, 4  ;;  %v787_v63 = vpop.permute.xlu0 %786  ;;  %v825_v32 = vrot.slane %v824_v6, 2  ;;  %v820_v28 = vrot.slane %v819_v50, 1  ;;  %v862_v53 = vrot.slane %v861_v22, 1 }
 0x3be   :  { %v804_v57 = vmul.f32 %v2445_v24, %v787_v63 }
 0x3bf   :  { %v831_v38 = vadd.f32 %v830_v52, %v829_v42  ;;  %v826_v26 = vadd.f32 %v825_v32, %v824_v6  ;;  %v821_v5 = vadd.f32 %v820_v28, %v819_v50  ;;  %v863_v17 = vadd.f32 %v862_v53, %v861_v22 }
 0x3c0   :  { %v843_v25 = vsel %vm807_vm10, %v804_v57, 0.0 }
 0x3c1   :  { %v832_v62 = vrot.slane %v831_v38, 2  ;;  %v844_v13 = vrot.slane %v843_v25, 4  ;;  %v792_v30 = vpop.permute.xlu0 %791  ;;  %v827_v51 = vrot.slane %v826_v26, 1  ;;  %v872_v15 = vsel %vm123_vm1, %v821_v5, %v814_v35 }
 0x3c2   :  { %v805_v34 = vmul.f32 %v2452_v39, %v792_v30 }
 0x3c3   :  { %v833_v40 = vadd.f32 %v832_v62, %v831_v38  ;;  %v845_v21 = vadd.f32 %v844_v13, %v843_v25  ;;  %v828_v58 = vadd.f32 %v827_v51, %v826_v26 }
 0x3c4   :  { %v850_v49 = vsel %vm807_vm10, %v805_v34, 0.0 }
 0x3c5   :  { %v834_v20 = vrot.slane %v833_v40, 1  ;;  %v846_v2 = vrot.slane %v845_v21, 2  ;;  %v851_v12 = vrot.slane %v850_v49, 4  ;;  %v873_v7 = vsel %vm125_vm2, %v828_v58, %v872_v15 }
 0x3c7   :  { %v847_v4 = vadd.f32 %v846_v2, %v845_v21  ;;  %v852_v18 = vadd.f32 %v851_v12, %v850_v49  ;;  %v835_v56 = vadd.f32 %v834_v20, %v833_v40 }
 0x3c9   :  { %v848_v59 = vrot.slane %v847_v4, 1  ;;  %v853_v0 = vrot.slane %v852_v18, 2  ;;  %v874_v43 = vsel %vm127_vm3, %v835_v56, %v873_v7 }
 0x3ca   :  { %v875_v60 = vsel %vm129_vm4, %v842_v29, %v874_v43 }
 0x3cb   :  { %v854_v9 = vadd.f32 %v853_v0, %v852_v18  ;;  %v849_v46 = vadd.f32 %v848_v59, %v847_v4 }
 0x3cd   :  { %v855_v45 = vrot.slane %v854_v9, 1  ;;  %v876_v16 = vsel %vm131_vm5, %v849_v46, %v875_v60 }
 0x3cf   :  { %v856_v1 = vadd.f32 %v855_v45, %v854_v9 }
 0x3d1   :  { %v877_v23 = vsel %vm133_vm6, %v856_v1, %v876_v16 }
 0x3d2   :  { %v878_v61 = vsel %vm135_vm7, %v863_v17, %v877_v23  ;;  %v1182_v37 = vpop.permute.xlu1 %1181  ;;  %v1187_v55 = vpop.permute.xlu0 %1186 }
 0x3d3   :  { %881 = vst.msk [vmem:[%s2556_s3] sm:$0xff] %vm880_vm11, %v878_v61  ;;  %v1219_v27 = vmul.f32 %v2410_v36, %v1182_v37  ;;  %v1220_v6 = vmul.f32 %v2401_v19, %v1187_v55 }
 0x3d5   :  { %v1228_v42 = vsel %vm1227_vm12, %v1219_v27, 0.0  ;;  %v1235_v33 = vsel %vm1227_vm12, %v1220_v6, 0.0 }
 0x3d6   :  { %v1229_v52 = vrot.slane %v1228_v42, 4  ;;  %v1236_v63 = vrot.slane %v1235_v33, 4  ;;  %v1192_v50 = vpop.permute.xlu1 %1191  ;;  %v1197_v32 = vpop.permute.xlu0 %1196 }
 0x3d7   :  { %v1221_v57 = vmul.f32 %v2415_v41, %v1192_v50  ;;  %v1222_v38 = vmul.f32 %v2427_v14, %v1197_v32 }
 0x3d8   :  { %v1230_v10 = vadd.f32 %v1229_v52, %v1228_v42  ;;  %v1237_v44 = vadd.f32 %v1236_v63, %v1235_v33 }
 0x3d9   :  { %v1242_v26 = vsel %vm1227_vm12, %v1221_v57, 0.0  ;;  %v1249_v25 = vsel %vm1227_vm12, %v1222_v38, 0.0 }
 0x3da   :  { %v1231_v31 = vrot.slane %v1230_v10, 2  ;;  %v1238_v62 = vrot.slane %v1237_v44, 2  ;;  %v1243_v13 = vrot.slane %v1242_v26, 4  ;;  %v1250_v30 = vrot.slane %v1249_v25, 4  ;;  %v1202_v28 = vpop.permute.xlu1 %1201  ;;  %v1207_v34 = vpop.permute.xlu0 %1206 }
 0x3db   :  { %v1223_v51 = vmul.f32 %v2438_v8, %v1202_v28  ;;  %v1224_v40 = vmul.f32 %v2445_v24, %v1207_v34 }
 0x3dc   :  { %v1232_v21 = vadd.f32 %v1231_v31, %v1230_v10  ;;  %v1239_v11 = vadd.f32 %v1238_v62, %v1237_v44  ;;  %v1244_v54 = vadd.f32 %v1243_v13, %v1242_v26  ;;  %v1251_v49 = vadd.f32 %v1250_v30, %v1249_v25 }
 0x3dd   :  { %v1256_v48 = vsel %vm1227_vm12, %v1223_v51, 0.0  ;;  %v1263_v20 = vsel %vm1227_vm12, %v1224_v40, 0.0 }
 0x3de   :  { %v1233_v2 = vrot.slane %v1232_v21, 1  ;;  %v1240_v12 = vrot.slane %v1239_v11, 1  ;;  %v1245_v5 = vrot.slane %v1244_v54, 2  ;;  %v1252_v58 = vrot.slane %v1251_v49, 2  ;;  %v1212_v4 = vpop.permute.xlu1 %1211  ;;  %v1217_v18 = vpop.permute.xlu0 %1216 }
 0x3df   :  { %v1257_v35 = vrot.slane %v1256_v48, 4  ;;  %v1264_v22 = vrot.slane %v1263_v20, 4  ;;  %v1225_v56 = vmul.f32 %v2452_v39, %v1212_v4  ;;  %v1226_v3 = vmul.f32 %v2459_v47, %v1217_v18 }
 0x3e0   :  { %v1234_v59 = vadd.f32 %v1233_v2, %v1232_v21  ;;  %v1241_v0 = vadd.f32 %v1240_v12, %v1239_v11  ;;  %v1246_v15 = vadd.f32 %v1245_v5, %v1244_v54  ;;  %v1253_v7 = vadd.f32 %v1252_v58, %v1251_v49 }
 0x3e1   :  { %v1258_v9 = vadd.f32 %v1257_v35, %v1256_v48  ;;  %v1265_v53 = vadd.f32 %v1264_v22, %v1263_v20  ;;  %v1270_v43 = vsel %vm1227_vm12, %v1225_v56, 0.0  ;;  %v1277_v46 = vsel %vm1227_vm12, %v1226_v3, 0.0 }
 0x3e2   :  { %v1292_v29 = vsel %vm123_vm1, %v1241_v0, %v1234_v59  ;;  %v1247_v45 = vrot.slane %v1246_v15, 1  ;;  %v1254_v60 = vrot.slane %v1253_v7, 1  ;;  %v1271_v1 = vrot.slane %v1270_v43, 4  ;;  %v1602_v17 = vpop.permute.xlu1 %1601  ;;  %v1607_v16 = vpop.permute.xlu0 %1606 }
 0x3e3   :  { %v1259_v23 = vrot.slane %v1258_v9, 2  ;;  %v1266_v61 = vrot.slane %v1265_v53, 2  ;;  %v1278_v37 = vrot.slane %v1277_v46, 4  ;;  %v1639_v55 = vmul.f32 %v2410_v36, %v1602_v17 }
 0x3e4   :  { %v1248_v27 = vadd.f32 %v1247_v45, %v1246_v15  ;;  %v1255_v6 = vadd.f32 %v1254_v60, %v1253_v7  ;;  %v1272_v42 = vadd.f32 %v1271_v1, %v1270_v43  ;;  %v1640_v33 = vmul.f32 %v2401_v19, %v1607_v16 }
 0x3e5   :  { %v1260_v52 = vadd.f32 %v1259_v23, %v1258_v9  ;;  %v1267_v63 = vadd.f32 %v1266_v61, %v1265_v53  ;;  %v1279_v50 = vadd.f32 %v1278_v37, %v1277_v46  ;;  %v1648_v32 = vsel %vm1647_vm13, %v1639_v55, 0.0 }
 0x3e6   :  { %v1293_v57 = vsel %vm125_vm2, %v1248_v27, %v1292_v29  ;;  %v1273_v38 = vrot.slane %v1272_v42, 2  ;;  %v1649_v10 = vrot.slane %v1648_v32, 4  ;;  %v1655_v44 = vsel %vm1647_vm13, %v1640_v33, 0.0  ;;  %v1612_v26 = vpop.permute.xlu1 %1611  ;;  %v1617_v25 = vpop.permute.xlu0 %1616 }
 0x3e7   :  { %v1294_v36 = vsel %vm127_vm3, %v1255_v6, %v1293_v57  ;;  %v1261_v31 = vrot.slane %v1260_v52, 1  ;;  %v1268_v62 = vrot.slane %v1267_v63, 1  ;;  %v1280_v13 = vrot.slane %v1279_v50, 2 }
 0x3e8   :  { %v1274_v19 = vadd.f32 %v1273_v38, %v1272_v42  ;;  %v1650_v30 = vadd.f32 %v1649_v10, %v1648_v32  ;;  %v1656_v28 = vrot.slane %v1655_v44, 4  ;;  %v1641_v34 = vmul.f32 %v2415_v41, %v1612_v26 }
 0x3e9   :  { %v1262_v51 = vadd.f32 %v1261_v31, %v1260_v52  ;;  %v1269_v40 = vadd.f32 %v1268_v62, %v1267_v63  ;;  %v1281_v21 = vadd.f32 %v1280_v13, %v1279_v50  ;;  %v1642_v11 = vmul.f32 %v2427_v14, %v1617_v25 }
 0x3ea   :  { %v1275_v54 = vrot.slane %v1274_v19, 1  ;;  %v1651_v49 = vrot.slane %v1650_v30, 2  ;;  %v1657_v48 = vadd.f32 %v1656_v28, %v1655_v44  ;;  %v1662_v20 = vsel %vm1647_vm13, %v1641_v34, 0.0  ;;  %v1622_v2 = vpop.permute.xlu1 %1621  ;;  %v1627_v12 = vpop.permute.xlu0 %1626 }
 0x3eb   :  { %v1295_v5 = vsel %vm129_vm4, %v1262_v51, %v1294_v36  ;;  %v1282_v58 = vrot.slane %v1281_v21, 1  ;;  %v1663_v4 = vrot.slane %v1662_v20, 4  ;;  %v1669_v18 = vsel %vm1647_vm13, %v1642_v11, 0.0 }
 0x3ec   :  { %v1296_v41 = vsel %vm131_vm5, %v1269_v40, %v1295_v5  ;;  %v1276_v35 = vadd.f32 %v1275_v54, %v1274_v19  ;;  %v1652_v22 = vadd.f32 %v1651_v49, %v1650_v30  ;;  %v1658_v56 = vrot.slane %v1657_v48, 2 }
 0x3ed   :  { %v1283_v3 = vadd.f32 %v1282_v58, %v1281_v21  ;;  %v1664_v14 = vadd.f32 %v1663_v4, %v1662_v20  ;;  %v1670_v59 = vrot.slane %v1669_v18, 4  ;;  %v1643_v0 = vmul.f32 %v2438_v8, %v1622_v2 }
 0x3ee   :  { %v1297_v15 = vsel %vm133_vm6, %v1276_v35, %v1296_v41  ;;  %v1653_v7 = vrot.slane %v1652_v22, 1  ;;  %v1659_v9 = vadd.f32 %v1658_v56, %v1657_v48  ;;  %v1644_v53 = vmul.f32 %v2445_v24, %v1627_v12  ;;  %v1632_v43 = vpop.permute.xlu1 %1631  ;;  %v1637_v1 = vpop.permute.xlu0 %1636 }
 0x3ef   :  { %v1298_v46 = vsel %vm135_vm7, %v1283_v3, %v1297_v15  ;;  %v1665_v29 = vrot.slane %v1664_v14, 2  ;;  %v1671_v45 = vadd.f32 %v1670_v59, %v1669_v18  ;;  %v1676_v60 = vsel %vm1647_vm13, %v1643_v0, 0.0 }
 0x3f0   :  { %1301 = vst.msk [vmem:[%s2556_s3] sm:$0xff] %vm1300_vm14, %v1298_v46  ;;  %v1660_v8 = vrot.slane %v1659_v9, 1  ;;  %v1677_v17 = vrot.slane %v1676_v60, 4  ;;  %v1683_v16 = vsel %vm1647_vm13, %v1644_v53, 0.0  ;;  %v1645_v37 = vmul.f32 %v2452_v39, %v1632_v43 }
 0x3f1   :  { %v1666_v23 = vadd.f32 %v1665_v29, %v1664_v14  ;;  %v1672_v61 = vrot.slane %v1671_v45, 2  ;;  %v1684_v24 = vrot.slane %v1683_v16, 4  ;;  %v1654_v55 = vadd.f32 %v1653_v7, %v1652_v22 }
 0x3f2   :  { %v1661_v27 = vadd.f32 %v1660_v8, %v1659_v9  ;;  %v1678_v6 = vadd.f32 %v1677_v17, %v1676_v60  ;;  %v1646_v42 = vmul.f32 %v2459_v47, %v1637_v1  ;;  %v1690_v50 = vsel %vm1647_vm13, %v1645_v37, 0.0 }
 0x3f3   :  { %v1667_v33 = vrot.slane %v1666_v23, 1  ;;  %v1673_v52 = vadd.f32 %v1672_v61, %v1671_v45  ;;  %v1685_v63 = vadd.f32 %v1684_v24, %v1683_v16  ;;  %v1691_v57 = vrot.slane %v1690_v50, 4 }
 0x3f4   :  { %v1679_v32 = vrot.slane %v1678_v6, 2  ;;  %v1697_v38 = vsel %vm1647_vm13, %v1646_v42, 0.0  ;;  %v1712_v31 = vsel %vm123_vm1, %v1661_v27, %v1654_v55 }
 0x3f5   :  { %v1668_v10 = vadd.f32 %v1667_v33, %v1666_v23  ;;  %v1674_v44 = vrot.slane %v1673_v52, 1  ;;  %v1686_v26 = vrot.slane %v1685_v63, 2  ;;  %v1698_v25 = vrot.slane %v1697_v38, 4 }
 0x3f6   :  { %v1680_v36 = vadd.f32 %v1679_v32, %v1678_v6  ;;  %v1692_v39 = vadd.f32 %v1691_v57, %v1690_v50 }
 0x3f7   :  { %v1675_v62 = vadd.f32 %v1674_v44, %v1673_v52  ;;  %v1687_v13 = vadd.f32 %v1686_v26, %v1685_v63  ;;  %v1699_v47 = vadd.f32 %v1698_v25, %v1697_v38  ;;  %v1713_v19 = vsel %vm125_vm2, %v1668_v10, %v1712_v31 }
 0x3f8   :  { %v1681_v30 = vrot.slane %v1680_v36, 1  ;;  %v1693_v28 = vrot.slane %v1692_v39, 2 }
 0x3f9   :  { %v1688_v34 = vrot.slane %v1687_v13, 1  ;;  %v1700_v51 = vrot.slane %v1699_v47, 2  ;;  %v1714_v11 = vsel %vm127_vm3, %v1675_v62, %v1713_v19 }
 0x3fa   :  { %v1682_v40 = vadd.f32 %v1681_v30, %v1680_v36  ;;  %v1694_v21 = vadd.f32 %v1693_v28, %v1692_v39 }
 0x3fb   :  { %v1689_v54 = vadd.f32 %v1688_v34, %v1687_v13  ;;  %v1701_v49 = vadd.f32 %v1700_v51, %v1699_v47 }
 0x3fc   :  { %v1715_v48 = vsel %vm129_vm4, %v1682_v40, %v1714_v11  ;;  %v1695_v20 = vrot.slane %v1694_v21, 1 }
 0x3fd   :  { %v1702_v2 = vrot.slane %v1701_v49, 1  ;;  %v1716_v5 = vsel %vm131_vm5, %v1689_v54, %v1715_v48 }
 0x3fe   :  { %v1696_v12 = vadd.f32 %v1695_v20, %v1694_v21 }
 0x3ff   :  { %v1703_v58 = vadd.f32 %v1702_v2, %v1701_v49 }
 0x400   :  { %v1717_v4 = vsel %vm133_vm6, %v1696_v12, %v1716_v5 }
 0x401   :  { %v1718_v18 = vsel %vm135_vm7, %v1703_v58, %v1717_v4 }
 0x402   :  { %1721 = vst.msk [vmem:[%s2556_s3] sm:$0xff] %vm1720_vm15, %v1718_v18 }

// kernel: vit_forward.23
= control target key start
LH: loop header
LB: loop body
LE: loop exit
PB: predicated region body
PF: predicated region fallthrough
CT: control target
= control target key end

     0   :  { %vm18_vm0 = vcmask 254976   ;;  %vm27_vm1 = vcmask 1040384   ;;  %v133_v0 = vmov 0.0   ;;  %vm134_vm2 = vmmov 0   ;;  %s170_s1 = inlined_call_operand.vmem [shape: f32[1,32], index: 1, kind: input, shape index: {}]   ;;  %s171_s0 = inlined_call_operand.vmem [shape: f32[2,1], index: 0, kind: input, shape index: {}]   ;;  %s172_s2 = inlined_call_operand.vmem [shape: f32[1,32], index: 2, kind: input, shape index: {}]   ;;  %s173_s3 = inlined_call_operand.vmem [shape: f32[2,32], index: 3, kind: output, shape index: {}]  }
   0x1   :  { %19 = vst.msk [vmem:[#allocation2] sm:$0x3] %vm18_vm0, %v133_v0  ;;  %126 = vmatprep.subr.mxu0 %v133_v0  ;;  %v22_v1 = vld [vmem:[%s170_s1] sm:$0x1]  ;;  %128 = vmatprep.mubr.msk.f32.mxu0 %vm134_vm2, %v133_v0  ;;  %vm23_vm3 = vcmask 7168  }
   0x2   :  { %v20_v2 = vld [vmem:[%s171_s0] sm:$0x3]  ;;  %127 = vmatpush3.msk.msra.mxu0 %vm27_vm1, %v22_v1 }
   0x3   :  { %129 = vmatmul.mubr.msk.f32.vlgmr.msra.gmra.mrb[0].mxu0 %vm23_vm3, %v20_v2  ;;  %v123_v7 = vld [vmem:[%s172_s2] ss:$0 sm:$0xff] }
   0x8   :  { %v21_v3 = vld [vmem:[#allocation2] sm:$0x3] }
  0xd6   :  { %v97_v4 = vpop.f32.mrb[0].mxu0 }
  0xd7   :  { %v101_v5 = vadd.f32 %v97_v4, %v21_v3  ;;  %v130_v6 = vpop.f32.mrb[1].mxu0 }
  0xd9   :  { %103 = vst.msk [vmem:[#allocation2] sm:$0x3] %vm18_vm0, %v101_v5 }
  0xe0   :  { %v107_v8 = vld [vmem:[#allocation2] sm:$0x3] }
  0xe1   :  { %v115_v9 = vadd.f32 %v123_v7, %v107_v8 }
  0xe3   :  { %116 = vst.msk [vmem:[%s173_s3] sm:$0x3] %vm18_vm0, %v115_v9 }

// kernel: vit_forward.24
= control target key start
LH: loop header
LB: loop body
LE: loop exit
PB: predicated region body
PF: predicated region fallthrough
CT: control target
= control target key end

     0   :  { %vm21_vm0 = vcmask 261120   ;;  %v151_v0 = vmov 0.0|0.0   ;;  %v152_v4 = vmov 0.0   ;;  %vm153_vm1 = vmmov 0   ;;  %s207_s1 = inlined_call_operand.vmem [shape: f32[32,32], index: 1, kind: input, shape index: {}]   ;;  %s208_s0 = inlined_call_operand.vmem [shape: f32[8,32], index: 0, kind: input, shape index: {}]   ;;  %s209_s2 = inlined_call_operand.vmem [shape: f32[1,32], index: 2, kind: input, shape index: {}]   ;;  %s210_s3 = inlined_call_operand.vmem [shape: f32[8,32], index: 3, kind: input, shape index: {}]   ;;  %s211_s4 = inlined_call_operand.vmem [shape: f32[8,32], index: 4, kind: output, shape index: {}]  }
   0x1   :  { %142 = vmatprep.subr.bf16.mxu0 %v151_v0  ;;  %v25_v1 = vld [vmem:[%s207_s1] sm:$0xff]  ;;  %v26_v2 = vld [vmem:[%s207_s1 + $0x8] sm:$0xff]  ;;  %v27_v3 = vld [vmem:[%s207_s1 + $0x10] sm:$0xff]  ;;  %22 = vst.msk [vmem:[#allocation2] sm:$0xff] %vm21_vm0, %v152_v4  ;;  %139 = vmatprep.mubr.msk.f32.mxu0 %vm153_vm1, %v152_v4 }
   0x2   :  { %v143_v5 = vpack.c.bf16 %v26_v2, %v25_v1  ;;  %v28_v6 = vld [vmem:[%s207_s1 + $0x18] sm:$0xff]  ;;  %v23_v8 = vld [vmem:[%s208_s0] sm:$0xff] }
   0x3   :  { %v146_v7 = vpack.c.bf16 %v28_v6, %v27_v3  ;;  %v125_v13 = vld [vmem:[%s209_s2] ss:$0 sm:$0xff] }
   0x4   :  { %144 = vmatpush3.bf16.msra.mxu0 %v143_v5  ;;  %v117_v15 = vld [vmem:[%s210_s3] sm:$0xff] }
   0x5   :  { %145 = vmatprep.subr.bf16.mxu0 %v151_v0 }
   0x8   :  { %147 = vmatpush3.bf16.msra.mxu0 %v146_v7  ;;  %v24_v9 = vld [vmem:[#allocation2] sm:$0xff] }
   0xb   :  { %140 = vmatmul.mubr.msk.f32.vlgmr.msra.gmra.mrb[0].mxu0 %vm21_vm0, %v23_v8 }
  0xde   :  { %v99_v10 = vpop.f32.mrb[0].mxu0 }
  0xdf   :  { %v103_v11 = vadd.f32 %v99_v10, %v24_v9  ;;  %v141_v12 = vpop.f32.mrb[1].mxu0 }
  0xe1   :  { %104 = vst.msk [vmem:[#allocation2] sm:$0xff] %vm21_vm0, %v103_v11 }
  0xe8   :  { %v108_v14 = vld [vmem:[#allocation2] sm:$0xff] }
  0xe9   :  { %v116_v16 = vadd.f32 %v125_v13, %v108_v14 }
  0xeb   :  { %v118_v17 = vadd.f32 %v117_v15, %v116_v16 }
  0xed   :  { %119 = vst.msk [vmem:[%s211_s4] sm:$0xff] %vm21_vm0, %v118_v17 }

// kernel: vit_forward.25
= control target key start
LH: loop header
LB: loop body
LE: loop exit
PB: predicated region body
PF: predicated region fallthrough
CT: control target
= control target key end

     0   :  { %s670_s18 = smov 0   ;;  %s672_s19 = smov 0   ;;  %s719_s0 = inlined_call_operand.vmem [shape: f32[8,32], index: 0, kind: input, shape index: {}]   ;;  %s720_s1 = inlined_call_operand.vmem [shape: f32[1,32], index: 1, kind: input, shape index: {}]   ;;  %s721_s2 = inlined_call_operand.vmem [shape: f32[1,32], index: 2, kind: input, shape index: {}]   ;;  %s722_s3 = inlined_call_operand.vmem [shape: f32[3,32,32], index: 3, kind: input, shape index: {}]   ;;  %s723_s4 = inlined_call_operand.vmem [shape: f32[3,1,32], index: 4, kind: input, shape index: {}]   ;;  %s724_s5 = inlined_call_operand.vmem [shape: f32[3,8,32], index: 5, kind: output, shape index: {}]  }
   0x1   :  { %s674_s20 = smov 0  }
   0x2 LB: > { %s30_s21 = sadd.s32 1, %s631_s19  ;;  %p551_p0 = scmp.ge.s32.totalorder %s635_s20, 1  ;;  %s635_s20 = sphi %s674_s20, %s15_s20   ;;  %s631_s19 = sphi %s672_s19, %s726_s19   ;;  %s627_s18 = sphi %s670_s18, %s725_s18  }
   0x3   : > { %p32_p1 = scmp.ge.s32.totalorder %s30_s21, 3  ;;  %p237_p2 = scmp.lt.s32.totalorder %s635_s20, 4 }
   0x5   : > { %s728_s21 = smov (%p32_p1, %s30_s21), 0  ;;  %p238_p3 = pnand %p551_p0, %p237_p2 }
   0x6   : > { %v311_v0 = vld [vmem:[%s719_s0] sm:$0xff] (!%p238_p3)  ;;  %vm314_vm0 = vcmask (!%p238_p3), 261120   ;;  %p287_p4 = scmp.lt.s32.totalorder (!%p238_p3), %s627_s18, 2  ;;  %v637_v7 = vmov (!%p238_p3), 0.0|0.0   ;;  %vm638_vm1 = vmmov (!%p238_p3), 0   ;;  %v639_v8 = vmov (!%p238_p3), 0.0  }
   0x7   : > { %241 = sbr.rel (%p238_p3) target bundleno = 535 (0x217), region = 40  ;;  %v315_v1 = vsel (!%p238_p3), %vm314_vm0, %v311_v0, 0.0  ;;  %578 = vmatprep.subr.bf16.mxu0 (!%p238_p3), %v637_v7  ;;  %575 = vmatprep.mubr.msk.f32.mxu0 (!%p238_p3), %vm638_vm1, %v639_v8  ;;  %v555_v19 = vld [vmem:[%s720_s1] ss:$0 sm:$0xff] (!%p238_p3) }
   0x8   : > { %316 = vadd.xlane.f32.xlu0 (!%p238_p3), %v315_v1  ;;  %v556_v21 = vld [vmem:[%s721_s2] ss:$0 sm:$0xff] (!%p238_p3) }
   0xe   : > { %s730_s18 = smov (!%p287_p4, %s627_s18), 2 }
   0xf   : > { %s561_s24 = sshll.u32 %s730_s18, 5  ;;  %s300_s9 = scalar_lea.vmem %s723_s4, %s730_s18 }
  0x10   : > { %s294_s27 = scalar_lea.vmem %s722_s3, %s561_s24  ;;  %s554_s10 = sshll.u32 %s730_s18, 3  ;;  %v557_v24 = vld [vmem:[%s300_s9] ss:$0 sm:$0xff] }
  0x11   : > { %v343_v9 = vld [vmem:[%s294_s27] sm:$0xff]  ;;  %v344_v10 = vld [vmem:[%s294_s27 + $0x8] sm:$0xff]  ;;  %v345_v11 = vld [vmem:[%s294_s27 + $0x10] sm:$0xff]  ;;  %s310_s13 = scalar_lea.vmem %s724_s5, %s554_s10 }
  0x12   : > { %v579_v12 = vpack.c.bf16 %v344_v10, %v343_v9  ;;  %v346_v13 = vld [vmem:[%s294_s27 + $0x18] sm:$0xff] }
  0x13   : > { %v582_v14 = vpack.c.bf16 %v346_v13, %v345_v11 }
  0x14   : > { %580 = vmatpush3.bf16.msra.mxu0 %v579_v12 }
  0x15   : > { %581 = vmatprep.subr.bf16.mxu0 %v637_v7 }
  0x18   : > { %583 = vmatpush3.bf16.msra.mxu0 %v582_v14 }
  0x95   : > { %v317_v2 = vpop.xlane.xlu0 %316 }
  0x96   : > { %v319_v3 = vmul.f32 0.03125, %v317_v2 }
  0x98   : > { %v320_v4 = vsub.f32 %v311_v0, %v319_v3 }
  0x9a   : > { %v321_v5 = vmul.f32 %v320_v4, %v320_v4 }
  0x9c   : > { %v322_v6 = vsel %vm314_vm0, %v321_v5, 0.0 }
  0x9d   : > { %323 = vadd.xlane.f32.xlu0 %v322_v6 }
 0x12a   : > { %v324_v15 = vpop.xlane.xlu0 %323 }
 0x12b   : > { %v325_v16 = vmul.f32 0.03125, %v324_v15 }
 0x12d   : > { %v326_v17 = vadd.f32 1e-05, %v325_v16 }
 0x12f   : > { %611 = vrsqrt.f32 %v326_v17 }
 0x139   : > { %v612_v18 = vpop.eup %611 }
 0x13a   : > { %v328_v20 = vmul.f32 %v612_v18, %v320_v4 }
 0x13c   : > { %v335_v22 = vmul.f32 %v555_v19, %v328_v20 }
 0x13e   : > { %v342_v23 = vadd.f32 %v556_v21, %v335_v22 }
 0x140   : > { %576 = vmatmul.mubr.msk.f32.vlgmr.msra.gmra.mrb[0].mxu0 %vm314_vm0, %v342_v23 }
 0x213   : > { %v423_v25 = vpop.f32.mrb[0].mxu0 }
 0x214   : > { %v424_v26 = vadd.f32 %v557_v24, %v423_v25  ;;  %v577_v27 = vpop.f32.mrb[1].mxu0 }
 0x216   : > { %427 = vst.msk [vmem:[%s310_s13] sm:$0xff] %vm314_vm0, %v424_v26 }
 0x217 PF: > { %s15_s20 = sadd.s32 1, %s635_s20   ;;  %s725_s18 = smov %s631_s19 }
 0x218   : > { %p12_p5 = scmp.ge.s32.totalorder %s15_s20, 5   ;;  %s726_s19 = smov %s728_s21 }
 0x21a   :  { %14 = sbr.rel (!%p12_p5) target bundleno = 2 (0x2), region = 76 }

// kernel: vit_forward.28
= control target key start
LH: loop header
LB: loop body
LE: loop exit
PB: predicated region body
PF: predicated region fallthrough
CT: control target
= control target key end

     0   :  { %vm28_vm0 = vcmask 261120   ;;  %v196_v7 = vmov 0.0|0.0   ;;  %vm197_vm1 = vmmov 0   ;;  %v198_v11 = vmov 0.0   ;;  %s259_s0 = inlined_call_operand.vmem [shape: f32[8,32], index: 0, kind: input, shape index: {}]   ;;  %s260_s1 = inlined_call_operand.vmem [shape: f32[32,128], index: 1, kind: input, shape index: {}]   ;;  %s261_s3 = inlined_call_operand.vmem [shape: f32[1,32], index: 3, kind: input, shape index: {}]   ;;  %s262_s4 = inlined_call_operand.vmem [shape: f32[1,32], index: 4, kind: input, shape index: {}]   ;;  %s263_s2 = inlined_call_operand.vmem [shape: f32[1,128], index: 2, kind: input, shape index: {}]   ;;  %s264_s5 = inlined_call_operand.vmem [shape: f32[8,128], index: 5, kind: output, shape index: {}]  }
   0x1   :  { %v25_v0 = vld [vmem:[%s259_s0] sm:$0xff]  ;;  %183 = vmatprep.subr.bf16.mxu0 %v196_v7  ;;  %v59_v9 = vld [vmem:[%s260_s1 + $0x8] sm:$0xff]  ;;  %v60_v10 = vld [vmem:[%s260_s1 + $0x10] sm:$0xff]  ;;  %180 = vmatprep.mubr.msk.f32.mxu0 %vm197_vm1, %v198_v11 }
   0x2   :  { %v29_v1 = vsel %vm28_vm0, %v25_v0, 0.0  ;;  %v58_v8 = vld [vmem:[%s260_s1] sm:$0xff]  ;;  %v61_v13 = vld [vmem:[%s260_s1 + $0x18] sm:$0xff] }
   0x3   :  { %30 = vadd.xlane.f32.xlu0 %v29_v1  ;;  %v184_v12 = vpack.c.bf16 %v59_v9, %v58_v8  ;;  %v187_v14 = vpack.c.bf16 %v61_v13, %v60_v10  ;;  %v163_v19 = vld [vmem:[%s261_s3] ss:$0 sm:$0xff] }
   0x4   :  { %v164_v21 = vld [vmem:[%s262_s4] ss:$0 sm:$0xff] }
   0x5   :  { %185 = vmatpush3.bf16.msra.mxu0 %v184_v12  ;;  %v166_v24 = vld [vmem:[%s263_s2] ss:$0 sm:$0xff] }
   0x6   :  { %186 = vmatprep.subr.bf16.mxu0 %v196_v7 }
   0x9   :  { %188 = vmatpush3.bf16.msra.mxu0 %v187_v14 }
  0x90   :  { %v31_v2 = vpop.xlane.xlu0 %30 }
  0x91   :  { %v33_v3 = vmul.f32 0.03125, %v31_v2 }
  0x93   :  { %v34_v4 = vsub.f32 %v25_v0, %v33_v3 }
  0x95   :  { %v35_v5 = vmul.f32 %v34_v4, %v34_v4 }
  0x97   :  { %v36_v6 = vsel %vm28_vm0, %v35_v5, 0.0 }
  0x98   :  { %37 = vadd.xlane.f32.xlu0 %v36_v6 }
 0x125   :  { %v38_v15 = vpop.xlane.xlu0 %37 }
 0x126   :  { %v39_v16 = vmul.f32 0.03125, %v38_v15 }
 0x128   :  { %v40_v17 = vadd.f32 1e-05, %v39_v16 }
 0x12a   :  { %192 = vrsqrt.f32 %v40_v17 }
 0x134   :  { %v193_v18 = vpop.eup %192 }
 0x135   :  { %v42_v20 = vmul.f32 %v193_v18, %v34_v4 }
 0x137   :  { %v49_v22 = vmul.f32 %v163_v19, %v42_v20 }
 0x139   :  { %v56_v23 = vadd.f32 %v164_v21, %v49_v22 }
 0x13b   :  { %181 = vmatmul.mubr.msk.f32.vlgmr.msra.gmra.mrb[0].mxu0 %vm28_vm0, %v56_v23 }
 0x20e   :  { %v131_v25 = vpop.f32.mrb[0].mxu0 }
 0x20f   :  { %v148_v26 = vadd.f32 %v166_v24, %v131_v25  ;;  %v182_v27 = vpop.f32.mrb[1].mxu0 }
 0x211   :  { %v149_v28 = vmul.f32 %v148_v26, %v148_v26 }
 0x213   :  { %v150_v29 = vmul.f32 %v149_v28, %v148_v26 }
 0x215   :  { %v151_v30 = vmul.f32 0.044715, %v150_v29 }
 0x217   :  { %v152_v31 = vadd.f32 %v151_v30, %v148_v26 }
 0x219   :  { %v153_v32 = vmul.f32 0.7978846, %v152_v31 }
 0x21b   :  { %194 = vtanh.f32 %v153_v32 }
 0x225   :  { %v195_v33 = vpop.eup %194 }
 0x226   :  { %v155_v34 = vadd.f32 1.0, %v195_v33 }
 0x228   :  { %v156_v35 = vmul.f32 0.5, %v155_v34 }
 0x22a   :  { %v157_v36 = vmul.f32 %v156_v35, %v148_v26 }
 0x22c   :  { %158 = vst [vmem:[%s264_s5] sm:$0xff] %v157_v36 }

// kernel: vit_forward.29
= control target key start
LH: loop header
LB: loop body
LE: loop exit
PB: predicated region body
PF: predicated region fallthrough
CT: control target
= control target key end

     0   :  { %vm21_vm0 = vcmask 261120   ;;  %v213_v0 = vmov 0.0|0.0   ;;  %v214_v4 = vmov 0.0   ;;  %vm215_vm1 = vmmov 0   ;;  %s304_s1 = inlined_call_operand.vmem [shape: f32[128,32], index: 1, kind: input, shape index: {}]   ;;  %s305_s0 = inlined_call_operand.vmem [shape: f32[8,128], index: 0, kind: input, shape index: {}]   ;;  %s306_s2 = inlined_call_operand.vmem [shape: f32[1,32], index: 2, kind: input, shape index: {}]   ;;  %s307_s3 = inlined_call_operand.vmem [shape: f32[8,32], index: 3, kind: input, shape index: {}]   ;;  %s308_s4 = inlined_call_operand.vmem [shape: f32[8,32], index: 4, kind: output, shape index: {}]  }
   0x1   :  { %186 = vmatprep.subr.bf16.mxu0 %v213_v0  ;;  %v25_v1 = vld [vmem:[%s304_s1] sm:$0xff]  ;;  %v26_v2 = vld [vmem:[%s304_s1 + $0x8] sm:$0xff]  ;;  %v27_v3 = vld [vmem:[%s304_s1 + $0x10] sm:$0xff]  ;;  %22 = vst.msk [vmem:[#allocation2] sm:$0xff] %vm21_vm0, %v214_v4  ;;  %183 = vmatprep.mubr.msk.f32.mxu0 %vm215_vm1, %v214_v4 }
   0x2   :  { %v187_v5 = vpack.c.bf16 %v26_v2, %v25_v1  ;;  %v28_v6 = vld [vmem:[%s304_s1 + $0x18] sm:$0xff]  ;;  %v29_v8 = vld [vmem:[%s304_s1 + $0x20] sm:$0xff]  ;;  %v30_v9 = vld [vmem:[%s304_s1 + $0x28] sm:$0xff] }
   0x3   :  { %v190_v7 = vpack.c.bf16 %v28_v6, %v27_v3  ;;  %v193_v10 = vpack.c.bf16 %v30_v9, %v29_v8  ;;  %v31_v11 = vld [vmem:[%s304_s1 + $0x30] sm:$0xff]  ;;  %v32_v12 = vld [vmem:[%s304_s1 + $0x38] sm:$0xff]  ;;  %v33_v14 = vld [vmem:[%s304_s1 + $0x40] sm:$0xff] }
   0x4   :  { %188 = vmatpush3.bf16.msra.mxu0 %v187_v5  ;;  %v196_v13 = vpack.c.bf16 %v32_v12, %v31_v11  ;;  %v34_v15 = vld [vmem:[%s304_s1 + $0x48] sm:$0xff]  ;;  %v35_v17 = vld [vmem:[%s304_s1 + $0x50] sm:$0xff]  ;;  %v36_v18 = vld [vmem:[%s304_s1 + $0x58] sm:$0xff] }
   0x5   :  { %189 = vmatprep.subr.bf16.mxu0 %v213_v0  ;;  %v199_v16 = vpack.c.bf16 %v34_v15, %v33_v14  ;;  %v202_v19 = vpack.c.bf16 %v36_v18, %v35_v17  ;;  %v37_v20 = vld [vmem:[%s304_s1 + $0x60] sm:$0xff]  ;;  %v38_v21 = vld [vmem:[%s304_s1 + $0x68] sm:$0xff]  ;;  %v39_v23 = vld [vmem:[%s304_s1 + $0x70] sm:$0xff] }
   0x6   :  { %v205_v22 = vpack.c.bf16 %v38_v21, %v37_v20  ;;  %v40_v24 = vld [vmem:[%s304_s1 + $0x78] sm:$0xff]  ;;  %v23_v26 = vld [vmem:[%s305_s0] sm:$0xff] }
   0x7   :  { %v208_v25 = vpack.c.bf16 %v40_v24, %v39_v23  ;;  %v133_v31 = vld [vmem:[%s306_s2] ss:$0 sm:$0xff] }
   0x8   :  { %191 = vmatpush3.bf16.msra.mxu0 %v190_v7  ;;  %v24_v27 = vld [vmem:[#allocation2] sm:$0xff] }
   0x9   :  { %192 = vmatprep.subr.bf16.mxu0 %v213_v0  ;;  %v126_v33 = vld [vmem:[%s307_s3] sm:$0xff] }
   0xc   :  { %194 = vmatpush3.bf16.msra.mxu0 %v193_v10 }
   0xd   :  { %195 = vmatprep.subr.bf16.mxu0 %v213_v0 }
  0x10   :  { %197 = vmatpush3.bf16.msra.mxu0 %v196_v13 }
  0x11   :  { %198 = vmatprep.subr.bf16.mxu0 %v213_v0 }
  0x14   :  { %200 = vmatpush3.bf16.msra.mxu0 %v199_v16 }
  0x15   :  { %201 = vmatprep.subr.bf16.mxu0 %v213_v0 }
  0x18   :  { %203 = vmatpush3.bf16.msra.mxu0 %v202_v19 }
  0x19   :  { %204 = vmatprep.subr.bf16.mxu0 %v213_v0 }
  0x1c   :  { %206 = vmatpush3.bf16.msra.mxu0 %v205_v22 }
  0x1d   :  { %207 = vmatprep.subr.bf16.mxu0 %v213_v0 }
  0x20   :  { %209 = vmatpush3.bf16.msra.mxu0 %v208_v25 }
  0x23   :  { %184 = vmatmul.mubr.f32.vlgmr.msra.gmra.mrb[0].mxu0 %v23_v26 }
  0xf6   :  { %v107_v28 = vpop.f32.mrb[0].mxu0 }
  0xf7   :  { %v111_v29 = vadd.f32 %v107_v28, %v24_v27  ;;  %v185_v30 = vpop.f32.mrb[1].mxu0 }
  0xf9   :  { %113 = vst.msk [vmem:[#allocation2] sm:$0xff] %vm21_vm0, %v111_v29 }
 0x100   :  { %v117_v32 = vld [vmem:[#allocation2] sm:$0xff] }
 0x101   :  { %v125_v34 = vadd.f32 %v133_v31, %v117_v32 }
 0x103   :  { %v127_v35 = vadd.f32 %v126_v33, %v125_v34 }
 0x105   :  { %128 = vst.msk [vmem:[%s308_s4] sm:$0xff] %vm21_vm0, %v127_v35 }

// kernel: vit_forward.35
= control target key start
LH: loop header
LB: loop body
LE: loop exit
PB: predicated region body
PF: predicated region fallthrough
CT: control target
= control target key end

     0   :  { %vm24_vm0 = vcmask 261120   ;;  %v197_v7 = vmov 0.0|0.0   ;;  %v198_v11 = vmov 0.0   ;;  %vm199_vm1 = vmmov 0   ;;  %s263_s0 = inlined_call_operand.vmem [shape: f32[8,32], index: 0, kind: input, shape index: {}]   ;;  %s264_s1 = inlined_call_operand.vmem [shape: f32[32,32], index: 1, kind: input, shape index: {}]   ;;  %s265_s3 = inlined_call_operand.vmem [shape: f32[1,32], index: 3, kind: input, shape index: {}]   ;;  %s266_s4 = inlined_call_operand.vmem [shape: f32[1,32], index: 4, kind: input, shape index: {}]   ;;  %s267_s2 = inlined_call_operand.vmem [shape: f32[1,32], index: 2, kind: input, shape index: {}]   ;;  %s268_s5 = inlined_call_operand.vmem [shape: f32[8,32], index: 5, kind: output, shape index: {}]  }
   0x1   :  { %v26_v0 = vld [vmem:[%s263_s0] sm:$0xff]  ;;  %184 = vmatprep.subr.bf16.mxu0 %v197_v7  ;;  %v60_v9 = vld [vmem:[%s264_s1 + $0x8] sm:$0xff]  ;;  %v61_v10 = vld [vmem:[%s264_s1 + $0x10] sm:$0xff]  ;;  %25 = vst.msk [vmem:[#allocation2] sm:$0xff] %vm24_vm0, %v198_v11  ;;  %181 = vmatprep.mubr.msk.f32.mxu0 %vm199_vm1, %v198_v11 }
   0x2   :  { %v30_v1 = vsel %vm24_vm0, %v26_v0, 0.0  ;;  %v59_v8 = vld [vmem:[%s264_s1] sm:$0xff]  ;;  %v62_v13 = vld [vmem:[%s264_s1 + $0x18] sm:$0xff] }
   0x3   :  { %31 = vadd.xlane.f32.xlu0 %v30_v1  ;;  %v185_v12 = vpack.c.bf16 %v60_v9, %v59_v8  ;;  %v188_v14 = vpack.c.bf16 %v62_v13, %v61_v10  ;;  %v164_v19 = vld [vmem:[%s265_s3] ss:$0 sm:$0xff] }
   0x4   :  { %v165_v21 = vld [vmem:[%s266_s4] ss:$0 sm:$0xff] }
   0x5   :  { %186 = vmatpush3.bf16.msra.mxu0 %v185_v12  ;;  %v167_v28 = vld [vmem:[%s267_s2] ss:$0 sm:$0xff] }
   0x6   :  { %187 = vmatprep.subr.bf16.mxu0 %v197_v7 }
   0x8   :  { %v58_v24 = vld [vmem:[#allocation2] sm:$0xff] }
   0x9   :  { %189 = vmatpush3.bf16.msra.mxu0 %v188_v14 }
  0x90   :  { %v32_v2 = vpop.xlane.xlu0 %31 }
  0x91   :  { %v34_v3 = vmul.f32 0.03125, %v32_v2 }
  0x93   :  { %v35_v4 = vsub.f32 %v26_v0, %v34_v3 }
  0x95   :  { %v36_v5 = vmul.f32 %v35_v4, %v35_v4 }
  0x97   :  { %v37_v6 = vsel %vm24_vm0, %v36_v5, 0.0 }
  0x98   :  { %38 = vadd.xlane.f32.xlu0 %v37_v6 }
 0x125   :  { %v39_v15 = vpop.xlane.xlu0 %38 }
 0x126   :  { %v40_v16 = vmul.f32 0.03125, %v39_v15 }
 0x128   :  { %v41_v17 = vadd.f32 1e-05, %v40_v16 }
 0x12a   :  { %193 = vrsqrt.f32 %v41_v17 }
 0x134   :  { %v194_v18 = vpop.eup %193 }
 0x135   :  { %v43_v20 = vmul.f32 %v194_v18, %v35_v4 }
 0x137   :  { %v50_v22 = vmul.f32 %v164_v19, %v43_v20 }
 0x139   :  { %v57_v23 = vadd.f32 %v165_v21, %v50_v22 }
 0x13b   :  { %182 = vmatmul.mubr.msk.f32.vlgmr.msra.gmra.mrb[0].mxu0 %vm24_vm0, %v57_v23 }
 0x20e   :  { %v132_v25 = vpop.f32.mrb[0].mxu0 }
 0x20f   :  { %v136_v26 = vadd.f32 %v132_v25, %v58_v24  ;;  %v183_v27 = vpop.f32.mrb[1].mxu0 }
 0x211   :  { %137 = vst.msk [vmem:[#allocation2] sm:$0xff] %vm24_vm0, %v136_v26 }
 0x218   :  { %v141_v29 = vld [vmem:[#allocation2] sm:$0xff] }
 0x219   :  { %v149_v30 = vadd.f32 %v167_v28, %v141_v29 }
 0x21b   :  { %v150_v31 = vmul.f32 %v149_v30, %v149_v30 }
 0x21d   :  { %v151_v32 = vmul.f32 %v150_v31, %v149_v30 }
 0x21f   :  { %v152_v33 = vmul.f32 0.044715, %v151_v32 }
 0x221   :  { %v153_v34 = vadd.f32 %v152_v33, %v149_v30 }
 0x223   :  { %v154_v35 = vmul.f32 0.7978846, %v153_v34 }
 0x225   :  { %195 = vtanh.f32 %v154_v35 }
 0x22f   :  { %v196_v36 = vpop.eup %195 }
 0x230   :  { %v156_v37 = vadd.f32 1.0, %v196_v36 }
 0x232   :  { %v157_v38 = vmul.f32 0.5, %v156_v37 }
 0x234   :  { %v158_v39 = vmul.f32 %v157_v38, %v149_v30 }
 0x236   :  { %159 = vst.msk [vmem:[%s268_s5] sm:$0xff] %vm24_vm0, %v158_v39 }

// kernel: vit_forward.26
= control target key start
LH: loop header
LB: loop body
LE: loop exit
PB: predicated region body
PF: predicated region fallthrough
CT: control target
= control target key end

     0   :  { %s1425_s12 = smov 0   ;;  %s1427_s13 = smov 0   ;;  %s1591_s0 = inlined_call_operand.vmem [shape: f32[3,2,4,32], index: 0, kind: input, shape index: {}, may-alias: {0,1,2}]   ;;  %s1592_s1 = inlined_call_operand.vmem [shape: f32[3,2,4,32], index: 1, kind: input, shape index: {}, may-alias: {0,1,2}]   ;;  %s1593_s2 = inlined_call_operand.vmem [shape: f32[3,2,4,32], index: 2, kind: input, shape index: {}, may-alias: {0,1,2}]   ;;  %s1594_s3 = inlined_call_operand.vmem [shape: f32[2,4,32], index: 3, kind: output, shape index: {}]  }
   0x1   :  { %s1429_s14 = smov 0  }
   0x2 LB: > { %s32_s15 = sadd.s32 1, %s1389_s13  ;;  %p1230_p0 = scmp.ge.s32.totalorder %s1393_s14, 1  ;;  %s1393_s14 = sphi %s1429_s14, %s13_s14   ;;  %s1389_s13 = sphi %s1427_s13, %s1596_s13   ;;  %s1385_s12 = sphi %s1425_s12, %s1595_s12  }
   0x3   : > { %p34_p1 = scmp.ge.s32.totalorder %s32_s15, 2  ;;  %p192_p2 = scmp.lt.s32.totalorder %s1393_s14, 3 }
   0x5   : > { %s1598_s15 = smov (%p34_p1, %s32_s15), 0  ;;  %p193_p3 = pnand %p1230_p0, %p192_p2 }
   0x6   : > { %p236_p4 = scmp.lt.s32.totalorder (!%p193_p3), %s1385_s12, 1  ;;  %v1395_v0 = vmov (!%p193_p3), 0.0   ;;  %vm1396_vm0 = vmmov (!%p193_p3), 0   ;;  %vm287_vm1 = vcmask (!%p193_p3), 64512   ;;  %vm270_vm2 = vcmask (!%p193_p3), 3072   ;;  %s1399_s23 = smov (!%p193_p3), 120  }
   0x7   : > { %196 = sbr.rel (%p193_p3) target bundleno = 1447 (0x5a7), region = 32  ;;  %1271 = vmatprep.subr.mxu0 (!%p193_p3), %v1395_v0  ;;  %1273 = vmatprep.mubr.msk.f32.mxu0 (!%p193_p3), %vm1396_vm0, %v1395_v0  ;;  %v1397_v3 = vmov (!%p193_p3), -1e+30   ;;  %275 = vst.msk [vmem:[#allocation3] sm:$0xf] (!%p193_p3), %vm270_vm2, %v1395_v0  ;;  %vm366_vm3 = vcmask (!%p193_p3), 27648  }
   0x8   : > { %1276 = vmatprep.subr.mxu1 (!%p193_p3), %v1395_v0  ;;  %1278 = vmatprep.mubr.msk.f32.mxu1 (!%p193_p3), %vm1396_vm0, %v1395_v0  ;;  %271 = vst.msk [vmem:[#allocation2] sm:$0xf] (!%p193_p3), %vm270_vm2, %v1397_v3  ;;  %272 = vst.msk [vmem:[#allocation2 + $0x4] sm:$0xf] (!%p193_p3), %vm270_vm2, %v1397_v3  ;;  %v1398_v8 = vmov (!%p193_p3), 0   ;;  %s1400_s24 = smov (!%p193_p3), 112  }
   0x9   : > { %273 = vst.msk [vmem:[#allocation2 + $0x8] sm:$0xf] (!%p193_p3), %vm270_vm2, %v1397_v3  ;;  %274 = vst.msk [vmem:[#allocation2 + $0xc] sm:$0xf] (!%p193_p3), %vm270_vm2, %v1397_v3  ;;  %1345 = vset.pattern.permute.xlu0 (!%p193_p3), %v1398_v8  ;;  %1346 = vset.pattern.permute.xlu1 (!%p193_p3), %v1398_v8  ;;  %s1401_s25 = smov (!%p193_p3), 104   ;;  %vm401_vm4 = vcmask (!%p193_p3), 1043456  }
   0xa   : > { %276 = vst.msk [vmem:[#allocation3 + $0x4] sm:$0xf] (!%p193_p3), %vm270_vm2, %v1395_v0  ;;  %277 = vst.msk [vmem:[#allocation3 + $0x8] sm:$0xf] (!%p193_p3), %vm270_vm2, %v1395_v0  ;;  %vm397_vm5 = vcmask (!%p193_p3), 31744   ;;  %vm279_vm6 = vcmask (!%p193_p3), 60416  }
   0xb   : > { %278 = vst.msk [vmem:[#allocation3 + $0xc] sm:$0xf] (!%p193_p3), %vm270_vm2, %v1395_v0  ;;  %s1402_s5 = smov (!%p193_p3), 8   ;;  %s1403_s6 = smov (!%p193_p3), 16   ;;  %vm1081_vm7 = vcmask (!%p193_p3), 126016   ;;  %vm1096_vm8 = vcmask (!%p193_p3), 191616  }
   0xc   : > { %281 = vst.msk [vmem:[#allocation4 + $0x4] sm:$0xf] (!%p193_p3), %vm279_vm6, %v1395_v0  ;;  %280 = vst.msk [vmem:[#allocation4] sm:$0xf] (!%p193_p3), %vm279_vm6, %v1395_v0  ;;  %s1404_s7 = smov (!%p193_p3), 24   ;;  %vm1111_vm9 = vcmask (!%p193_p3), 257216  }
   0xd   : > { %282 = vst.msk [vmem:[#allocation4 + $0x8] sm:$0xf] (!%p193_p3), %vm279_vm6, %v1395_v0  ;;  %283 = vst.msk [vmem:[#allocation4 + $0xc] sm:$0xf] (!%p193_p3), %vm279_vm6, %v1395_v0 }
   0xe   : > { %s1600_s12 = smov (!%p236_p4, %s1385_s12), 1 }
   0xf   : > { %s1449_s16 = sshll.u32 %s1600_s12, 2  ;;  %v1483_v9 = vld [vmem:[#allocation2] sm:$0xf]  ;;  %v559_v38 = vld [vmem:[#allocation2 + $0x4] sm:$0xf] }
  0x10   : > { %s1168_s19 = scalar_lea.vmem %s1592_s1, %s1449_s16  ;;  %s242_s22 = scalar_lea.vmem %s1591_s0, %s1449_s16  ;;  %v1522_v41 = vld [vmem:[#allocation2 + $0x8] sm:$0xf]  ;;  %v943_v45 = vld [vmem:[#allocation2 + $0xc] sm:$0xf] }
  0x11   : > { %v1235_v1 = vld [vmem:[%s1168_s19 + $0x8] sm:$0xf]  ;;  %v284_v2 = vld [vmem:[%s242_s22] sm:$0xf]  ;;  %s1172_s28 = scalar_lea.vmem %s1593_s2, %s1449_s16  ;;  %s1572_s4 = scalar_lea.vmem %s1594_s3, %s1449_s16 }
  0x12   : > { %1272 = vmatpush3.xpose.msk.msra.mxu0 %vm287_vm1, %v1235_v1  ;;  %481 = vrot.lane.b32.xlu1 %v1235_v1, %s1399_s23  ;;  %v1497_v13 = vld [vmem:[%s1172_s28 + $0x10] sm:$0xf] }
  0x13   : > { %1286 = vmatprep.subr.mxu0 %v1395_v0  ;;  %1277 = vmatpush3.msk.msra.mxu1 %vm401_vm4, %v1497_v13 }
  0x14   : > { %1281 = vmatprep.subr.mxu1 %v1395_v0 }
  0x15   : > { %1274 = vmatmul.mubr.msk.f32.vlgmr.msra.gmra.mrb[0].mxu0 %vm287_vm1, %v284_v2 }
  0x16   : > { %1288 = vmatprep.mubr.msk.f32.mxu0 %vm1396_vm0, %v1395_v0  ;;  %479 = vrot.lane.b32.xlu1 %v284_v2, %s1399_s23 }
  0x1a   : > { %673 = vrot.lane.b32.xlu1 %v1235_v1, %s1400_s24 }
  0x1e   : > { %671 = vrot.lane.b32.xlu1 %v284_v2, %s1400_s24 }
  0x22   : > { %865 = vrot.lane.b32.xlu1 %v1235_v1, %s1401_s25 }
  0x26   : > { %863 = vrot.lane.b32.xlu1 %v284_v2, %s1401_s25 }
  0x84   : > { %v482_v14 = vpop.permute.xlu1 %481 }
  0x88   : > { %v480_v17 = vpop.permute.xlu1 %479 }
  0x8c   : > { %v674_v19 = vpop.permute.xlu1 %673 }
  0x90   : > { %v672_v20 = vpop.permute.xlu1 %671 }
  0x94   : > { %v866_v22 = vpop.permute.xlu1 %865 }
  0x98   : > { %v864_v23 = vpop.permute.xlu1 %863 }
  0xe8   : > { %v360_v4 = vpop.f32.mrb[0].mxu0 }
  0xe9   : > { %v364_v5 = vmul.f32 0.35355338, %v360_v4  ;;  %v1275_v6 = vpop.f32.mrb[1].mxu0 }
  0xeb   : > { %v367_v7 = vsel %vm366_vm3, %v364_v5, -inf }
  0xec   : > { %368 = vmax.xlane.f32.xlu0 %v367_v7 }
 0x179   : > { %v369_v10 = vpop.xlane.xlu0 %368 }
 0x17a   : > { %v1486_v11 = vmax.f32 %v1483_v9, %v369_v10 }
 0x17c   : > { %v371_v12 = vsub.f32 %v1483_v9, %v1486_v11  ;;  %478 = vst.msk [vmem:[#allocation2] sm:$0xf] %vm270_vm2, %v1486_v11  ;;  %376 = vperm.xlu0 %1345, %v1486_v11  }
 0x17e   : > { %v372_v8 = vmul.f32 1.442695, %v371_v12  ;;  %v382_v12 = vld [vmem:[#allocation3] sm:$0xf] }
 0x1fb   : > { %v377_v15 = vpop.permute.xlu0 %376 }
 0x1fc   : > { %v379_v16 = vsub.f32 %v364_v5, %v377_v15 }
 0x1fe   : > { %v380_v18 = vmul.f32 1.442695, %v379_v16 }
 0x200   : > { %1347 = vpow2.f32 %v380_v18 }
 0x20a   : > { %v1348_v21 = vpop.eup %1347 }
 0x20b   : > { %1279 = vmatmul.mubr.msk.f32.vlgmr.msra.gmra.mrb[0].mxu1 %vm397_vm5, %v1348_v21  ;;  %v384_v50 = vsel %vm366_vm3, %v1348_v21, 0.0 }
 0x20c   : > { %1282 = vmatpush3.xpose.msk.msra.mxu1 %vm287_vm1, %v482_v14  ;;  %1283 = vmatprep.mubr.msk.f32.mxu1 %vm1396_vm0, %v1395_v0 }
 0x20d   : > { %1291 = vmatprep.subr.mxu1 %v1395_v0 }
 0x20f   : > { %1284 = vmatmul.mubr.msk.f32.vlgmr.msra.gmra.mrb[2].mxu1 %vm287_vm1, %v480_v17 }
 0x210   : > { %1292 = vmatpush3.xpose.msk.msra.mxu1 %vm287_vm1, %v674_v19  ;;  %1293 = vmatprep.mubr.msk.f32.mxu1 %vm1396_vm0, %v1395_v0  ;;  %v576_v19 = vld [vmem:[#allocation3 + $0x4] sm:$0xf] }
 0x211   : > { %1301 = vmatprep.subr.mxu1 %v1395_v0 }
 0x213   : > { %1294 = vmatmul.mubr.msk.f32.vlgmr.msra.gmra.mrb[4].mxu1 %vm287_vm1, %v672_v20 }
 0x214   : > { %1302 = vmatpush3.xpose.msk.msra.mxu1 %vm287_vm1, %v866_v22  ;;  %1303 = vmatprep.mubr.msk.f32.mxu1 %vm1396_vm0, %v1395_v0  ;;  %v768_v22 = vld [vmem:[#allocation3 + $0x8] sm:$0xf] }
 0x217   : > { %1304 = vmatmul.mubr.msk.f32.vlgmr.msra.gmra.mrb[6].mxu1 %vm287_vm1, %v864_v23 }
 0x2de   : > { %v1517_v24 = vpop.f32.mrb[0].mxu1 }
 0x2df   : > { %v1280_v25 = vpop.f32.mrb[1].mxu1 }
 0x2e2   : > { %v553_v26 = vpop.f32.mrb[2].mxu1 }
 0x2e3   : > { %v557_v27 = vmul.f32 0.35355338, %v553_v26  ;;  %v1285_v28 = vpop.f32.mrb[3].mxu1 }
 0x2e5   : > { %v560_v29 = vsel %vm366_vm3, %v557_v27, -inf }
 0x2e6   : > { %561 = vmax.xlane.f32.xlu1 %v560_v29  ;;  %v745_v30 = vpop.f32.mrb[4].mxu1 }
 0x2e7   : > { %v749_v31 = vmul.f32 0.35355338, %v745_v30  ;;  %v1295_v32 = vpop.f32.mrb[5].mxu1 }
 0x2e9   : > { %v752_v33 = vsel %vm366_vm3, %v749_v31, -inf }
 0x2ea   : > { %753 = vmax.xlane.f32.xlu0 %v752_v33  ;;  %v937_v34 = vpop.f32.mrb[6].mxu1  ;;  %v390_v33 = vld [vmem:[#allocation4] sm:$0xf] }
 0x2eb   : > { %v941_v35 = vmul.f32 0.35355338, %v937_v34  ;;  %v1305_v36 = vpop.f32.mrb[7].mxu1 }
 0x2ed   : > { %v944_v37 = vsel %vm366_vm3, %v941_v35, -inf }
 0x2ee   : > { %945 = vmax.xlane.f32.xlu1 %v944_v37 }
 0x373   : > { %v562_v39 = vpop.xlane.xlu1 %561 }
 0x374   : > { %v563_v40 = vmax.f32 %v559_v38, %v562_v39 }
 0x376   : > { %v564_v42 = vsub.f32 %v559_v38, %v563_v40  ;;  %670 = vst.msk [vmem:[#allocation2 + $0x4] sm:$0xf] %vm270_vm2, %v563_v40  ;;  %569 = vperm.xlu1 %1346, %v563_v40  }
 0x377   : > { %v754_v43 = vpop.xlane.xlu0 %753 }
 0x378   : > { %v755_v44 = vmax.f32 %v1522_v41, %v754_v43  ;;  %v565_v5 = vmul.f32 1.442695, %v564_v42 }
 0x37a   : > { %v756_v46 = vsub.f32 %v1522_v41, %v755_v44  ;;  %862 = vst.msk [vmem:[#allocation2 + $0x8] sm:$0xf] %vm270_vm2, %v755_v44  ;;  %761 = vperm.xlu0 %1345, %v755_v44  }
 0x37b   : > { %v946_v47 = vpop.xlane.xlu1 %945 }
 0x37c   : > { %v947_v48 = vmax.f32 %v943_v45, %v946_v47  ;;  %v757_v10 = vmul.f32 1.442695, %v756_v46  ;;  %v584_v46 = vld [vmem:[#allocation4 + $0x4] sm:$0xf] }
 0x37e   : > { %v948_v49 = vsub.f32 %v943_v45, %v947_v48  ;;  %1054 = vst.msk [vmem:[#allocation2 + $0xc] sm:$0xf] %vm270_vm2, %v947_v48  ;;  %953 = vperm.xlu1 %1346, %v947_v48   ;;  %v776_v48 = vld [vmem:[#allocation4 + $0x8] sm:$0xf] }
 0x380   : > { %v949_v7 = vmul.f32 1.442695, %v948_v49 }
 0x382   : > { %591 = vrot.lane.b32.xlu1 %v1497_v13, %s1399_s23 }
 0x386   : > { %783 = vrot.lane.b32.xlu1 %v1497_v13, %s1400_s24 }
 0x38a   : > { %975 = vrot.lane.b32.xlu1 %v1497_v13, %s1401_s25 }
 0x3ae   : > { %385 = vadd.xlane.f32.xlu1 %v384_v50 }
 0x3f5   : > { %v570_v51 = vpop.permute.xlu1 %569 }
 0x3f6   : > { %v572_v52 = vsub.f32 %v557_v27, %v570_v51  ;;  %v960_v27 = vld [vmem:[#allocation3 + $0xc] sm:$0xf] }
 0x3f8   : > { %v573_v53 = vmul.f32 1.442695, %v572_v52 }
 0x3f9   : > { %v762_v54 = vpop.permute.xlu0 %761 }
 0x3fa   : > { %1349 = vpow2.f32 %v573_v53  ;;  %v764_v55 = vsub.f32 %v749_v31, %v762_v54  ;;  %v968_v54 = vld [vmem:[#allocation4 + $0xc] sm:$0xf] }
 0x3fc   : > { %v765_v56 = vmul.f32 1.442695, %v764_v55 }
 0x3fd   : > { %v954_v57 = vpop.permute.xlu1 %953 }
 0x3fe   : > { %1351 = vpow2.f32 %v765_v56  ;;  %v956_v58 = vsub.f32 %v941_v35, %v954_v57 }
 0x400   : > { %v957_v59 = vmul.f32 1.442695, %v956_v58 }
 0x401   : > { %v592_v60 = vpop.permute.xlu1 %591 }
 0x402   : > { %1353 = vpow2.f32 %v957_v59  ;;  %1287 = vmatpush3.msk.msra.mxu0 %vm401_vm4, %v592_v60 }
 0x403   : > { %1296 = vmatprep.subr.mxu0 %v1395_v0  ;;  %1355 = vpow2.f32 %v565_v5 }
 0x404   : > { %v1350_v61 = vpop.eup %1349  ;;  %1357 = vpow2.f32 %v949_v7 }
 0x405   : > { %1289 = vmatmul.mubr.msk.f32.vlgmr.msra.gmra.mrb[2].mxu0 %vm397_vm5, %v1350_v61  ;;  %v578_v62 = vsel %vm366_vm3, %v1350_v61, 0.0  ;;  %v784_v63 = vpop.permute.xlu1 %783  ;;  %1359 = vpow2.f32 %v372_v8 }
 0x406   : > { %579 = vadd.xlane.f32.xlu0 %v578_v62  ;;  %1297 = vmatpush3.msk.msra.mxu0 %vm401_vm4, %v784_v63  ;;  %1361 = vpow2.f32 %v757_v10 }
 0x407   : > { %1298 = vmatprep.mubr.msk.f32.mxu0 %vm1396_vm0, %v1395_v0  ;;  %1306 = vmatprep.subr.mxu0 %v1395_v0 }
 0x408   : > { %v1352_v1 = vpop.eup %1351 }
 0x409   : > { %1299 = vmatmul.mubr.msk.f32.vlgmr.msra.gmra.mrb[4].mxu0 %vm397_vm5, %v1352_v1  ;;  %v770_v2 = vsel %vm366_vm3, %v1352_v1, 0.0  ;;  %v976_v3 = vpop.permute.xlu1 %975 }
 0x40a   : > { %771 = vadd.xlane.f32.xlu1 %v770_v2  ;;  %1307 = vmatpush3.msk.msra.mxu0 %vm401_vm4, %v976_v3 }
 0x40b   : > { %1308 = vmatprep.mubr.msk.f32.mxu0 %vm1396_vm0, %v1395_v0 }
 0x40c   : > { %v1354_v4 = vpop.eup %1353 }
 0x40d   : > { %1309 = vmatmul.mubr.msk.f32.vlgmr.msra.gmra.mrb[6].mxu0 %vm397_vm5, %v1354_v4  ;;  %v962_v6 = vsel %vm366_vm3, %v1354_v4, 0.0  ;;  %v1356_v13 = vpop.eup %1355 }
 0x40e   : > { %963 = vadd.xlane.f32.xlu0 %v962_v6  ;;  %v1358_v14 = vpop.eup %1357  ;;  %v577_v20 = vmul.f32 %v1356_v13, %v576_v19 }
 0x40f   : > { %v1360_v9 = vpop.eup %1359  ;;  %v961_v29 = vmul.f32 %v1358_v14, %v960_v27 }
 0x410   : > { %v1362_v11 = vpop.eup %1361  ;;  %v383_v15 = vmul.f32 %v1360_v9, %v382_v12 }
 0x411   : > { %v769_v25 = vmul.f32 %v1362_v11, %v768_v22 }
 0x41b   : > { %587 = vperm.xlu1 %1346, %v1356_v13  }
 0x41f   : > { %971 = vperm.xlu1 %1346, %v1358_v14  }
 0x424   : > { %393 = vperm.xlu0 %1345, %v1360_v9  }
 0x428   : > { %779 = vperm.xlu0 %1345, %v1362_v11  }
 0x43b   : > { %v386_v16 = vpop.xlane.xlu1 %385 }
 0x43c   : > { %v387_v17 = vadd.f32 %v386_v16, %v383_v15 }
 0x43e   : > { %389 = vst.msk [vmem:[#allocation3] sm:$0xf] %vm270_vm2, %v387_v17 }
 0x445   : > { %v1058_v18 = vld [vmem:[#allocation3] sm:$0xf] }
 0x446   : > { %1363 = vrcp.f32 %v1058_v18 }
 0x450   : > { %v1364_v0 = vpop.eup %1363 }
 0x451   : > { %1063 = vperm.xlu1 %1346, %v1364_v0  }
 0x493   : > { %v580_v21 = vpop.xlane.xlu0 %579 }
 0x494   : > { %v581_v23 = vadd.f32 %v580_v21, %v577_v20 }
 0x496   : > { %582 = vst.msk [vmem:[#allocation3 + $0x4] sm:$0xf] %vm270_vm2, %v581_v23 }
 0x497   : > { %v772_v26 = vpop.xlane.xlu1 %771 }
 0x498   : > { %v773_v28 = vadd.f32 %v772_v26, %v769_v25 }
 0x49a   : > { %774 = vst.msk [vmem:[#allocation3 + $0x8] sm:$0xf] %vm270_vm2, %v773_v28 }
 0x49b   : > { %v964_v30 = vpop.xlane.xlu0 %963  ;;  %v588_v42 = vpop.permute.xlu1 %587 }
 0x49c   : > { %v965_v31 = vadd.f32 %v964_v30, %v961_v29  ;;  %v590_v47 = vmul.f32 %v588_v42, %v584_v46 }
 0x49d   : > { %v1068_v32 = vld [vmem:[#allocation3 + $0x4] sm:$0xf] }
 0x49e   : > { %966 = vst.msk [vmem:[#allocation3 + $0xc] sm:$0xf] %vm270_vm2, %v965_v31  ;;  %1365 = vrcp.f32 %v1068_v32 }
 0x49f   : > { %v972_v43 = vpop.permute.xlu1 %971 }
 0x4a0   : > { %v974_v58 = vmul.f32 %v972_v43, %v968_v54 }
 0x4a1   : > { %v1083_v34 = vld [vmem:[#allocation3 + $0x8] sm:$0xf] }
 0x4a2   : > { %1367 = vrcp.f32 %v1083_v34 }
 0x4a3   : > { %v394_v35 = vpop.permute.xlu0 %393 }
 0x4a4   : > { %v396_v36 = vmul.f32 %v394_v35, %v390_v33 }
 0x4a5   : > { %v1098_v37 = vld [vmem:[#allocation3 + $0xc] sm:$0xf] }
 0x4a6   : > { %v475_v38 = vadd.f32 %v1517_v24, %v396_v36  ;;  %1369 = vrcp.f32 %v1098_v37 }
 0x4a7   : > { %v780_v49 = vpop.permute.xlu0 %779 }
 0x4a8   : > { %v1366_v39 = vpop.eup %1365  ;;  %477 = vst.msk [vmem:[#allocation4] sm:$0xf] %vm279_vm6, %v475_v38  ;;  %v782_v53 = vmul.f32 %v780_v49, %v776_v48 }
 0x4a9   : > { %1073 = vperm.xlu0 %1345, %v1366_v39  }
 0x4ac   : > { %v1368_v40 = vpop.eup %1367 }
 0x4ad   : > { %1088 = vperm.xlu0 %1345, %v1368_v40  }
 0x4af   : > { %v1060_v44 = vld [vmem:[#allocation4] sm:$0xf] }
 0x4b0   : > { %v1370_v41 = vpop.eup %1369 }
 0x4b1   : > { %1103 = vperm.xlu0 %1345, %v1370_v41  }
 0x4d0   : > { %v1064_v45 = vpop.permute.xlu1 %1063 }
 0x4d1   : > { %v1066_v24 = vmul.f32 %v1064_v45, %v1060_v44 }
 0x4d3   : > { %1067 = vst.msk [vmem:[%s1572_s4] sm:$0xf] %vm279_vm6, %v1066_v24 }
 0x4d8   : > { %v664_v50 = vpop.f32.mrb[2].mxu0 }
 0x4d9   : > { %v668_v51 = vadd.f32 %v664_v50, %v590_v47  ;;  %v1290_v52 = vpop.f32.mrb[3].mxu0 }
 0x4db   : > { %669 = vst.msk [vmem:[#allocation4 + $0x4] sm:$0xf] %vm279_vm6, %v668_v51 }
 0x4dc   : > { %v856_v55 = vpop.f32.mrb[4].mxu0 }
 0x4dd   : > { %v860_v56 = vadd.f32 %v856_v55, %v782_v53  ;;  %v1300_v57 = vpop.f32.mrb[5].mxu0 }
 0x4df   : > { %861 = vst.msk [vmem:[#allocation4 + $0x8] sm:$0xf] %vm279_vm6, %v860_v56 }
 0x4e0   : > { %v1048_v59 = vpop.f32.mrb[6].mxu0 }
 0x4e1   : > { %v1052_v60 = vadd.f32 %v1048_v59, %v974_v58  ;;  %v1310_v61 = vpop.f32.mrb[7].mxu0 }
 0x4e2   : > { %v1070_v63 = vld [vmem:[#allocation4 + $0x4] sm:$0xf] }
 0x4e3   : > { %1053 = vst.msk [vmem:[#allocation4 + $0xc] sm:$0xf] %vm279_vm6, %v1052_v60 }
 0x4e6   : > { %v1085_v3 = vld [vmem:[#allocation4 + $0x8] sm:$0xf] }
 0x4ea   : > { %v1100_v6 = vld [vmem:[#allocation4 + $0xc] sm:$0xf] }
 0x528   : > { %v1074_v62 = vpop.permute.xlu0 %1073 }
 0x529   : > { %v1076_v1 = vmul.f32 %v1074_v62, %v1070_v63 }
 0x52b   : > { %1078 = vrot.lane.b32.xlu1 %v1076_v1, %s1402_s5 }
 0x52c   : > { %v1089_v2 = vpop.permute.xlu0 %1088 }
 0x52d   : > { %v1091_v4 = vmul.f32 %v1089_v2, %v1085_v3 }
 0x52f   : > { %1093 = vrot.lane.b32.xlu1 %v1091_v4, %s1403_s6 }
 0x530   : > { %v1104_v5 = vpop.permute.xlu0 %1103 }
 0x531   : > { %v1106_v7 = vmul.f32 %v1104_v5, %v1100_v6 }
 0x533   : > { %1108 = vrot.lane.b32.xlu1 %v1106_v7, %s1404_s7 }
 0x59d   : > { %v1079_v8 = vpop.permute.xlu1 %1078 }
 0x59e   : > { %1082 = vst.msk [vmem:[%s1572_s4] sm:$0xf] %vm1081_vm7, %v1079_v8 }
 0x5a1   : > { %v1094_v10 = vpop.permute.xlu1 %1093 }
 0x5a2   : > { %1097 = vst.msk [vmem:[%s1572_s4] sm:$0xf] %vm1096_vm8, %v1094_v10 }
 0x5a5   : > { %v1109_v13 = vpop.permute.xlu1 %1108 }
 0x5a6   : > { %1112 = vst.msk [vmem:[%s1572_s4] sm:$0xf] %vm1111_vm9, %v1109_v13 }
 0x5a7 PF: > { %s13_s14 = sadd.s32 1, %s1393_s14   ;;  %s1595_s12 = smov %s1389_s13 }
 0x5a8   : > { %p10_p5 = scmp.ge.s32.totalorder %s13_s14, 4   ;;  %s1596_s13 = smov %s1598_s15 }
 0x5aa   :  { %12 = sbr.rel (!%p10_p5) target bundleno = 2 (0x2), region = 85 }

// kernel: vit_forward.36
= control target key start
LH: loop header
LB: loop body
LE: loop exit
PB: predicated region body
PF: predicated region fallthrough
CT: control target
= control target key end

     0   :  { %vm18_vm0 = vcmask 261120   ;;  %v157_v0 = vmov 0.0|0.0   ;;  %v158_v4 = vmov 0.0   ;;  %vm159_vm1 = vmmov 0   ;;  %s205_s1 = inlined_call_operand.vmem [shape: f32[32,32], index: 1, kind: input, shape index: {}]   ;;  %s206_s0 = inlined_call_operand.vmem [shape: f32[8,32], index: 0, kind: input, shape index: {}]   ;;  %s207_s2 = inlined_call_operand.vmem [shape: f32[1,32], index: 2, kind: input, shape index: {}]   ;;  %s208_s3 = inlined_call_operand.vmem [shape: f32[8,32], index: 3, kind: output, shape index: {}]  }
   0x1   :  { %146 = vmatprep.subr.bf16.mxu0 %v157_v0  ;;  %v22_v1 = vld [vmem:[%s205_s1] sm:$0xff]  ;;  %v23_v2 = vld [vmem:[%s205_s1 + $0x8] sm:$0xff]  ;;  %v24_v3 = vld [vmem:[%s205_s1 + $0x10] sm:$0xff]  ;;  %19 = vst.msk [vmem:[#allocation2] sm:$0xff] %vm18_vm0, %v158_v4  ;;  %143 = vmatprep.mubr.msk.f32.mxu0 %vm159_vm1, %v158_v4 }
   0x2   :  { %v147_v5 = vpack.c.bf16 %v23_v2, %v22_v1  ;;  %v25_v6 = vld [vmem:[%s205_s1 + $0x18] sm:$0xff]  ;;  %v20_v8 = vld [vmem:[%s206_s0] sm:$0xff] }
   0x3   :  { %v150_v7 = vpack.c.bf16 %v25_v6, %v24_v3  ;;  %v129_v13 = vld [vmem:[%s207_s2] ss:$0 sm:$0xff] }
   0x4   :  { %148 = vmatpush3.bf16.msra.mxu0 %v147_v5 }
   0x5   :  { %149 = vmatprep.subr.bf16.mxu0 %v157_v0 }
   0x8   :  { %151 = vmatpush3.bf16.msra.mxu0 %v150_v7  ;;  %v21_v9 = vld [vmem:[#allocation2] sm:$0xff] }
   0xb   :  { %144 = vmatmul.mubr.msk.f32.vlgmr.msra.gmra.mrb[0].mxu0 %vm18_vm0, %v20_v8 }
  0xde   :  { %v96_v10 = vpop.f32.mrb[0].mxu0 }
  0xdf   :  { %v100_v11 = vadd.f32 %v96_v10, %v21_v9  ;;  %v145_v12 = vpop.f32.mrb[1].mxu0 }
  0xe1   :  { %101 = vst.msk [vmem:[#allocation2] sm:$0xff] %vm18_vm0, %v100_v11 }
  0xe8   :  { %v105_v14 = vld [vmem:[#allocation2] sm:$0xff] }
  0xe9   :  { %v113_v15 = vadd.f32 %v129_v13, %v105_v14 }
  0xeb   :  { %v114_v16 = vmul.f32 %v113_v15, %v113_v15 }
  0xed   :  { %v115_v17 = vmul.f32 %v114_v16, %v113_v15 }
  0xef   :  { %v116_v18 = vmul.f32 0.044715, %v115_v17 }
  0xf1   :  { %v117_v19 = vadd.f32 %v116_v18, %v113_v15 }
  0xf3   :  { %v118_v20 = vmul.f32 0.7978846, %v117_v19 }
  0xf5   :  { %155 = vtanh.f32 %v118_v20 }
  0xff   :  { %v156_v21 = vpop.eup %155 }
 0x100   :  { %v120_v22 = vadd.f32 1.0, %v156_v21 }
 0x102   :  { %v121_v23 = vmul.f32 0.5, %v120_v22 }
 0x104   :  { %v122_v24 = vmul.f32 %v121_v23, %v113_v15 }
 0x106   :  { %123 = vst.msk [vmem:[%s208_s3] sm:$0xff] %vm18_vm0, %v122_v24 }

// kernel: vit_forward.37
= control target key start
LH: loop header
LB: loop body
LE: loop exit
PB: predicated region body
PF: predicated region fallthrough
CT: control target
= control target key end

     0   :  { %vm19_vm0 = vcmask 523264   ;;  %v147_v3 = vmov 0.0   ;;  %vm32_vm1 = vcmask 261120   ;;  %v119_v14 = vlaneseq  ;;  %s207_s1 = inlined_call_operand.vmem [shape: f32[32,192], index: 1, kind: input, shape index: {}]   ;;  %s208_s0 = inlined_call_operand.vmem [shape: f32[8,32], index: 0, kind: input, shape index: {}]   ;;  %s209_s2 = inlined_call_operand.vmem [shape: f32[1,192], index: 2, kind: input, shape index: {}]   ;;  %s210_s3 = inlined_call_operand.vmem [shape: f32[8,192], index: 3, kind: output, shape index: {}]  }
   0x1   :  { %v25_v0 = vld [vmem:[%s207_s1 + $0x8] sm:$0xff]  ;;  %v27_v1 = vld [vmem:[%s207_s1 + $0x18] sm:$0xff]  ;;  %v24_v2 = vld [vmem:[%s207_s1] sm:$0xff]  ;;  %20 = vst.msk [vmem:[#allocation2 + $0x8] sm:$0xff] %vm19_vm0, %v147_v3  ;;  %100 = vmatprep.mubr.f32.mxu0 %v147_v3 }
   0x2   :  { %v138_v4 = vpack.c.bf16 %v27_v1, %v25_v0  ;;  %v26_v5 = vld [vmem:[%s207_s1 + $0x10] sm:$0xff]  ;;  %v29_v6 = vld [vmem:[%s207_s1 + $0x28] sm:$0xff]  ;;  %v31_v7 = vld [vmem:[%s207_s1 + $0x38] sm:$0xff]  ;;  %v120_v15 = vshrl.u32 %v119_v14, 7 }
   0x3   :  { %v140_v8 = vpack.c.bf16 %v26_v5, %v24_v2  ;;  %v142_v9 = vpack.c.bf16 %v31_v7, %v29_v6  ;;  %v28_v10 = vld [vmem:[%s207_s1 + $0x20] sm:$0xff]  ;;  %v30_v11 = vld [vmem:[%s207_s1 + $0x30] sm:$0xff] }
   0x4   :  { %139 = vmatprep.subr.bf16.mxu0 %v138_v4  ;;  %v144_v12 = vpack.c.bf16 %v30_v11, %v28_v10  ;;  %v21_v13 = vld [vmem:[%s208_s0] sm:$0xff]  ;;  %v121_v16 = vsub.s32 0, %v120_v15  ;;  %v125_v24 = vsub.s32 1, %v120_v15 }
   0x5   :  { %141 = vmatpush1.bf16.msra.mxu0 %v140_v8  ;;  %v117_v17 = vld [vmem:[%s209_s2] sm:$0x3] }
   0x6   :  { %143 = vmatprep.subr.bf16.mxu0 %v142_v9  ;;  %v122_v18 = vrot.slane %v117_v17, %v121_v16  ;;  %v126_v25 = vrot.slane %v117_v17, %v125_v24 }
   0x8   :  { %v23_v19 = vld [vmem:[#allocation2 + $0x8] sm:$0xff] }
   0x9   :  { %145 = vmatpush1.bf16.msra.mxu0 %v144_v12 }
   0xc   :  { %137 = vmatmul.mubr.msk.f32.vlgmr.msra.gmra.mrb[0].mxu0 %vm32_vm1, %v21_v13 }
  0xdf   :  { %v102_v20 = vpop.f32.mrb[0].mxu0 }
  0xe0   :  { %v104_v21 = vpop.f32.mrb[1].mxu0  ;;  %v129_v23 = vadd.f32 %v122_v18, %v102_v20 }
  0xe1   :  { %v108_v22 = vadd.f32 %v104_v21, %v23_v19 }
  0xe2   :  { %131 = vst [vmem:[%s210_s3] sm:$0xff] %v129_v23 }
  0xe3   :  { %111 = vst.msk [vmem:[#allocation2 + $0x8] sm:$0xff] %vm19_vm0, %v108_v22 }
  0xea   :  { %v116_v26 = vld [vmem:[#allocation2 + $0x8] sm:$0xff] }
  0xeb   :  { %v130_v27 = vadd.f32 %v126_v25, %v116_v26 }
  0xed   :  { %132 = vst.msk [vmem:[%s210_s3 + $0x8] sm:$0xff] %vm19_vm0, %v130_v27 }

</bundles_post_ra>
